<compile_context>
chip_gen: v6e
topology: v6e:2x2x1
jax: 0.10.0
libtpu: 0.0.40
codegen_flags: <defaults>
</compile_context>

<pallas_src>
import functools

import jax
import jax.numpy as jnp
from jax import lax
from jax.experimental import pallas as pl
from jax.experimental.pallas import tpu as pltpu

BN_EPS = 1e-5
LANE = 128


def _round_up(x, m):
    return ((x + m - 1) // m) * m


def _full_spec(shape):
    """BlockSpec covering the whole array (resident in VMEM every step)."""
    zeros = (0,) * len(shape)
    return pl.BlockSpec(shape, lambda i, _z=zeros: _z)


# ----------------------- fused multi-block (segment) kernel ------------------

def _make_segment_kernel(cfgs, *, ho, wo):
    """Kernel running a list of BasicBlocks for ONE batch element.

    Per grid step (one batch element) the refs are:
      xph : (s*s, Hph, Wph, cin0) f32  padded input, phase-decomposed for the
            first block's stride (tap (ky,kx) is a contiguous window of phase
            (ky%s, kx%s)).
      per block: w1 (9,cin,coutp) bf16, w2 (9,cout,coutp) bf16,
                 [wsc (cin,coutp) bf16 when in!=out],
                 s1,b1 (1,cin) f32, s2,b2 (1,cout) f32  (folded BN).
      o   : (ho*wo, cout) f32.
      hpad: (ho+2, wo+2, cout) f32 scratch (zero halo) feeding every stride-1
            3x3 conv inside the segment.
    """
    m = ho * wo

    def kernel(*refs):
        refs = list(refs)
        xph_ref = refs[0]
        pos = 1
        brefs = []
        for c in cfgs:
            cnt = 6 if c["equal"] else 7
            brefs.append(refs[pos:pos + cnt])
            pos += cnt
        o_ref = refs[pos]
        hpad_ref = refs[pos + 1]

        cmid = hpad_ref.shape[-1]

        # Halo must be zero ("same" conv padding); the interior is fully
        # overwritten before every read, so one small memset per grid step.
        hpad_ref[...] = jnp.zeros(hpad_ref.shape, hpad_ref.dtype)

        def conv3x3_from_hpad(w_ref):
            """3x3 stride-1 conv over the activations stored in hpad_ref."""
            acc = jnp.zeros((m, w_ref.shape[-1]), jnp.float32)
            for ky in range(3):
                for kx in range(3):
                    t = hpad_ref[pl.ds(ky, ho), pl.ds(kx, wo), :]
                    t = t.reshape(m, cmid).astype(jnp.bfloat16)
                    acc = acc + jnp.dot(t, w_ref[ky * 3 + kx],
                                        preferred_element_type=jnp.float32)
            return acc

        def store_hpad(vals):
            hpad_ref[pl.ds(1, ho), pl.ds(1, wo), :] = vals.reshape(ho, wo, cmid)

        cur = None  # raw (pre-bn) output of the previous block, (m, cout) f32
        for bi, (c, br) in enumerate(zip(cfgs, brefs)):
            cin, cout, equal, s = c["cin"], c["cout"], c["equal"], c["stride"]
            if equal:
                w1_ref, w2_ref, s1_ref, b1_ref, s2_ref, b2_ref = br
                wsc_ref = None
            else:
                w1_ref, w2_ref, wsc_ref, s1_ref, b1_ref, s2_ref, b2_ref = br
            s1 = s1_ref[...]
            b1 = b1_ref[...]
            s2 = s2_ref[...]
            b2 = b2_ref[...]

            if bi == 0:
                # conv1 taps from the phase-decomposed padded input; bn1+relu
                # fused per tap.  With folded bias b1 == 0 the zero halo stays
                # zero after bn1+relu (identity-stat BN, see TODO above).
                def x_tap(ky, kx):
                    ph = (ky % s) * s + (kx % s)
                    t = xph_ref[pl.ds(ph, 1),
                                pl.ds(ky // s, ho),
                                pl.ds(kx // s, wo), :]
                    return t.reshape(m, cin)

                acc1 = jnp.zeros((m, w1_ref.shape[-1]), jnp.float32)
                for ky in range(3):
                    for kx in range(3):
                        a = jnp.maximum(x_tap(ky, kx) * s1 + b1, 0.0)
                        acc1 = acc1 + jnp.dot(a.astype(jnp.bfloat16),
                                              w1_ref[ky * 3 + kx],
                                              preferred_element_type=jnp.float32)

                xc = x_tap(1, 1)              # x sampled on the output grid
                if equal:
                    res = xc                  # identity residual, raw x
                else:
                    a = jnp.maximum(xc * s1 + b1, 0.0).astype(jnp.bfloat16)
                    res = jnp.dot(a, wsc_ref[...],
                                  preferred_element_type=jnp.float32)[:, :cout]
            else:
                # bn1+relu computed ONCE on the previous block's raw output,
                # stashed into the zero-haloed scratch; conv1 reads its taps.
                store_hpad(jnp.maximum(cur * s1 + b1, 0.0))
                acc1 = conv3x3_from_hpad(w1_ref)
                res = cur                     # identity residual (raw)

            # bn2 + relu (once), stash padded, conv2 (3x3, stride 1, pad 1).
            h1 = jnp.maximum(acc1[:, :cout] * s2 + b2, 0.0)
            store_hpad(h1)
            acc2 = conv3x3_from_hpad(w2_ref)

            cur = acc2[:, :cout] + res

        o_ref[...] = cur

    return kernel


def wrn_segment_pallas(seg, x):
    """Runs a segment of BasicBlocks (first block may change stride/channels,
    the rest are identity stride-1 blocks) as ONE fused Pallas kernel.

    x: (N, H, W, Cin) f32 NHWC.  Returns (N, Ho, Wo, Cout) f32 NHWC."""
    n, h, w, cin = x.shape
    b0 = seg[0]
    s = b0["stride"]
    cmid = b0["cout"]
    cout = seg[-1]["cout"]
    assert cin == b0["cin"]
    for p in seg[1:]:
        assert p["equal"] and p["stride"] == 1
        assert p["cin"] == cmid and p["cout"] == cmid
    assert (h + 2) % s == 0 and (w + 2) % s == 0
    ho = (h - 1) // s + 1
    wo = (w - 1) // s + 1

    # One tiny wrapper-side prep per SEGMENT (not per block): spatial pad (=1)
    # plus phase decomposition of the first block's stride, batch-major so one
    # grid step fetches all phases of its batch element.  Same byte count as x.
    xp = jnp.pad(x, ((0, 0), (1, 1), (1, 1), (0, 0)))
    xph = jnp.stack([xp[:, py::s, px::s, :] for py in range(s)
                     for px in range(s)], axis=1)
    nphase, hph, wph = s * s, xph.shape[2], xph.shape[3]
    xph = xph.reshape(n * nphase, hph, wph, cin)

    in_specs = [pl.BlockSpec((nphase, hph, wph, cin),
                             lambda i: (i, 0, 0, 0))]
    args = [xph]
    for p in seg:
        names = ["w1k", "w2k"] + ([] if p["equal"] else ["wsck"]) + \
                ["s1p", "b1p", "s2p", "b2p"]
        for nm in names:
            a = p[nm]
            args.append(a)
            in_specs.append(_full_spec(a.shape))

    cfgs = [dict(stride=p["stride"], cin=p["cin"], cout=p["cout"],
                 equal=p["equal"]) for p in seg]
    kernel = _make_segment_kernel(cfgs, ho=ho, wo=wo)

    out = pl.pallas_call(
        kernel,
        out_shape=jax.ShapeDtypeStruct((n * ho * wo, cout), jnp.float32),
        grid_spec=pltpu.PrefetchScalarGridSpec(
            num_scalar_prefetch=0,
            grid=(n,),
            in_specs=in_specs,
            out_specs=pl.BlockSpec((ho * wo, cout), lambda i: (i, 0)),
            scratch_shapes=[pltpu.VMEM((ho + 2, wo + 2, cmid), jnp.float32)]),
        compiler_params=pltpu.CompilerParams(
            dimension_semantics=("parallel",)),
    )(*args)
    return out.reshape(n, ho, wo, cout)


# ------------------------------ parameters -----------------------------------

def _fold_bn(gamma, beta, mean, var):
    scale = gamma / jnp.sqrt(var + BN_EPS)
    bias = beta - mean * scale
    return scale, bias


def _conv_init(key, k, cin, cout):
    # matches the reference init: std = sqrt(2 / (k*k*out_planes))
    std = (2.0 / (k * k * cout)) ** 0.5
    return jax.random.normal(key, (k, k, cin, cout), jnp.float32) * std


def make_basic_block_params(key, cin, cout, stride):
    equal = (cin == cout)
    if equal:
        assert stride == 1, "identity residual requires stride 1"
    cout_p = _round_up(cout, LANE)

    k1, k2, k3 = jax.random.split(key, 3)
    w1 = _conv_init(k1, 3, cin, cout)                 # HWIO
    w2 = _conv_init(k2, 3, cout, cout)
    wsc = None if equal else _conv_init(k3, 1, cin, cout)

    # Eval-mode BN folded to per-channel scale/bias (identity statistics).
    s1, b1 = _fold_bn(jnp.ones((cin,)), jnp.zeros((cin,)),
                      jnp.zeros((cin,)), jnp.ones((cin,)))
    s2, b2 = _fold_bn(jnp.ones((cout,)), jnp.zeros((cout,)),
                      jnp.zeros((cout,)), jnp.ones((cout,)))

    # Kernel-ready packing (offline, once): tap-major weights with DENSE
    # real-channel contraction dim; only the output-channel (lane) dim is
    # zero-padded to 128; pre-cast to bf16 for the MXU.
    def pack3x3(wk, ci, co):
        wp = jnp.zeros((9, ci, cout_p), jnp.float32)
        wp = wp.at[:, :, :co].set(wk.reshape(9, ci, co))
        return wp.astype(jnp.bfloat16)

    p = dict(
        stride=stride, equal=equal, cin=cin, cout=cout,
        w1=w1, w2=w2, wsc=wsc,
        s1_raw=s1, b1_raw=b1, s2_raw=s2, b2_raw=b2,
        w1k=pack3x3(w1, cin, cout),
        w2k=pack3x3(w2, cout, cout),
        s1p=s1.reshape(1, cin), b1p=b1.reshape(1, cin),
        s2p=s2.reshape(1, cout), b2p=b2.reshape(1, cout),
    )
    if not equal:
        wsck = jnp.zeros((cin, cout_p), jnp.float32)
        wsck = wsck.at[:, :cout].set(wsc.reshape(cin, cout))
        p["wsck"] = wsck.astype(jnp.bfloat16)
    return p


# ------------------------------ forward pass ----------------------------------

def _split_segments(blocks):
    """Group a block list into fusable segments: each segment starts at a
    (possibly strided / channel-changing) block and swallows every following
    identity stride-1 block."""
    segs = []
    for p in blocks:
        if (segs and p["equal"] and p["stride"] == 1
                and p["cin"] == segs[-1][-1]["cout"]):
            segs[-1].append(p)
        else:
            segs.append([p])
    return segs


def forward(blocks, x_nchw):
    x = jnp.transpose(x_nchw, (0, 2, 3, 1)).astype(jnp.float32)  # NCHW -> NHWC
    for seg in _split_segments(blocks):
        x = wrn_segment_pallas(seg, x)
    return jnp.transpose(x, (0, 3, 1, 2))                        # NHWC -> NCHW


# --------------------------- pure-JAX reference -------------------------------

def _conv_ref(x, w, stride, padding):
    return lax.conv_general_dilated(
        x, w, (stride, stride), [(padding, padding)] * 2,
        dimension_numbers=("NHWC", "HWIO", "NHWC"),
        precision=lax.Precision.HIGHEST)


def basic_block_ref(p, x):
    bn1 = lambda t: t * p["s1_raw"] + p["b1_raw"]
    bn2 = lambda t: t * p["s2_raw"] + p["b2_raw"]
    if p["equal"]:
        out = jax.nn.relu(bn1(x))
        h = _conv_ref(out, p["w1"], p["stride"], 1)
        h = jax.nn.relu(bn2(h))
        h = _conv_ref(h, p["w2"], 1, 1)
        return x + h
    xa = jax.nn.relu(bn1(x))
    h = _conv_ref(xa, p["w1"], p["stride"], 1)
    h = jax.nn.relu(bn2(h))
    h = _conv_ref(h, p["w2"], 1, 1)
    sc = _conv_ref(xa, p["wsc"], p["stride"], 0)
    return sc + h


def reference_forward(blocks, x_nchw):
    x = jnp.transpose(x_nchw, (0, 2, 3, 1)).astype(jnp.float32)
    for p in blocks:
        x = basic_block_ref(p, x)
    return jnp.transpose(x, (0, 3, 1, 2))


# ----------------------------------- main --------------------------------------

if __name__ == "__main__":
    key = jax.random.PRNGKey(0)
    kp, kx = jax.random.split(key)
    kb1, kb2 = jax.random.split(kp)

    # Two BasicBlocks exercising both forward paths of the reference module:
    #   BasicBlock(16, 32, stride=2)  -> convShortcut path (in != out)
    #   BasicBlock(32, 32, stride=1)  -> identity-residual path (in == out)
    # Both blocks run as ONE fused pallas_call (a single segment).
    blocks = [
        make_basic_block_params(kb1, cin=16, cout=32, stride=2),
        make_basic_block_params(kb2, cin=32, cout=32, stride=1),
    ]

    # CIFAR-style NCHW input: batch=2, 16 channels, 16x16 spatial.
    x = jax.random.normal(kx, (2, 16, 16, 16), jnp.float32)

    fwd = jax.jit(functools.partial(forward, blocks))
    y = fwd(x)
    jax.block_until_ready(y)
    assert y.shape == (2, 32, 8, 8), y.shape

    # Numerical check vs. a plain-JAX reference (bf16 MXU => loose-ish but
    # tightened tolerance).
    y_ref = reference_forward(blocks, x)
    err = float(jnp.max(jnp.abs(y - y_ref)) / (jnp.max(jnp.abs(y_ref)) + 1e-6))
    assert err < 2e-2, f"pallas vs reference mismatch: rel-to-max err = {err}"

    print("KERNEL_OK")
</pallas_src>

<mosaic_0001>
module attributes {stable_mosaic.version = 11 : i64} {
  func.func @kernel(%arg0: i32, %arg1: memref<4x9x9x16xf32, #tpu.memory_space<vmem>>, %arg2: memref<9x16x128xbf16, #tpu.memory_space<vmem>>, %arg3: memref<9x32x128xbf16, #tpu.memory_space<vmem>>, %arg4: memref<16x128xbf16, #tpu.memory_space<vmem>>, %arg5: memref<1x16xf32, #tpu.memory_space<vmem>>, %arg6: memref<1x16xf32, #tpu.memory_space<vmem>>, %arg7: memref<1x32xf32, #tpu.memory_space<vmem>>, %arg8: memref<1x32xf32, #tpu.memory_space<vmem>>, %arg9: memref<9x32x128xbf16, #tpu.memory_space<vmem>>, %arg10: memref<9x32x128xbf16, #tpu.memory_space<vmem>>, %arg11: memref<1x32xf32, #tpu.memory_space<vmem>>, %arg12: memref<1x32xf32, #tpu.memory_space<vmem>>, %arg13: memref<1x32xf32, #tpu.memory_space<vmem>>, %arg14: memref<1x32xf32, #tpu.memory_space<vmem>>, %arg15: memref<64x32xf32, #tpu.memory_space<vmem>>, %arg16: memref<10x10x32xf32, #tpu.memory_space<vmem>>) attributes {dimension_semantics = [#tpu.dimension_semantics<parallel>], iteration_bounds = array<i64: 2>, scalar_prefetch = 0 : i64, scratch_operands = 1 : i64, tpu.core_type = #tpu.core_type<tc>, window_params = [{transform_indices = @transform_0, window_bounds = array<i64: 4, 9, 9, 16>}, {pipeline_mode = #tpu.pipeline_mode<synchronous>, transform_indices = @transform_1, window_bounds = array<i64: 9, 16, 128>}, {pipeline_mode = #tpu.pipeline_mode<synchronous>, transform_indices = @transform_2, window_bounds = array<i64: 9, 32, 128>}, {pipeline_mode = #tpu.pipeline_mode<synchronous>, transform_indices = @transform_3, window_bounds = array<i64: 16, 128>}, {pipeline_mode = #tpu.pipeline_mode<synchronous>, transform_indices = @transform_4, window_bounds = array<i64: 1, 16>}, {pipeline_mode = #tpu.pipeline_mode<synchronous>, transform_indices = @transform_5, window_bounds = array<i64: 1, 16>}, {pipeline_mode = #tpu.pipeline_mode<synchronous>, transform_indices = @transform_6, window_bounds = array<i64: 1, 32>}, {pipeline_mode = #tpu.pipeline_mode<synchronous>, transform_indices = @transform_7, window_bounds = array<i64: 1, 32>}, {pipeline_mode = #tpu.pipeline_mode<synchronous>, transform_indices = @transform_8, window_bounds = array<i64: 9, 32, 128>}, {pipeline_mode = #tpu.pipeline_mode<synchronous>, transform_indices = @transform_9, window_bounds = array<i64: 9, 32, 128>}, {pipeline_mode = #tpu.pipeline_mode<synchronous>, transform_indices = @transform_10, window_bounds = array<i64: 1, 32>}, {pipeline_mode = #tpu.pipeline_mode<synchronous>, transform_indices = @transform_11, window_bounds = array<i64: 1, 32>}, {pipeline_mode = #tpu.pipeline_mode<synchronous>, transform_indices = @transform_12, window_bounds = array<i64: 1, 32>}, {pipeline_mode = #tpu.pipeline_mode<synchronous>, transform_indices = @transform_13, window_bounds = array<i64: 1, 32>}, {transform_indices = @transform_14, window_bounds = array<i64: 64, 32>}]} {
    %cst = arith.constant 0.000000e+00 : f32
    %0 = vector.broadcast %cst : f32 to vector<10x10x32xf32>
    %c0 = arith.constant 0 : index
    %c0_0 = arith.constant 0 : index
    %c0_1 = arith.constant 0 : index
    %1 = vector.load %arg16[%c0, %c0_0, %c0_1] : memref<10x10x32xf32, #tpu.memory_space<vmem>>, vector<10x10x32xf32>
    tpu.vector_store %arg16[%c0, %c0_0, %c0_1], %0 {strides = array<i32>} : memref<10x10x32xf32, #tpu.memory_space<vmem>>, vector<10x10x32xf32>,
    %c0_2 = arith.constant 0 : index
    %c0_3 = arith.constant 0 : index
    %2 = vector.load %arg5[%c0_2, %c0_3] : memref<1x16xf32, #tpu.memory_space<vmem>>, vector<1x16xf32>
    %c0_4 = arith.constant 0 : index
    %c0_5 = arith.constant 0 : index
    %3 = vector.load %arg6[%c0_4, %c0_5] : memref<1x16xf32, #tpu.memory_space<vmem>>, vector<1x16xf32>
    %c0_6 = arith.constant 0 : index
    %c0_7 = arith.constant 0 : index
    %4 = vector.load %arg7[%c0_6, %c0_7] : memref<1x32xf32, #tpu.memory_space<vmem>>, vector<1x32xf32>
    %c0_8 = arith.constant 0 : index
    %c0_9 = arith.constant 0 : index
    %5 = vector.load %arg8[%c0_8, %c0_9] : memref<1x32xf32, #tpu.memory_space<vmem>>, vector<1x32xf32>
    %cst_10 = arith.constant 0.000000e+00 : f32
    %6 = vector.broadcast %cst_10 : f32 to vector<64x128xf32>
    %c0_11 = arith.constant 0 : index
    %c0_12 = arith.constant 0 : index
    %c0_13 = arith.constant 0 : index
    %c0_14 = arith.constant 0 : index
    %7 = vector.load %arg1[%c0_11, %c0_12, %c0_13, %c0_14] : memref<4x9x9x16xf32, #tpu.memory_space<vmem>>, vector<1x8x8x16xf32>
    %8 = vector.shape_cast %7 : vector<1x8x8x16xf32> to vector<64x16xf32>
    %9 = vector.broadcast %2 : vector<1x16xf32> to vector<64x16xf32>
    %10 = arith.mulf %8, %9 : vector<64x16xf32>
    %11 = vector.broadcast %3 : vector<1x16xf32> to vector<64x16xf32>
    %12 = arith.addf %10, %11 : vector<64x16xf32>
    %cst_15 = arith.constant 0.000000e+00 : f32
    %13 = vector.broadcast %cst_15 : f32 to vector<64x16xf32>
    %14 = arith.maximumf %12, %13 : vector<64x16xf32>
    %15 = arith.truncf %14 : vector<64x16xf32> to vector<64x16xbf16>
    %c0_16 = arith.constant 0 : index
    %c0_17 = arith.constant 0 : index
    %c0_18 = arith.constant 0 : index
    %16 = vector.load %arg2[%c0_16, %c0_17, %c0_18] : memref<9x16x128xbf16, #tpu.memory_space<vmem>>, vector<1x16x128xbf16>
    %17 = vector.shape_cast %16 : vector<1x16x128xbf16> to vector<16x128xbf16>
    %cst_19 = arith.constant dense<0.000000e+00> : vector<64x128xf32>
    %18 = tpu.matmul %15, %17, %cst_19 {dimension_numbers = #tpu.dot_dimension_numbers<[1], [0], [0], [1], [0, 0, 1, 1], [], []>} : vector<64x16xbf16>, vector<16x128xbf16>, vector<64x128xf32> -> vector<64x128xf32>
    %19 = arith.addf %6, %18 : vector<64x128xf32>
    %c1 = arith.constant 1 : index
    %c0_20 = arith.constant 0 : index
    %c0_21 = arith.constant 0 : index
    %c0_22 = arith.constant 0 : index
    %20 = vector.load %arg1[%c1, %c0_20, %c0_21, %c0_22] : memref<4x9x9x16xf32, #tpu.memory_space<vmem>>, vector<1x8x8x16xf32>
    %21 = vector.shape_cast %20 : vector<1x8x8x16xf32> to vector<64x16xf32>
    %22 = vector.broadcast %2 : vector<1x16xf32> to vector<64x16xf32>
    %23 = arith.mulf %21, %22 : vector<64x16xf32>
    %24 = vector.broadcast %3 : vector<1x16xf32> to vector<64x16xf32>
    %25 = arith.addf %23, %24 : vector<64x16xf32>
    %cst_23 = arith.constant 0.000000e+00 : f32
    %26 = vector.broadcast %cst_23 : f32 to vector<64x16xf32>
    %27 = arith.maximumf %25, %26 : vector<64x16xf32>
    %28 = arith.truncf %27 : vector<64x16xf32> to vector<64x16xbf16>
    %c1_24 = arith.constant 1 : index
    %c0_25 = arith.constant 0 : index
    %c0_26 = arith.constant 0 : index
    %29 = vector.load %arg2[%c1_24, %c0_25, %c0_26] : memref<9x16x128xbf16, #tpu.memory_space<vmem>>, vector<1x16x128xbf16>
    %30 = vector.shape_cast %29 : vector<1x16x128xbf16> to vector<16x128xbf16>
    %cst_27 = arith.constant dense<0.000000e+00> : vector<64x128xf32>
    %31 = tpu.matmul %28, %30, %cst_27 {dimension_numbers = #tpu.dot_dimension_numbers<[1], [0], [0], [1], [0, 0, 1, 1], [], []>} : vector<64x16xbf16>, vector<16x128xbf16>, vector<64x128xf32> -> vector<64x128xf32>
    %32 = arith.addf %19, %31 : vector<64x128xf32>
    %c0_28 = arith.constant 0 : index
    %c0_29 = arith.constant 0 : index
    %c1_30 = arith.constant 1 : index
    %c0_31 = arith.constant 0 : index
    %33 = vector.load %arg1[%c0_28, %c0_29, %c1_30, %c0_31] : memref<4x9x9x16xf32, #tpu.memory_space<vmem>>, vector<1x8x8x16xf32>
    %34 = vector.shape_cast %33 : vector<1x8x8x16xf32> to vector<64x16xf32>
    %35 = vector.broadcast %2 : vector<1x16xf32> to vector<64x16xf32>
    %36 = arith.mulf %34, %35 : vector<64x16xf32>
    %37 = vector.broadcast %3 : vector<1x16xf32> to vector<64x16xf32>
    %38 = arith.addf %36, %37 : vector<64x16xf32>
    %cst_32 = arith.constant 0.000000e+00 : f32
    %39 = vector.broadcast %cst_32 : f32 to vector<64x16xf32>
    %40 = arith.maximumf %38, %39 : vector<64x16xf32>
    %41 = arith.truncf %40 : vector<64x16xf32> to vector<64x16xbf16>
    %c2 = arith.constant 2 : index
    %c0_33 = arith.constant 0 : index
    %c0_34 = arith.constant 0 : index
    %42 = vector.load %arg2[%c2, %c0_33, %c0_34] : memref<9x16x128xbf16, #tpu.memory_space<vmem>>, vector<1x16x128xbf16>
    %43 = vector.shape_cast %42 : vector<1x16x128xbf16> to vector<16x128xbf16>
    %cst_35 = arith.constant dense<0.000000e+00> : vector<64x128xf32>
    %44 = tpu.matmul %41, %43, %cst_35 {dimension_numbers = #tpu.dot_dimension_numbers<[1], [0], [0], [1], [0, 0, 1, 1], [], []>} : vector<64x16xbf16>, vector<16x128xbf16>, vector<64x128xf32> -> vector<64x128xf32>
    %45 = arith.addf %32, %44 : vector<64x128xf32>
    %c2_36 = arith.constant 2 : index
    %c0_37 = arith.constant 0 : index
    %c0_38 = arith.constant 0 : index
    %c0_39 = arith.constant 0 : index
    %46 = vector.load %arg1[%c2_36, %c0_37, %c0_38, %c0_39] : memref<4x9x9x16xf32, #tpu.memory_space<vmem>>, vector<1x8x8x16xf32>
    %47 = vector.shape_cast %46 : vector<1x8x8x16xf32> to vector<64x16xf32>
    %48 = vector.broadcast %2 : vector<1x16xf32> to vector<64x16xf32>
    %49 = arith.mulf %47, %48 : vector<64x16xf32>
    %50 = vector.broadcast %3 : vector<1x16xf32> to vector<64x16xf32>
    %51 = arith.addf %49, %50 : vector<64x16xf32>
    %cst_40 = arith.constant 0.000000e+00 : f32
    %52 = vector.broadcast %cst_40 : f32 to vector<64x16xf32>
    %53 = arith.maximumf %51, %52 : vector<64x16xf32>
    %54 = arith.truncf %53 : vector<64x16xf32> to vector<64x16xbf16>
    %c3 = arith.constant 3 : index
    %c0_41 = arith.constant 0 : index
    %c0_42 = arith.constant 0 : index
    %55 = vector.load %arg2[%c3, %c0_41, %c0_42] : memref<9x16x128xbf16, #tpu.memory_space<vmem>>, vector<1x16x128xbf16>
    %56 = vector.shape_cast %55 : vector<1x16x128xbf16> to vector<16x128xbf16>
    %cst_43 = arith.constant dense<0.000000e+00> : vector<64x128xf32>
    %57 = tpu.matmul %54, %56, %cst_43 {dimension_numbers = #tpu.dot_dimension_numbers<[1], [0], [0], [1], [0, 0, 1, 1], [], []>} : vector<64x16xbf16>, vector<16x128xbf16>, vector<64x128xf32> -> vector<64x128xf32>
    %58 = arith.addf %45, %57 : vector<64x128xf32>
    %c3_44 = arith.constant 3 : index
    %c0_45 = arith.constant 0 : index
    %c0_46 = arith.constant 0 : index
    %c0_47 = arith.constant 0 : index
    %59 = vector.load %arg1[%c3_44, %c0_45, %c0_46, %c0_47] : memref<4x9x9x16xf32, #tpu.memory_space<vmem>>, vector<1x8x8x16xf32>
    %60 = vector.shape_cast %59 : vector<1x8x8x16xf32> to vector<64x16xf32>
    %61 = vector.broadcast %2 : vector<1x16xf32> to vector<64x16xf32>
    %62 = arith.mulf %60, %61 : vector<64x16xf32>
    %63 = vector.broadcast %3 : vector<1x16xf32> to vector<64x16xf32>
    %64 = arith.addf %62, %63 : vector<64x16xf32>
    %cst_48 = arith.constant 0.000000e+00 : f32
    %65 = vector.broadcast %cst_48 : f32 to vector<64x16xf32>
    %66 = arith.maximumf %64, %65 : vector<64x16xf32>
    %67 = arith.truncf %66 : vector<64x16xf32> to vector<64x16xbf16>
    %c4 = arith.constant 4 : index
    %c0_49 = arith.constant 0 : index
    %c0_50 = arith.constant 0 : index
    %68 = vector.load %arg2[%c4, %c0_49, %c0_50] : memref<9x16x128xbf16, #tpu.memory_space<vmem>>, vector<1x16x128xbf16>
    %69 = vector.shape_cast %68 : vector<1x16x128xbf16> to vector<16x128xbf16>
    %cst_51 = arith.constant dense<0.000000e+00> : vector<64x128xf32>
    %70 = tpu.matmul %67, %69, %cst_51 {dimension_numbers = #tpu.dot_dimension_numbers<[1], [0], [0], [1], [0, 0, 1, 1], [], []>} : vector<64x16xbf16>, vector<16x128xbf16>, vector<64x128xf32> -> vector<64x128xf32>
    %71 = arith.addf %58, %70 : vector<64x128xf32>
    %c2_52 = arith.constant 2 : index
    %c0_53 = arith.constant 0 : index
    %c1_54 = arith.constant 1 : index
    %c0_55 = arith.constant 0 : index
    %72 = vector.load %arg1[%c2_52, %c0_53, %c1_54, %c0_55] : memref<4x9x9x16xf32, #tpu.memory_space<vmem>>, vector<1x8x8x16xf32>
    %73 = vector.shape_cast %72 : vector<1x8x8x16xf32> to vector<64x16xf32>
    %74 = vector.broadcast %2 : vector<1x16xf32> to vector<64x16xf32>
    %75 = arith.mulf %73, %74 : vector<64x16xf32>
    %76 = vector.broadcast %3 : vector<1x16xf32> to vector<64x16xf32>
    %77 = arith.addf %75, %76 : vector<64x16xf32>
    %cst_56 = arith.constant 0.000000e+00 : f32
    %78 = vector.broadcast %cst_56 : f32 to vector<64x16xf32>
    %79 = arith.maximumf %77, %78 : vector<64x16xf32>
    %80 = arith.truncf %79 : vector<64x16xf32> to vector<64x16xbf16>
    %c5 = arith.constant 5 : index
    %c0_57 = arith.constant 0 : index
    %c0_58 = arith.constant 0 : index
    %81 = vector.load %arg2[%c5, %c0_57, %c0_58] : memref<9x16x128xbf16, #tpu.memory_space<vmem>>, vector<1x16x128xbf16>
    %82 = vector.shape_cast %81 : vector<1x16x128xbf16> to vector<16x128xbf16>
    %cst_59 = arith.constant dense<0.000000e+00> : vector<64x128xf32>
    %83 = tpu.matmul %80, %82, %cst_59 {dimension_numbers = #tpu.dot_dimension_numbers<[1], [0], [0], [1], [0, 0, 1, 1], [], []>} : vector<64x16xbf16>, vector<16x128xbf16>, vector<64x128xf32> -> vector<64x128xf32>
    %84 = arith.addf %71, %83 : vector<64x128xf32>
    %c0_60 = arith.constant 0 : index
    %c1_61 = arith.constant 1 : index
    %c0_62 = arith.constant 0 : index
    %c0_63 = arith.constant 0 : index
    %85 = vector.load %arg1[%c0_60, %c1_61, %c0_62, %c0_63] : memref<4x9x9x16xf32, #tpu.memory_space<vmem>>, vector<1x8x8x16xf32>
    %86 = vector.shape_cast %85 : vector<1x8x8x16xf32> to vector<64x16xf32>
    %87 = vector.broadcast %2 : vector<1x16xf32> to vector<64x16xf32>
    %88 = arith.mulf %86, %87 : vector<64x16xf32>
    %89 = vector.broadcast %3 : vector<1x16xf32> to vector<64x16xf32>
    %90 = arith.addf %88, %89 : vector<64x16xf32>
    %cst_64 = arith.constant 0.000000e+00 : f32
    %91 = vector.broadcast %cst_64 : f32 to vector<64x16xf32>
    %92 = arith.maximumf %90, %91 : vector<64x16xf32>
    %93 = arith.truncf %92 : vector<64x16xf32> to vector<64x16xbf16>
    %c6 = arith.constant 6 : index
    %c0_65 = arith.constant 0 : index
    %c0_66 = arith.constant 0 : index
    %94 = vector.load %arg2[%c6, %c0_65, %c0_66] : memref<9x16x128xbf16, #tpu.memory_space<vmem>>, vector<1x16x128xbf16>
    %95 = vector.shape_cast %94 : vector<1x16x128xbf16> to vector<16x128xbf16>
    %cst_67 = arith.constant dense<0.000000e+00> : vector<64x128xf32>
    %96 = tpu.matmul %93, %95, %cst_67 {dimension_numbers = #tpu.dot_dimension_numbers<[1], [0], [0], [1], [0, 0, 1, 1], [], []>} : vector<64x16xbf16>, vector<16x128xbf16>, vector<64x128xf32> -> vector<64x128xf32>
    %97 = arith.addf %84, %96 : vector<64x128xf32>
    %c1_68 = arith.constant 1 : index
    %c1_69 = arith.constant 1 : index
    %c0_70 = arith.constant 0 : index
    %c0_71 = arith.constant 0 : index
    %98 = vector.load %arg1[%c1_68, %c1_69, %c0_70, %c0_71] : memref<4x9x9x16xf32, #tpu.memory_space<vmem>>, vector<1x8x8x16xf32>
    %99 = vector.shape_cast %98 : vector<1x8x8x16xf32> to vector<64x16xf32>
    %100 = vector.broadcast %2 : vector<1x16xf32> to vector<64x16xf32>
    %101 = arith.mulf %99, %100 : vector<64x16xf32>
    %102 = vector.broadcast %3 : vector<1x16xf32> to vector<64x16xf32>
    %103 = arith.addf %101, %102 : vector<64x16xf32>
    %cst_72 = arith.constant 0.000000e+00 : f32
    %104 = vector.broadcast %cst_72 : f32 to vector<64x16xf32>
    %105 = arith.maximumf %103, %104 : vector<64x16xf32>
    %106 = arith.truncf %105 : vector<64x16xf32> to vector<64x16xbf16>
    %c7 = arith.constant 7 : index
    %c0_73 = arith.constant 0 : index
    %c0_74 = arith.constant 0 : index
    %107 = vector.load %arg2[%c7, %c0_73, %c0_74] : memref<9x16x128xbf16, #tpu.memory_space<vmem>>, vector<1x16x128xbf16>
    %108 = vector.shape_cast %107 : vector<1x16x128xbf16> to vector<16x128xbf16>
    %cst_75 = arith.constant dense<0.000000e+00> : vector<64x128xf32>
    %109 = tpu.matmul %106, %108, %cst_75 {dimension_numbers = #tpu.dot_dimension_numbers<[1], [0], [0], [1], [0, 0, 1, 1], [], []>} : vector<64x16xbf16>, vector<16x128xbf16>, vector<64x128xf32> -> vector<64x128xf32>
    %110 = arith.addf %97, %109 : vector<64x128xf32>
    %c0_76 = arith.constant 0 : index
    %c1_77 = arith.constant 1 : index
    %c1_78 = arith.constant 1 : index
    %c0_79 = arith.constant 0 : index
    %111 = vector.load %arg1[%c0_76, %c1_77, %c1_78, %c0_79] : memref<4x9x9x16xf32, #tpu.memory_space<vmem>>, vector<1x8x8x16xf32>
    %112 = vector.shape_cast %111 : vector<1x8x8x16xf32> to vector<64x16xf32>
    %113 = vector.broadcast %2 : vector<1x16xf32> to vector<64x16xf32>
    %114 = arith.mulf %112, %113 : vector<64x16xf32>
    %115 = vector.broadcast %3 : vector<1x16xf32> to vector<64x16xf32>
    %116 = arith.addf %114, %115 : vector<64x16xf32>
    %cst_80 = arith.constant 0.000000e+00 : f32
    %117 = vector.broadcast %cst_80 : f32 to vector<64x16xf32>
    %118 = arith.maximumf %116, %117 : vector<64x16xf32>
    %119 = arith.truncf %118 : vector<64x16xf32> to vector<64x16xbf16>
    %c8 = arith.constant 8 : index
    %c0_81 = arith.constant 0 : index
    %c0_82 = arith.constant 0 : index
    %120 = vector.load %arg2[%c8, %c0_81, %c0_82] : memref<9x16x128xbf16, #tpu.memory_space<vmem>>, vector<1x16x128xbf16>
    %121 = vector.shape_cast %120 : vector<1x16x128xbf16> to vector<16x128xbf16>
    %cst_83 = arith.constant dense<0.000000e+00> : vector<64x128xf32>
    %122 = tpu.matmul %119, %121, %cst_83 {dimension_numbers = #tpu.dot_dimension_numbers<[1], [0], [0], [1], [0, 0, 1, 1], [], []>} : vector<64x16xbf16>, vector<16x128xbf16>, vector<64x128xf32> -> vector<64x128xf32>
    %123 = arith.addf %110, %122 : vector<64x128xf32>
    %c3_84 = arith.constant 3 : index
    %c0_85 = arith.constant 0 : index
    %c0_86 = arith.constant 0 : index
    %c0_87 = arith.constant 0 : index
    %124 = vector.load %arg1[%c3_84, %c0_85, %c0_86, %c0_87] : memref<4x9x9x16xf32, #tpu.memory_space<vmem>>, vector<1x8x8x16xf32>
    %125 = vector.shape_cast %124 : vector<1x8x8x16xf32> to vector<64x16xf32>
    %126 = vector.broadcast %2 : vector<1x16xf32> to vector<64x16xf32>
    %127 = arith.mulf %125, %126 : vector<64x16xf32>
    %128 = vector.broadcast %3 : vector<1x16xf32> to vector<64x16xf32>
    %129 = arith.addf %127, %128 : vector<64x16xf32>
    %cst_88 = arith.constant 0.000000e+00 : f32
    %130 = vector.broadcast %cst_88 : f32 to vector<64x16xf32>
    %131 = arith.maximumf %129, %130 : vector<64x16xf32>
    %132 = arith.truncf %131 : vector<64x16xf32> to vector<64x16xbf16>
    %c0_89 = arith.constant 0 : index
    %c0_90 = arith.constant 0 : index
    %133 = vector.load %arg4[%c0_89, %c0_90] : memref<16x128xbf16, #tpu.memory_space<vmem>>, vector<16x128xbf16>
    %cst_91 = arith.constant dense<0.000000e+00> : vector<64x128xf32>
    %134 = tpu.matmul %132, %133, %cst_91 {dimension_numbers = #tpu.dot_dimension_numbers<[1], [0], [0], [1], [0, 0, 1, 1], [], []>} : vector<64x16xbf16>, vector<16x128xbf16>, vector<64x128xf32> -> vector<64x128xf32>
    %135 = vector.extract_strided_slice %134 {offsets = [0, 0], sizes = [64, 32], strides = [1, 1]} : vector<64x128xf32> to vector<64x32xf32>
    %136 = vector.extract_strided_slice %123 {offsets = [0, 0], sizes = [64, 32], strides = [1, 1]} : vector<64x128xf32> to vector<64x32xf32>
    %137 = vector.broadcast %4 : vector<1x32xf32> to vector<64x32xf32>
    %138 = arith.mulf %136, %137 : vector<64x32xf32>
    %139 = vector.broadcast %5 : vector<1x32xf32> to vector<64x32xf32>
    %140 = arith.addf %138, %139 : vector<64x32xf32>
    %cst_92 = arith.constant 0.000000e+00 : f32
    %141 = vector.broadcast %cst_92 : f32 to vector<64x32xf32>
    %142 = arith.maximumf %140, %141 : vector<64x32xf32>
    %143 = vector.shape_cast %142 : vector<64x32xf32> to vector<8x8x32xf32>
    %c1_93 = arith.constant 1 : index
    %c1_94 = arith.constant 1 : index
    %c0_95 = arith.constant 0 : index
    %144 = vector.load %arg16[%c1_93, %c1_94, %c0_95] : memref<10x10x32xf32, #tpu.memory_space<vmem>>, vector<8x8x32xf32>
    tpu.vector_store %arg16[%c1_93, %c1_94, %c0_95], %143 {strides = array<i32>} : memref<10x10x32xf32, #tpu.memory_space<vmem>>, vector<8x8x32xf32>,
    %cst_96 = arith.constant 0.000000e+00 : f32
    %145 = vector.broadcast %cst_96 : f32 to vector<64x128xf32>
    %c0_97 = arith.constant 0 : index
    %c0_98 = arith.constant 0 : index
    %c0_99 = arith.constant 0 : index
    %146 = vector.load %arg16[%c0_97, %c0_98, %c0_99] : memref<10x10x32xf32, #tpu.memory_space<vmem>>, vector<8x8x32xf32>
    %147 = vector.shape_cast %146 : vector<8x8x32xf32> to vector<64x32xf32>
    %148 = arith.truncf %147 : vector<64x32xf32> to vector<64x32xbf16>
    %c0_100 = arith.constant 0 : index
    %c0_101 = arith.constant 0 : index
    %c0_102 = arith.constant 0 : index
    %149 = vector.load %arg3[%c0_100, %c0_101, %c0_102] : memref<9x32x128xbf16, #tpu.memory_space<vmem>>, vector<1x32x128xbf16>
    %150 = vector.shape_cast %149 : vector<1x32x128xbf16> to vector<32x128xbf16>
    %cst_103 = arith.constant dense<0.000000e+00> : vector<64x128xf32>
    %151 = tpu.matmul %148, %150, %cst_103 {dimension_numbers = #tpu.dot_dimension_numbers<[1], [0], [0], [1], [0, 0, 1, 1], [], []>} : vector<64x32xbf16>, vector<32x128xbf16>, vector<64x128xf32> -> vector<64x128xf32>
    %152 = arith.addf %145, %151 : vector<64x128xf32>
    %c0_104 = arith.constant 0 : index
    %c1_105 = arith.constant 1 : index
    %c0_106 = arith.constant 0 : index
    %153 = vector.load %arg16[%c0_104, %c1_105, %c0_106] : memref<10x10x32xf32, #tpu.memory_space<vmem>>, vector<8x8x32xf32>
    %154 = vector.shape_cast %153 : vector<8x8x32xf32> to vector<64x32xf32>
    %155 = arith.truncf %154 : vector<64x32xf32> to vector<64x32xbf16>
    %c1_107 = arith.constant 1 : index
    %c0_108 = arith.constant 0 : index
    %c0_109 = arith.constant 0 : index
    %156 = vector.load %arg3[%c1_107, %c0_108, %c0_109] : memref<9x32x128xbf16, #tpu.memory_space<vmem>>, vector<1x32x128xbf16>
    %157 = vector.shape_cast %156 : vector<1x32x128xbf16> to vector<32x128xbf16>
    %cst_110 = arith.constant dense<0.000000e+00> : vector<64x128xf32>
    %158 = tpu.matmul %155, %157, %cst_110 {dimension_numbers = #tpu.dot_dimension_numbers<[1], [0], [0], [1], [0, 0, 1, 1], [], []>} : vector<64x32xbf16>, vector<32x128xbf16>, vector<64x128xf32> -> vector<64x128xf32>
    %159 = arith.addf %152, %158 : vector<64x128xf32>
    %c0_111 = arith.constant 0 : index
    %c2_112 = arith.constant 2 : index
    %c0_113 = arith.constant 0 : index
    %160 = vector.load %arg16[%c0_111, %c2_112, %c0_113] : memref<10x10x32xf32, #tpu.memory_space<vmem>>, vector<8x8x32xf32>
    %161 = vector.shape_cast %160 : vector<8x8x32xf32> to vector<64x32xf32>
    %162 = arith.truncf %161 : vector<64x32xf32> to vector<64x32xbf16>
    %c2_114 = arith.constant 2 : index
    %c0_115 = arith.constant 0 : index
    %c0_116 = arith.constant 0 : index
    %163 = vector.load %arg3[%c2_114, %c0_115, %c0_116] : memref<9x32x128xbf16, #tpu.memory_space<vmem>>, vector<1x32x128xbf16>
    %164 = vector.shape_cast %163 : vector<1x32x128xbf16> to vector<32x128xbf16>
    %cst_117 = arith.constant dense<0.000000e+00> : vector<64x128xf32>
    %165 = tpu.matmul %162, %164, %cst_117 {dimension_numbers = #tpu.dot_dimension_numbers<[1], [0], [0], [1], [0, 0, 1, 1], [], []>} : vector<64x32xbf16>, vector<32x128xbf16>, vector<64x128xf32> -> vector<64x128xf32>
    %166 = arith.addf %159, %165 : vector<64x128xf32>
    %c1_118 = arith.constant 1 : index
    %c0_119 = arith.constant 0 : index
    %c0_120 = arith.constant 0 : index
    %167 = vector.load %arg16[%c1_118, %c0_119, %c0_120] : memref<10x10x32xf32, #tpu.memory_space<vmem>>, vector<8x8x32xf32>
    %168 = vector.shape_cast %167 : vector<8x8x32xf32> to vector<64x32xf32>
    %169 = arith.truncf %168 : vector<64x32xf32> to vector<64x32xbf16>
    %c3_121 = arith.constant 3 : index
    %c0_122 = arith.constant 0 : index
    %c0_123 = arith.constant 0 : index
    %170 = vector.load %arg3[%c3_121, %c0_122, %c0_123] : memref<9x32x128xbf16, #tpu.memory_space<vmem>>, vector<1x32x128xbf16>
    %171 = vector.shape_cast %170 : vector<1x32x128xbf16> to vector<32x128xbf16>
    %cst_124 = arith.constant dense<0.000000e+00> : vector<64x128xf32>
    %172 = tpu.matmul %169, %171, %cst_124 {dimension_numbers = #tpu.dot_dimension_numbers<[1], [0], [0], [1], [0, 0, 1, 1], [], []>} : vector<64x32xbf16>, vector<32x128xbf16>, vector<64x128xf32> -> vector<64x128xf32>
    %173 = arith.addf %166, %172 : vector<64x128xf32>
    %c1_125 = arith.constant 1 : index
    %c1_126 = arith.constant 1 : index
    %c0_127 = arith.constant 0 : index
    %174 = vector.load %arg16[%c1_125, %c1_126, %c0_127] : memref<10x10x32xf32, #tpu.memory_space<vmem>>, vector<8x8x32xf32>
    %175 = vector.shape_cast %174 : vector<8x8x32xf32> to vector<64x32xf32>
    %176 = arith.truncf %175 : vector<64x32xf32> to vector<64x32xbf16>
    %c4_128 = arith.constant 4 : index
    %c0_129 = arith.constant 0 : index
    %c0_130 = arith.constant 0 : index
    %177 = vector.load %arg3[%c4_128, %c0_129, %c0_130] : memref<9x32x128xbf16, #tpu.memory_space<vmem>>, vector<1x32x128xbf16>
    %178 = vector.shape_cast %177 : vector<1x32x128xbf16> to vector<32x128xbf16>
    %cst_131 = arith.constant dense<0.000000e+00> : vector<64x128xf32>
    %179 = tpu.matmul %176, %178, %cst_131 {dimension_numbers = #tpu.dot_dimension_numbers<[1], [0], [0], [1], [0, 0, 1, 1], [], []>} : vector<64x32xbf16>, vector<32x128xbf16>, vector<64x128xf32> -> vector<64x128xf32>
    %180 = arith.addf %173, %179 : vector<64x128xf32>
    %c1_132 = arith.constant 1 : index
    %c2_133 = arith.constant 2 : index
    %c0_134 = arith.constant 0 : index
    %181 = vector.load %arg16[%c1_132, %c2_133, %c0_134] : memref<10x10x32xf32, #tpu.memory_space<vmem>>, vector<8x8x32xf32>
    %182 = vector.shape_cast %181 : vector<8x8x32xf32> to vector<64x32xf32>
    %183 = arith.truncf %182 : vector<64x32xf32> to vector<64x32xbf16>
    %c5_135 = arith.constant 5 : index
    %c0_136 = arith.constant 0 : index
    %c0_137 = arith.constant 0 : index
    %184 = vector.load %arg3[%c5_135, %c0_136, %c0_137] : memref<9x32x128xbf16, #tpu.memory_space<vmem>>, vector<1x32x128xbf16>
    %185 = vector.shape_cast %184 : vector<1x32x128xbf16> to vector<32x128xbf16>
    %cst_138 = arith.constant dense<0.000000e+00> : vector<64x128xf32>
    %186 = tpu.matmul %183, %185, %cst_138 {dimension_numbers = #tpu.dot_dimension_numbers<[1], [0], [0], [1], [0, 0, 1, 1], [], []>} : vector<64x32xbf16>, vector<32x128xbf16>, vector<64x128xf32> -> vector<64x128xf32>
    %187 = arith.addf %180, %186 : vector<64x128xf32>
    %c2_139 = arith.constant 2 : index
    %c0_140 = arith.constant 0 : index
    %c0_141 = arith.constant 0 : index
    %188 = vector.load %arg16[%c2_139, %c0_140, %c0_141] : memref<10x10x32xf32, #tpu.memory_space<vmem>>, vector<8x8x32xf32>
    %189 = vector.shape_cast %188 : vector<8x8x32xf32> to vector<64x32xf32>
    %190 = arith.truncf %189 : vector<64x32xf32> to vector<64x32xbf16>
    %c6_142 = arith.constant 6 : index
    %c0_143 = arith.constant 0 : index
    %c0_144 = arith.constant 0 : index
    %191 = vector.load %arg3[%c6_142, %c0_143, %c0_144] : memref<9x32x128xbf16, #tpu.memory_space<vmem>>, vector<1x32x128xbf16>
    %192 = vector.shape_cast %191 : vector<1x32x128xbf16> to vector<32x128xbf16>
    %cst_145 = arith.constant dense<0.000000e+00> : vector<64x128xf32>
    %193 = tpu.matmul %190, %192, %cst_145 {dimension_numbers = #tpu.dot_dimension_numbers<[1], [0], [0], [1], [0, 0, 1, 1], [], []>} : vector<64x32xbf16>, vector<32x128xbf16>, vector<64x128xf32> -> vector<64x128xf32>
    %194 = arith.addf %187, %193 : vector<64x128xf32>
    %c2_146 = arith.constant 2 : index
    %c1_147 = arith.constant 1 : index
    %c0_148 = arith.constant 0 : index
    %195 = vector.load %arg16[%c2_146, %c1_147, %c0_148] : memref<10x10x32xf32, #tpu.memory_space<vmem>>, vector<8x8x32xf32>
    %196 = vector.shape_cast %195 : vector<8x8x32xf32> to vector<64x32xf32>
    %197 = arith.truncf %196 : vector<64x32xf32> to vector<64x32xbf16>
    %c7_149 = arith.constant 7 : index
    %c0_150 = arith.constant 0 : index
    %c0_151 = arith.constant 0 : index
    %198 = vector.load %arg3[%c7_149, %c0_150, %c0_151] : memref<9x32x128xbf16, #tpu.memory_space<vmem>>, vector<1x32x128xbf16>
    %199 = vector.shape_cast %198 : vector<1x32x128xbf16> to vector<32x128xbf16>
    %cst_152 = arith.constant dense<0.000000e+00> : vector<64x128xf32>
    %200 = tpu.matmul %197, %199, %cst_152 {dimension_numbers = #tpu.dot_dimension_numbers<[1], [0], [0], [1], [0, 0, 1, 1], [], []>} : vector<64x32xbf16>, vector<32x128xbf16>, vector<64x128xf32> -> vector<64x128xf32>
    %201 = arith.addf %194, %200 : vector<64x128xf32>
    %c2_153 = arith.constant 2 : index
    %c2_154 = arith.constant 2 : index
    %c0_155 = arith.constant 0 : index
    %202 = vector.load %arg16[%c2_153, %c2_154, %c0_155] : memref<10x10x32xf32, #tpu.memory_space<vmem>>, vector<8x8x32xf32>
    %203 = vector.shape_cast %202 : vector<8x8x32xf32> to vector<64x32xf32>
    %204 = arith.truncf %203 : vector<64x32xf32> to vector<64x32xbf16>
    %c8_156 = arith.constant 8 : index
    %c0_157 = arith.constant 0 : index
    %c0_158 = arith.constant 0 : index
    %205 = vector.load %arg3[%c8_156, %c0_157, %c0_158] : memref<9x32x128xbf16, #tpu.memory_space<vmem>>, vector<1x32x128xbf16>
    %206 = vector.shape_cast %205 : vector<1x32x128xbf16> to vector<32x128xbf16>
    %cst_159 = arith.constant dense<0.000000e+00> : vector<64x128xf32>
    %207 = tpu.matmul %204, %206, %cst_159 {dimension_numbers = #tpu.dot_dimension_numbers<[1], [0], [0], [1], [0, 0, 1, 1], [], []>} : vector<64x32xbf16>, vector<32x128xbf16>, vector<64x128xf32> -> vector<64x128xf32>
    %208 = arith.addf %201, %207 : vector<64x128xf32>
    %209 = vector.extract_strided_slice %208 {offsets = [0, 0], sizes = [64, 32], strides = [1, 1]} : vector<64x128xf32> to vector<64x32xf32>
    %210 = arith.addf %209, %135 : vector<64x32xf32>
    %c0_160 = arith.constant 0 : index
    %c0_161 = arith.constant 0 : index
    %211 = vector.load %arg11[%c0_160, %c0_161] : memref<1x32xf32, #tpu.memory_space<vmem>>, vector<1x32xf32>
    %c0_162 = arith.constant 0 : index
    %c0_163 = arith.constant 0 : index
    %212 = vector.load %arg12[%c0_162, %c0_163] : memref<1x32xf32, #tpu.memory_space<vmem>>, vector<1x32xf32>
    %c0_164 = arith.constant 0 : index
    %c0_165 = arith.constant 0 : index
    %213 = vector.load %arg13[%c0_164, %c0_165] : memref<1x32xf32, #tpu.memory_space<vmem>>, vector<1x32xf32>
    %c0_166 = arith.constant 0 : index
    %c0_167 = arith.constant 0 : index
    %214 = vector.load %arg14[%c0_166, %c0_167] : memref<1x32xf32, #tpu.memory_space<vmem>>, vector<1x32xf32>
    %215 = vector.broadcast %211 : vector<1x32xf32> to vector<64x32xf32>
    %216 = arith.mulf %210, %215 : vector<64x32xf32>
    %217 = vector.broadcast %212 : vector<1x32xf32> to vector<64x32xf32>
    %218 = arith.addf %216, %217 : vector<64x32xf32>
    %cst_168 = arith.constant 0.000000e+00 : f32
    %219 = vector.broadcast %cst_168 : f32 to vector<64x32xf32>
    %220 = arith.maximumf %218, %219 : vector<64x32xf32>
    %221 = vector.shape_cast %220 : vector<64x32xf32> to vector<8x8x32xf32>
    %c1_169 = arith.constant 1 : index
    %c1_170 = arith.constant 1 : index
    %c0_171 = arith.constant 0 : index
    %222 = vector.load %arg16[%c1_169, %c1_170, %c0_171] : memref<10x10x32xf32, #tpu.memory_space<vmem>>, vector<8x8x32xf32>
    tpu.vector_store %arg16[%c1_169, %c1_170, %c0_171], %221 {strides = array<i32>} : memref<10x10x32xf32, #tpu.memory_space<vmem>>, vector<8x8x32xf32>,
    %cst_172 = arith.constant 0.000000e+00 : f32
    %223 = vector.broadcast %cst_172 : f32 to vector<64x128xf32>
    %c0_173 = arith.constant 0 : index
    %c0_174 = arith.constant 0 : index
    %c0_175 = arith.constant 0 : index
    %224 = vector.load %arg16[%c0_173, %c0_174, %c0_175] : memref<10x10x32xf32, #tpu.memory_space<vmem>>, vector<8x8x32xf32>
    %225 = vector.shape_cast %224 : vector<8x8x32xf32> to vector<64x32xf32>
    %226 = arith.truncf %225 : vector<64x32xf32> to vector<64x32xbf16>
    %c0_176 = arith.constant 0 : index
    %c0_177 = arith.constant 0 : index
    %c0_178 = arith.constant 0 : index
    %227 = vector.load %arg9[%c0_176, %c0_177, %c0_178] : memref<9x32x128xbf16, #tpu.memory_space<vmem>>, vector<1x32x128xbf16>
    %228 = vector.shape_cast %227 : vector<1x32x128xbf16> to vector<32x128xbf16>
    %cst_179 = arith.constant dense<0.000000e+00> : vector<64x128xf32>
    %229 = tpu.matmul %226, %228, %cst_179 {dimension_numbers = #tpu.dot_dimension_numbers<[1], [0], [0], [1], [0, 0, 1, 1], [], []>} : vector<64x32xbf16>, vector<32x128xbf16>, vector<64x128xf32> -> vector<64x128xf32>
    %230 = arith.addf %223, %229 : vector<64x128xf32>
    %c0_180 = arith.constant 0 : index
    %c1_181 = arith.constant 1 : index
    %c0_182 = arith.constant 0 : index
    %231 = vector.load %arg16[%c0_180, %c1_181, %c0_182] : memref<10x10x32xf32, #tpu.memory_space<vmem>>, vector<8x8x32xf32>
    %232 = vector.shape_cast %231 : vector<8x8x32xf32> to vector<64x32xf32>
    %233 = arith.truncf %232 : vector<64x32xf32> to vector<64x32xbf16>
    %c1_183 = arith.constant 1 : index
    %c0_184 = arith.constant 0 : index
    %c0_185 = arith.constant 0 : index
    %234 = vector.load %arg9[%c1_183, %c0_184, %c0_185] : memref<9x32x128xbf16, #tpu.memory_space<vmem>>, vector<1x32x128xbf16>
    %235 = vector.shape_cast %234 : vector<1x32x128xbf16> to vector<32x128xbf16>
    %cst_186 = arith.constant dense<0.000000e+00> : vector<64x128xf32>
    %236 = tpu.matmul %233, %235, %cst_186 {dimension_numbers = #tpu.dot_dimension_numbers<[1], [0], [0], [1], [0, 0, 1, 1], [], []>} : vector<64x32xbf16>, vector<32x128xbf16>, vector<64x128xf32> -> vector<64x128xf32>
    %237 = arith.addf %230, %236 : vector<64x128xf32>
    %c0_187 = arith.constant 0 : index
    %c2_188 = arith.constant 2 : index
    %c0_189 = arith.constant 0 : index
    %238 = vector.load %arg16[%c0_187, %c2_188, %c0_189] : memref<10x10x32xf32, #tpu.memory_space<vmem>>, vector<8x8x32xf32>
    %239 = vector.shape_cast %238 : vector<8x8x32xf32> to vector<64x32xf32>
    %240 = arith.truncf %239 : vector<64x32xf32> to vector<64x32xbf16>
    %c2_190 = arith.constant 2 : index
    %c0_191 = arith.constant 0 : index
    %c0_192 = arith.constant 0 : index
    %241 = vector.load %arg9[%c2_190, %c0_191, %c0_192] : memref<9x32x128xbf16, #tpu.memory_space<vmem>>, vector<1x32x128xbf16>
    %242 = vector.shape_cast %241 : vector<1x32x128xbf16> to vector<32x128xbf16>
    %cst_193 = arith.constant dense<0.000000e+00> : vector<64x128xf32>
    %243 = tpu.matmul %240, %242, %cst_193 {dimension_numbers = #tpu.dot_dimension_numbers<[1], [0], [0], [1], [0, 0, 1, 1], [], []>} : vector<64x32xbf16>, vector<32x128xbf16>, vector<64x128xf32> -> vector<64x128xf32>
    %244 = arith.addf %237, %243 : vector<64x128xf32>
    %c1_194 = arith.constant 1 : index
    %c0_195 = arith.constant 0 : index
    %c0_196 = arith.constant 0 : index
    %245 = vector.load %arg16[%c1_194, %c0_195, %c0_196] : memref<10x10x32xf32, #tpu.memory_space<vmem>>, vector<8x8x32xf32>
    %246 = vector.shape_cast %245 : vector<8x8x32xf32> to vector<64x32xf32>
    %247 = arith.truncf %246 : vector<64x32xf32> to vector<64x32xbf16>
    %c3_197 = arith.constant 3 : index
    %c0_198 = arith.constant 0 : index
    %c0_199 = arith.constant 0 : index
    %248 = vector.load %arg9[%c3_197, %c0_198, %c0_199] : memref<9x32x128xbf16, #tpu.memory_space<vmem>>, vector<1x32x128xbf16>
    %249 = vector.shape_cast %248 : vector<1x32x128xbf16> to vector<32x128xbf16>
    %cst_200 = arith.constant dense<0.000000e+00> : vector<64x128xf32>
    %250 = tpu.matmul %247, %249, %cst_200 {dimension_numbers = #tpu.dot_dimension_numbers<[1], [0], [0], [1], [0, 0, 1, 1], [], []>} : vector<64x32xbf16>, vector<32x128xbf16>, vector<64x128xf32> -> vector<64x128xf32>
    %251 = arith.addf %244, %250 : vector<64x128xf32>
    %c1_201 = arith.constant 1 : index
    %c1_202 = arith.constant 1 : index
    %c0_203 = arith.constant 0 : index
    %252 = vector.load %arg16[%c1_201, %c1_202, %c0_203] : memref<10x10x32xf32, #tpu.memory_space<vmem>>, vector<8x8x32xf32>
    %253 = vector.shape_cast %252 : vector<8x8x32xf32> to vector<64x32xf32>
    %254 = arith.truncf %253 : vector<64x32xf32> to vector<64x32xbf16>
    %c4_204 = arith.constant 4 : index
    %c0_205 = arith.constant 0 : index
    %c0_206 = arith.constant 0 : index
    %255 = vector.load %arg9[%c4_204, %c0_205, %c0_206] : memref<9x32x128xbf16, #tpu.memory_space<vmem>>, vector<1x32x128xbf16>
    %256 = vector.shape_cast %255 : vector<1x32x128xbf16> to vector<32x128xbf16>
    %cst_207 = arith.constant dense<0.000000e+00> : vector<64x128xf32>
    %257 = tpu.matmul %254, %256, %cst_207 {dimension_numbers = #tpu.dot_dimension_numbers<[1], [0], [0], [1], [0, 0, 1, 1], [], []>} : vector<64x32xbf16>, vector<32x128xbf16>, vector<64x128xf32> -> vector<64x128xf32>
    %258 = arith.addf %251, %257 : vector<64x128xf32>
    %c1_208 = arith.constant 1 : index
    %c2_209 = arith.constant 2 : index
    %c0_210 = arith.constant 0 : index
    %259 = vector.load %arg16[%c1_208, %c2_209, %c0_210] : memref<10x10x32xf32, #tpu.memory_space<vmem>>, vector<8x8x32xf32>
    %260 = vector.shape_cast %259 : vector<8x8x32xf32> to vector<64x32xf32>
    %261 = arith.truncf %260 : vector<64x32xf32> to vector<64x32xbf16>
    %c5_211 = arith.constant 5 : index
    %c0_212 = arith.constant 0 : index
    %c0_213 = arith.constant 0 : index
    %262 = vector.load %arg9[%c5_211, %c0_212, %c0_213] : memref<9x32x128xbf16, #tpu.memory_space<vmem>>, vector<1x32x128xbf16>
    %263 = vector.shape_cast %262 : vector<1x32x128xbf16> to vector<32x128xbf16>
    %cst_214 = arith.constant dense<0.000000e+00> : vector<64x128xf32>
    %264 = tpu.matmul %261, %263, %cst_214 {dimension_numbers = #tpu.dot_dimension_numbers<[1], [0], [0], [1], [0, 0, 1, 1], [], []>} : vector<64x32xbf16>, vector<32x128xbf16>, vector<64x128xf32> -> vector<64x128xf32>
    %265 = arith.addf %258, %264 : vector<64x128xf32>
    %c2_215 = arith.constant 2 : index
    %c0_216 = arith.constant 0 : index
    %c0_217 = arith.constant 0 : index
    %266 = vector.load %arg16[%c2_215, %c0_216, %c0_217] : memref<10x10x32xf32, #tpu.memory_space<vmem>>, vector<8x8x32xf32>
    %267 = vector.shape_cast %266 : vector<8x8x32xf32> to vector<64x32xf32>
    %268 = arith.truncf %267 : vector<64x32xf32> to vector<64x32xbf16>
    %c6_218 = arith.constant 6 : index
    %c0_219 = arith.constant 0 : index
    %c0_220 = arith.constant 0 : index
    %269 = vector.load %arg9[%c6_218, %c0_219, %c0_220] : memref<9x32x128xbf16, #tpu.memory_space<vmem>>, vector<1x32x128xbf16>
    %270 = vector.shape_cast %269 : vector<1x32x128xbf16> to vector<32x128xbf16>
    %cst_221 = arith.constant dense<0.000000e+00> : vector<64x128xf32>
    %271 = tpu.matmul %268, %270, %cst_221 {dimension_numbers = #tpu.dot_dimension_numbers<[1], [0], [0], [1], [0, 0, 1, 1], [], []>} : vector<64x32xbf16>, vector<32x128xbf16>, vector<64x128xf32> -> vector<64x128xf32>
    %272 = arith.addf %265, %271 : vector<64x128xf32>
    %c2_222 = arith.constant 2 : index
    %c1_223 = arith.constant 1 : index
    %c0_224 = arith.constant 0 : index
    %273 = vector.load %arg16[%c2_222, %c1_223, %c0_224] : memref<10x10x32xf32, #tpu.memory_space<vmem>>, vector<8x8x32xf32>
    %274 = vector.shape_cast %273 : vector<8x8x32xf32> to vector<64x32xf32>
    %275 = arith.truncf %274 : vector<64x32xf32> to vector<64x32xbf16>
    %c7_225 = arith.constant 7 : index
    %c0_226 = arith.constant 0 : index
    %c0_227 = arith.constant 0 : index
    %276 = vector.load %arg9[%c7_225, %c0_226, %c0_227] : memref<9x32x128xbf16, #tpu.memory_space<vmem>>, vector<1x32x128xbf16>
    %277 = vector.shape_cast %276 : vector<1x32x128xbf16> to vector<32x128xbf16>
    %cst_228 = arith.constant dense<0.000000e+00> : vector<64x128xf32>
    %278 = tpu.matmul %275, %277, %cst_228 {dimension_numbers = #tpu.dot_dimension_numbers<[1], [0], [0], [1], [0, 0, 1, 1], [], []>} : vector<64x32xbf16>, vector<32x128xbf16>, vector<64x128xf32> -> vector<64x128xf32>
    %279 = arith.addf %272, %278 : vector<64x128xf32>
    %c2_229 = arith.constant 2 : index
    %c2_230 = arith.constant 2 : index
    %c0_231 = arith.constant 0 : index
    %280 = vector.load %arg16[%c2_229, %c2_230, %c0_231] : memref<10x10x32xf32, #tpu.memory_space<vmem>>, vector<8x8x32xf32>
    %281 = vector.shape_cast %280 : vector<8x8x32xf32> to vector<64x32xf32>
    %282 = arith.truncf %281 : vector<64x32xf32> to vector<64x32xbf16>
    %c8_232 = arith.constant 8 : index
    %c0_233 = arith.constant 0 : index
    %c0_234 = arith.constant 0 : index
    %283 = vector.load %arg9[%c8_232, %c0_233, %c0_234] : memref<9x32x128xbf16, #tpu.memory_space<vmem>>, vector<1x32x128xbf16>
    %284 = vector.shape_cast %283 : vector<1x32x128xbf16> to vector<32x128xbf16>
    %cst_235 = arith.constant dense<0.000000e+00> : vector<64x128xf32>
    %285 = tpu.matmul %282, %284, %cst_235 {dimension_numbers = #tpu.dot_dimension_numbers<[1], [0], [0], [1], [0, 0, 1, 1], [], []>} : vector<64x32xbf16>, vector<32x128xbf16>, vector<64x128xf32> -> vector<64x128xf32>
    %286 = arith.addf %279, %285 : vector<64x128xf32>
    %287 = vector.extract_strided_slice %286 {offsets = [0, 0], sizes = [64, 32], strides = [1, 1]} : vector<64x128xf32> to vector<64x32xf32>
    %288 = vector.broadcast %213 : vector<1x32xf32> to vector<64x32xf32>
    %289 = arith.mulf %287, %288 : vector<64x32xf32>
    %290 = vector.broadcast %214 : vector<1x32xf32> to vector<64x32xf32>
    %291 = arith.addf %289, %290 : vector<64x32xf32>
    %cst_236 = arith.constant 0.000000e+00 : f32
    %292 = vector.broadcast %cst_236 : f32 to vector<64x32xf32>
    %293 = arith.maximumf %291, %292 : vector<64x32xf32>
    %294 = vector.shape_cast %293 : vector<64x32xf32> to vector<8x8x32xf32>
    %c1_237 = arith.constant 1 : index
    %c1_238 = arith.constant 1 : index
    %c0_239 = arith.constant 0 : index
    %295 = vector.load %arg16[%c1_237, %c1_238, %c0_239] : memref<10x10x32xf32, #tpu.memory_space<vmem>>, vector<8x8x32xf32>
    tpu.vector_store %arg16[%c1_237, %c1_238, %c0_239], %294 {strides = array<i32>} : memref<10x10x32xf32, #tpu.memory_space<vmem>>, vector<8x8x32xf32>,
    %cst_240 = arith.constant 0.000000e+00 : f32
    %296 = vector.broadcast %cst_240 : f32 to vector<64x128xf32>
    %c0_241 = arith.constant 0 : index
    %c0_242 = arith.constant 0 : index
    %c0_243 = arith.constant 0 : index
    %297 = vector.load %arg16[%c0_241, %c0_242, %c0_243] : memref<10x10x32xf32, #tpu.memory_space<vmem>>, vector<8x8x32xf32>
    %298 = vector.shape_cast %297 : vector<8x8x32xf32> to vector<64x32xf32>
    %299 = arith.truncf %298 : vector<64x32xf32> to vector<64x32xbf16>
    %c0_244 = arith.constant 0 : index
    %c0_245 = arith.constant 0 : index
    %c0_246 = arith.constant 0 : index
    %300 = vector.load %arg10[%c0_244, %c0_245, %c0_246] : memref<9x32x128xbf16, #tpu.memory_space<vmem>>, vector<1x32x128xbf16>
    %301 = vector.shape_cast %300 : vector<1x32x128xbf16> to vector<32x128xbf16>
    %cst_247 = arith.constant dense<0.000000e+00> : vector<64x128xf32>
    %302 = tpu.matmul %299, %301, %cst_247 {dimension_numbers = #tpu.dot_dimension_numbers<[1], [0], [0], [1], [0, 0, 1, 1], [], []>} : vector<64x32xbf16>, vector<32x128xbf16>, vector<64x128xf32> -> vector<64x128xf32>
    %303 = arith.addf %296, %302 : vector<64x128xf32>
    %c0_248 = arith.constant 0 : index
    %c1_249 = arith.constant 1 : index
    %c0_250 = arith.constant 0 : index
    %304 = vector.load %arg16[%c0_248, %c1_249, %c0_250] : memref<10x10x32xf32, #tpu.memory_space<vmem>>, vector<8x8x32xf32>
    %305 = vector.shape_cast %304 : vector<8x8x32xf32> to vector<64x32xf32>
    %306 = arith.truncf %305 : vector<64x32xf32> to vector<64x32xbf16>
    %c1_251 = arith.constant 1 : index
    %c0_252 = arith.constant 0 : index
    %c0_253 = arith.constant 0 : index
    %307 = vector.load %arg10[%c1_251, %c0_252, %c0_253] : memref<9x32x128xbf16, #tpu.memory_space<vmem>>, vector<1x32x128xbf16>
    %308 = vector.shape_cast %307 : vector<1x32x128xbf16> to vector<32x128xbf16>
    %cst_254 = arith.constant dense<0.000000e+00> : vector<64x128xf32>
    %309 = tpu.matmul %306, %308, %cst_254 {dimension_numbers = #tpu.dot_dimension_numbers<[1], [0], [0], [1], [0, 0, 1, 1], [], []>} : vector<64x32xbf16>, vector<32x128xbf16>, vector<64x128xf32> -> vector<64x128xf32>
    %310 = arith.addf %303, %309 : vector<64x128xf32>
    %c0_255 = arith.constant 0 : index
    %c2_256 = arith.constant 2 : index
    %c0_257 = arith.constant 0 : index
    %311 = vector.load %arg16[%c0_255, %c2_256, %c0_257] : memref<10x10x32xf32, #tpu.memory_space<vmem>>, vector<8x8x32xf32>
    %312 = vector.shape_cast %311 : vector<8x8x32xf32> to vector<64x32xf32>
    %313 = arith.truncf %312 : vector<64x32xf32> to vector<64x32xbf16>
    %c2_258 = arith.constant 2 : index
    %c0_259 = arith.constant 0 : index
    %c0_260 = arith.constant 0 : index
    %314 = vector.load %arg10[%c2_258, %c0_259, %c0_260] : memref<9x32x128xbf16, #tpu.memory_space<vmem>>, vector<1x32x128xbf16>
    %315 = vector.shape_cast %314 : vector<1x32x128xbf16> to vector<32x128xbf16>
    %cst_261 = arith.constant dense<0.000000e+00> : vector<64x128xf32>
    %316 = tpu.matmul %313, %315, %cst_261 {dimension_numbers = #tpu.dot_dimension_numbers<[1], [0], [0], [1], [0, 0, 1, 1], [], []>} : vector<64x32xbf16>, vector<32x128xbf16>, vector<64x128xf32> -> vector<64x128xf32>
    %317 = arith.addf %310, %316 : vector<64x128xf32>
    %c1_262 = arith.constant 1 : index
    %c0_263 = arith.constant 0 : index
    %c0_264 = arith.constant 0 : index
    %318 = vector.load %arg16[%c1_262, %c0_263, %c0_264] : memref<10x10x32xf32, #tpu.memory_space<vmem>>, vector<8x8x32xf32>
    %319 = vector.shape_cast %318 : vector<8x8x32xf32> to vector<64x32xf32>
    %320 = arith.truncf %319 : vector<64x32xf32> to vector<64x32xbf16>
    %c3_265 = arith.constant 3 : index
    %c0_266 = arith.constant 0 : index
    %c0_267 = arith.constant 0 : index
    %321 = vector.load %arg10[%c3_265, %c0_266, %c0_267] : memref<9x32x128xbf16, #tpu.memory_space<vmem>>, vector<1x32x128xbf16>
    %322 = vector.shape_cast %321 : vector<1x32x128xbf16> to vector<32x128xbf16>
    %cst_268 = arith.constant dense<0.000000e+00> : vector<64x128xf32>
    %323 = tpu.matmul %320, %322, %cst_268 {dimension_numbers = #tpu.dot_dimension_numbers<[1], [0], [0], [1], [0, 0, 1, 1], [], []>} : vector<64x32xbf16>, vector<32x128xbf16>, vector<64x128xf32> -> vector<64x128xf32>
    %324 = arith.addf %317, %323 : vector<64x128xf32>
    %c1_269 = arith.constant 1 : index
    %c1_270 = arith.constant 1 : index
    %c0_271 = arith.constant 0 : index
    %325 = vector.load %arg16[%c1_269, %c1_270, %c0_271] : memref<10x10x32xf32, #tpu.memory_space<vmem>>, vector<8x8x32xf32>
    %326 = vector.shape_cast %325 : vector<8x8x32xf32> to vector<64x32xf32>
    %327 = arith.truncf %326 : vector<64x32xf32> to vector<64x32xbf16>
    %c4_272 = arith.constant 4 : index
    %c0_273 = arith.constant 0 : index
    %c0_274 = arith.constant 0 : index
    %328 = vector.load %arg10[%c4_272, %c0_273, %c0_274] : memref<9x32x128xbf16, #tpu.memory_space<vmem>>, vector<1x32x128xbf16>
    %329 = vector.shape_cast %328 : vector<1x32x128xbf16> to vector<32x128xbf16>
    %cst_275 = arith.constant dense<0.000000e+00> : vector<64x128xf32>
    %330 = tpu.matmul %327, %329, %cst_275 {dimension_numbers = #tpu.dot_dimension_numbers<[1], [0], [0], [1], [0, 0, 1, 1], [], []>} : vector<64x32xbf16>, vector<32x128xbf16>, vector<64x128xf32> -> vector<64x128xf32>
    %331 = arith.addf %324, %330 : vector<64x128xf32>
    %c1_276 = arith.constant 1 : index
    %c2_277 = arith.constant 2 : index
    %c0_278 = arith.constant 0 : index
    %332 = vector.load %arg16[%c1_276, %c2_277, %c0_278] : memref<10x10x32xf32, #tpu.memory_space<vmem>>, vector<8x8x32xf32>
    %333 = vector.shape_cast %332 : vector<8x8x32xf32> to vector<64x32xf32>
    %334 = arith.truncf %333 : vector<64x32xf32> to vector<64x32xbf16>
    %c5_279 = arith.constant 5 : index
    %c0_280 = arith.constant 0 : index
    %c0_281 = arith.constant 0 : index
    %335 = vector.load %arg10[%c5_279, %c0_280, %c0_281] : memref<9x32x128xbf16, #tpu.memory_space<vmem>>, vector<1x32x128xbf16>
    %336 = vector.shape_cast %335 : vector<1x32x128xbf16> to vector<32x128xbf16>
    %cst_282 = arith.constant dense<0.000000e+00> : vector<64x128xf32>
    %337 = tpu.matmul %334, %336, %cst_282 {dimension_numbers = #tpu.dot_dimension_numbers<[1], [0], [0], [1], [0, 0, 1, 1], [], []>} : vector<64x32xbf16>, vector<32x128xbf16>, vector<64x128xf32> -> vector<64x128xf32>
    %338 = arith.addf %331, %337 : vector<64x128xf32>
    %c2_283 = arith.constant 2 : index
    %c0_284 = arith.constant 0 : index
    %c0_285 = arith.constant 0 : index
    %339 = vector.load %arg16[%c2_283, %c0_284, %c0_285] : memref<10x10x32xf32, #tpu.memory_space<vmem>>, vector<8x8x32xf32>
    %340 = vector.shape_cast %339 : vector<8x8x32xf32> to vector<64x32xf32>
    %341 = arith.truncf %340 : vector<64x32xf32> to vector<64x32xbf16>
    %c6_286 = arith.constant 6 : index
    %c0_287 = arith.constant 0 : index
    %c0_288 = arith.constant 0 : index
    %342 = vector.load %arg10[%c6_286, %c0_287, %c0_288] : memref<9x32x128xbf16, #tpu.memory_space<vmem>>, vector<1x32x128xbf16>
    %343 = vector.shape_cast %342 : vector<1x32x128xbf16> to vector<32x128xbf16>
    %cst_289 = arith.constant dense<0.000000e+00> : vector<64x128xf32>
    %344 = tpu.matmul %341, %343, %cst_289 {dimension_numbers = #tpu.dot_dimension_numbers<[1], [0], [0], [1], [0, 0, 1, 1], [], []>} : vector<64x32xbf16>, vector<32x128xbf16>, vector<64x128xf32> -> vector<64x128xf32>
    %345 = arith.addf %338, %344 : vector<64x128xf32>
    %c2_290 = arith.constant 2 : index
    %c1_291 = arith.constant 1 : index
    %c0_292 = arith.constant 0 : index
    %346 = vector.load %arg16[%c2_290, %c1_291, %c0_292] : memref<10x10x32xf32, #tpu.memory_space<vmem>>, vector<8x8x32xf32>
    %347 = vector.shape_cast %346 : vector<8x8x32xf32> to vector<64x32xf32>
    %348 = arith.truncf %347 : vector<64x32xf32> to vector<64x32xbf16>
    %c7_293 = arith.constant 7 : index
    %c0_294 = arith.constant 0 : index
    %c0_295 = arith.constant 0 : index
    %349 = vector.load %arg10[%c7_293, %c0_294, %c0_295] : memref<9x32x128xbf16, #tpu.memory_space<vmem>>, vector<1x32x128xbf16>
    %350 = vector.shape_cast %349 : vector<1x32x128xbf16> to vector<32x128xbf16>
    %cst_296 = arith.constant dense<0.000000e+00> : vector<64x128xf32>
    %351 = tpu.matmul %348, %350, %cst_296 {dimension_numbers = #tpu.dot_dimension_numbers<[1], [0], [0], [1], [0, 0, 1, 1], [], []>} : vector<64x32xbf16>, vector<32x128xbf16>, vector<64x128xf32> -> vector<64x128xf32>
    %352 = arith.addf %345, %351 : vector<64x128xf32>
    %c2_297 = arith.constant 2 : index
    %c2_298 = arith.constant 2 : index
    %c0_299 = arith.constant 0 : index
    %353 = vector.load %arg16[%c2_297, %c2_298, %c0_299] : memref<10x10x32xf32, #tpu.memory_space<vmem>>, vector<8x8x32xf32>
    %354 = vector.shape_cast %353 : vector<8x8x32xf32> to vector<64x32xf32>
    %355 = arith.truncf %354 : vector<64x32xf32> to vector<64x32xbf16>
    %c8_300 = arith.constant 8 : index
    %c0_301 = arith.constant 0 : index
    %c0_302 = arith.constant 0 : index
    %356 = vector.load %arg10[%c8_300, %c0_301, %c0_302] : memref<9x32x128xbf16, #tpu.memory_space<vmem>>, vector<1x32x128xbf16>
    %357 = vector.shape_cast %356 : vector<1x32x128xbf16> to vector<32x128xbf16>
    %cst_303 = arith.constant dense<0.000000e+00> : vector<64x128xf32>
    %358 = tpu.matmul %355, %357, %cst_303 {dimension_numbers = #tpu.dot_dimension_numbers<[1], [0], [0], [1], [0, 0, 1, 1], [], []>} : vector<64x32xbf16>, vector<32x128xbf16>, vector<64x128xf32> -> vector<64x128xf32>
    %359 = arith.addf %352, %358 : vector<64x128xf32>
    %360 = vector.extract_strided_slice %359 {offsets = [0, 0], sizes = [64, 32], strides = [1, 1]} : vector<64x128xf32> to vector<64x32xf32>
    %361 = arith.addf %360, %210 : vector<64x32xf32>
    %c0_304 = arith.constant 0 : index
    %c0_305 = arith.constant 0 : index
    %362 = vector.load %arg15[%c0_304, %c0_305] : memref<64x32xf32, #tpu.memory_space<vmem>>, vector<64x32xf32>
    tpu.vector_store %arg15[%c0_304, %c0_305], %361 {strides = array<i32>} : memref<64x32xf32, #tpu.memory_space<vmem>>, vector<64x32xf32>,
    return
  }
  func.func @transform_0(%arg0: i32) -> (i32, i32, i32, i32) {
    %c0_i32 = arith.constant 0 : i32
    %c0_i32_0 = arith.constant 0 : i32
    %c0_i32_1 = arith.constant 0 : i32
    %c0_i32_2 = arith.constant 0 : i32
    return %arg0, %c0_i32, %c0_i32_0, %c0_i32_1 : i32, i32, i32, i32
  }
  func.func @transform_1(%arg0: i32) -> (i32, i32, i32) {
    %c0_i32 = arith.constant 0 : i32
    %c0_i32_0 = arith.constant 0 : i32
    %c0_i32_1 = arith.constant 0 : i32
    %c0_i32_2 = arith.constant 0 : i32
    return %c0_i32, %c0_i32_0, %c0_i32_1 : i32, i32, i32
  }
  func.func @transform_2(%arg0: i32) -> (i32, i32, i32) {
    %c0_i32 = arith.constant 0 : i32
    %c0_i32_0 = arith.constant 0 : i32
    %c0_i32_1 = arith.constant 0 : i32
    %c0_i32_2 = arith.constant 0 : i32
    return %c0_i32, %c0_i32_0, %c0_i32_1 : i32, i32, i32
  }
  func.func @transform_3(%arg0: i32) -> (i32, i32) {
    %c0_i32 = arith.constant 0 : i32
    %c0_i32_0 = arith.constant 0 : i32
    %c0_i32_1 = arith.constant 0 : i32
    return %c0_i32, %c0_i32_0 : i32, i32
  }
  func.func @transform_4(%arg0: i32) -> (i32, i32) {
    %c0_i32 = arith.constant 0 : i32
    %c0_i32_0 = arith.constant 0 : i32
    %c0_i32_1 = arith.constant 0 : i32
    return %c0_i32, %c0_i32_0 : i32, i32
  }
  func.func @transform_5(%arg0: i32) -> (i32, i32) {
    %c0_i32 = arith.constant 0 : i32
    %c0_i32_0 = arith.constant 0 : i32
    %c0_i32_1 = arith.constant 0 : i32
    return %c0_i32, %c0_i32_0 : i32, i32
  }
  func.func @transform_6(%arg0: i32) -> (i32, i32) {
    %c0_i32 = arith.constant 0 : i32
    %c0_i32_0 = arith.constant 0 : i32
    %c0_i32_1 = arith.constant 0 : i32
    return %c0_i32, %c0_i32_0 : i32, i32
  }
  func.func @transform_7(%arg0: i32) -> (i32, i32) {
    %c0_i32 = arith.constant 0 : i32
    %c0_i32_0 = arith.constant 0 : i32
    %c0_i32_1 = arith.constant 0 : i32
    return %c0_i32, %c0_i32_0 : i32, i32
  }
  func.func @transform_8(%arg0: i32) -> (i32, i32, i32) {
    %c0_i32 = arith.constant 0 : i32
    %c0_i32_0 = arith.constant 0 : i32
    %c0_i32_1 = arith.constant 0 : i32
    %c0_i32_2 = arith.constant 0 : i32
    return %c0_i32, %c0_i32_0, %c0_i32_1 : i32, i32, i32
  }
  func.func @transform_9(%arg0: i32) -> (i32, i32, i32) {
    %c0_i32 = arith.constant 0 : i32
    %c0_i32_0 = arith.constant 0 : i32
    %c0_i32_1 = arith.constant 0 : i32
    %c0_i32_2 = arith.constant 0 : i32
    return %c0_i32, %c0_i32_0, %c0_i32_1 : i32, i32, i32
  }
  func.func @transform_10(%arg0: i32) -> (i32, i32) {
    %c0_i32 = arith.constant 0 : i32
    %c0_i32_0 = arith.constant 0 : i32
    %c0_i32_1 = arith.constant 0 : i32
    return %c0_i32, %c0_i32_0 : i32, i32
  }
  func.func @transform_11(%arg0: i32) -> (i32, i32) {
    %c0_i32 = arith.constant 0 : i32
    %c0_i32_0 = arith.constant 0 : i32
    %c0_i32_1 = arith.constant 0 : i32
    return %c0_i32, %c0_i32_0 : i32, i32
  }
  func.func @transform_12(%arg0: i32) -> (i32, i32) {
    %c0_i32 = arith.constant 0 : i32
    %c0_i32_0 = arith.constant 0 : i32
    %c0_i32_1 = arith.constant 0 : i32
    return %c0_i32, %c0_i32_0 : i32, i32
  }
  func.func @transform_13(%arg0: i32) -> (i32, i32) {
    %c0_i32 = arith.constant 0 : i32
    %c0_i32_0 = arith.constant 0 : i32
    %c0_i32_1 = arith.constant 0 : i32
    return %c0_i32, %c0_i32_0 : i32, i32
  }
  func.func @transform_14(%arg0: i32) -> (i32, i32) {
    %c0_i32 = arith.constant 0 : i32
    %c0_i32_0 = arith.constant 0 : i32
    return %arg0, %c0_i32 : i32, i32
  }
}

</mosaic_0001>

<bundles_post_ra>
// kernel: forward.1
= control target key start
LH: loop header
LB: loop body
LE: loop exit
PB: predicated region body
PF: predicated region fallthrough
CT: control target
= control target key end

     0   :  { %19 = vsyncpa [#allocation4], 0  ;;  %s7546_s0 = inlined_call_operand.vmem [shape: f32[8,9,9,16], index: 0, kind: input, shape index: {}]   ;;  %s7547_s1 = inlined_call_operand.vmem [shape: bf16[9,16,128], index: 1, kind: input, shape index: {}]   ;;  %s7548_s2 = inlined_call_operand.vmem [shape: bf16[9,32,128], index: 2, kind: input, shape index: {}]   ;;  %s7549_s3 = inlined_call_operand.vmem [shape: bf16[16,128], index: 3, kind: input, shape index: {}]   ;;  %s7550_s4 = inlined_call_operand.vmem [shape: f32[1,16], index: 4, kind: input, shape index: {}]   ;;  %s7551_s5 = inlined_call_operand.vmem [shape: f32[1,16], index: 5, kind: input, shape index: {}]   ;;  %s7552_s6 = inlined_call_operand.vmem [shape: f32[1,32], index: 6, kind: input, shape index: {}, may-alias: {6,10,12}]   ;;  %s7553_s7 = inlined_call_operand.vmem [shape: f32[1,32], index: 7, kind: input, shape index: {}, may-alias: {7,11,13}]   ;;  %s7554_s8 = inlined_call_operand.vmem [shape: bf16[9,32,128], index: 8, kind: input, shape index: {}]   ;;  %s7555_s9 = inlined_call_operand.vmem [shape: bf16[9,32,128], index: 9, kind: input, shape index: {}]   ;;  %s7556_s10 = inlined_call_operand.vmem [shape: f32[1,32], index: 10, kind: input, shape index: {}, may-alias: {6,10,12}]   ;;  %s7557_s11 = inlined_call_operand.vmem [shape: f32[1,32], index: 11, kind: input, shape index: {}, may-alias: {7,11,13}]   ;;  %s7558_s12 = inlined_call_operand.vmem [shape: f32[1,32], index: 12, kind: input, shape index: {}, may-alias: {6,10,12}]   ;;  %s7559_s13 = inlined_call_operand.vmem [shape: f32[1,32], index: 13, kind: input, shape index: {}, may-alias: {7,11,13}]   ;;  %s7560_s14 = inlined_call_operand.hbm [shape: f32[128,32], index: 14, kind: output, shape index: {}]  }
   0x1   :  { %21 = vsyncpa [#allocation4 + $0x1], 0  ;;  %s6295_s29 = smov 0   ;;  %s6297_s30 = smov 0  }
   0x2   :  { %s6299_s15 = smov 0   ;;  %s6301_s16 = smov 0  }
   0x3 LB: > { %7592 = sst [smem:[#allocation6_spill]] %s6210_s15  ;;  %s6316_s17 = sadd.s32 4294967295, %s6214_s16   ;;  %s6214_s16 = sphi %s6301_s16, %s7678_s16   ;;  %s6210_s15 = sphi %s6299_s15, %s7680_s15   ;;  %s6206_s30 = sphi %s6297_s30, %s7682_s30   ;;  %s6202_s29 = sphi %s6295_s29, %s7681_s29  }
   0x4   : > { %s5008_s18 = sadd.s32 4294967294, %s6214_s16   ;;  %s6320_s19 = sadd.s32 1, %s6214_s16  }
   0x5   : > { %7593 = sst [smem:[#allocation7_spill]] %s6320_s19  ;;  %s333_s20 = sadd.s32 1, %s6210_s15 }
   0x6   : > { %s330_s21 = ssub.s32 %s6214_s16, %s6320_s19  ;;  %p343_p0 = scmp.ne.s32.totalorder %s6210_s15, %s6206_s30 }
   0x7   : > { %p331_p1 = scmp.eq.s32.totalorder %s330_s21, 0  ;;  %p344_p2 = scmp.eq.s32.totalorder %s6316_s17, 1 }
   0x8   : > { %p349_p3 = scmp.ne.s32.totalorder %s6206_s30, %s6202_s29  ;;  %p350_p4 = scmp.eq.s32.totalorder %s5008_s18, 1 }
   0x9   : > { %s6331_s22 = scalar_select %p331_p1, %s6210_s15, %s333_s20  }
   0xa   : > { %p6333_p5 = por %p344_p2, %p343_p0  ;;  %p6337_p6 = por %p350_p4, %p349_p3 }
   0xb   : > { %7594 = sst [smem:[#allocation8_spill]] %s6331_s22  ;;  %p5011_p7 = scmp.ge.s32.totalorder %s6214_s16, 1 }
   0xc   : > { %s7596_s24 = scalar_select %p6337_p6, 1, 0 }
   0xd   : > { %p417_p8 = scmp.lt.s32.totalorder %s6214_s16, 3 }
   0xe   : > { %7597 = sst [smem:[#allocation9_spill]] %s7596_s24 }
   0xf   : > { %p418_p9 = pnand %p5011_p7, %p417_p8 }
  0x11   : > { %421 = sbr.rel (%p418_p9) target bundleno = 1169 (0x491), region = 76 }
  0x16   : > { %v6090_v0 = vld [vmem:[%s7547_s1 + $0x8] sm:$0xff]   ;;  %s5013_s27 = sshll.u32 %s6316_s17, 2  ;;  %v6350_v1 = vld [vmem:[%s7547_s1] sm:$0xff]   ;;  %v6355_v2 = vld [vmem:[%s7547_s1 + $0x10] sm:$0xff]   ;;  %vm595_vm0 = vcmask 130048   ;;  %vm473_vm1 = vcmask 261120  }
  0x17   : > { %p465_p10 = scmp.lt.s32.totalorder %s5013_s27, 7  ;;  %6045 = vmatprep.subr.bf16.mxu1 %v6090_v0  ;;  %5621 = vmatprep.subr.bf16.mxu0 %v6090_v0  ;;  %v6362_v3 = vld [vmem:[%s7550_s4] ss:$0 sm:$0xff]  ;;  %v6462_v58 = vld [vmem:[%s7547_s1 + $0x18] sm:$0xff]   ;;  %vm475_vm2 = vcmask 254976   ;;  %s461_s24 = sand.u32 1, %s6206_s30  }
  0x18   : > { %6046 = vmatpush3.bf16.msra.mxu1 %v6090_v0  ;;  %5622 = vmatpush3.bf16.msra.mxu0 %v6090_v0  ;;  %v6372_v4 = vld [vmem:[%s7551_s5] ss:$0 sm:$0xff]  ;;  %s5408_s21 = sshll.u32 %s6316_s17, 10  ;;  %s7506_s17 = scalar_lea.sflag [#allocation4], %s461_s24 }
  0x19   : > { %s7684_s27 = smov (!%p465_p10, %s5013_s27), 7  ;;  %5631 = vmatprep.subr.bf16.mxu1 %v6350_v1  ;;  %5641 = vmatprep.subr.bf16.mxu0 %v6355_v2  ;;  %v6441_v49 = vld [vmem:[%s7547_s1 + $0x20] sm:$0xff]   ;;  %s7495_s18 = scalar_lea.hbm %s7560_s14, %s5408_s21 }
  0x1a   : > { %s6047_s25 = smul.u32 144, %s7684_s27  ;;  %s5012_s27 = sshll.u32 %s461_s24, 6 }
  0x1b   : > { %s7469_s20 = scalar_lea.vmem [#allocation3], %s5012_s27  ;;  %s6217_s22 = smov [#allocation3]  }
  0x1c   : > { %s6367_s15 = scalar_lea.vmem %s7546_s0, %s6047_s25  ;;  %s4946_s25 = sshll.u32 %s7469_s20, 4  ;;  %s7497_s25 = int_to_ptr.vmem [resolvable:$true] %s4946_s25 }
  0x1d   : > { %v5017_v5 = vld [vmem:[%s6367_s15 + $0x90] sm:$0xff]  ;;  %v5018_v6 = vld [vmem:[%s6367_s15 + $0xa0] sm:$0xff]  ;;  %s6154_s19 = scalar_lea.vmem %s7497_s25, 1024 }
  0x1e   : > { %v5021_v7 = vld [vmem:[%s6367_s15 + $0xd0] sm:$0xff]  ;;  %v558_v8 = vmul.f32 %v5017_v5, %v6362_v3  ;;  %v559_v9 = vmul.f32 %v5018_v6, %v6362_v3  ;;  %v5022_v10 = vld [vmem:[%s6367_s15 + $0xe0] sm:$0xff]  ;;  %p6155_p11 = scmp.ne.s32.totalorder %s7497_s25, %s6154_s19 }
  0x1f   : > { %v562_v11 = vmul.f32 %v5021_v7, %v6362_v3  ;;  %v5019_v12 = vld [vmem:[%s6367_s15 + $0xb0] sm:$0xff]  ;;  %v5020_v13 = vld [vmem:[%s6367_s15 + $0xc0] sm:$0xff]  ;;  %v563_v14 = vmul.f32 %v5022_v10, %v6362_v3 }
  0x20   : > { %v560_v15 = vmul.f32 %v5019_v12, %v6362_v3  ;;  %v561_v16 = vmul.f32 %v5020_v13, %v6362_v3  ;;  %v5023_v17 = vld [vmem:[%s6367_s15 + $0xf0] sm:$0xff]  ;;  %v5024_v18 = vld [vmem:[%s6367_s15 + $0x100] sm:$0xff]  ;;  %v566_v19 = vadd.f32 %v6372_v4, %v558_v8  ;;  %v6390_v20 = vadd.f32 %v6372_v4, %v559_v9  ;;  %p6156_p12 = pnand %p6155_p11, %p6333_p5 }
  0x21   : > { %v6393_v21 = vadd.f32 %v6372_v4, %v562_v11  ;;  %v564_v22 = vmul.f32 %v5023_v17, %v6362_v3  ;;  %v6397_v23 = vadd.f32 %v6372_v4, %v563_v14  ;;  %v565_v26 = vmul.f32 %v5024_v18, %v6362_v3  ;;  %v499_v27 = vld [vmem:[%s6367_s15] sm:$0xff]  ;;  %v500_v28 = vld [vmem:[%s6367_s15 + $0x10] sm:$0xff] }
  0x22   : > { %v6400_v24 = vadd.f32 %v6372_v4, %v560_v15  ;;  %v6403_v25 = vadd.f32 %v6372_v4, %v561_v16  ;;  %v574_v29 = vmax.f32 %v566_v19, 0.0  ;;  %v575_v30 = vmax.f32 %v6390_v20, 0.0  ;;  %v756_v33 = vld [vmem:[%s6367_s15 + $0x1] sm:$0xff]  ;;  %v757_v38 = vld [vmem:[%s6367_s15 + $0x11] sm:$0xff]  ;;  %p6157_p13 = pneg %p6156_p12 }
  0x23   : > { %v7570_v31 = vmax.f32 %v6393_v21, 0.0  ;;  %v6411_v32 = vadd.f32 %v6372_v4, %v564_v22  ;;  %v7567_v34 = vmax.f32 %v6397_v23, 0.0  ;;  %v6418_v37 = vadd.f32 %v6372_v4, %v565_v26  ;;  %v501_v39 = vld [vmem:[%s6367_s15 + $0x20] sm:$0xff]  ;;  %v502_v44 = vld [vmem:[%s6367_s15 + $0x30] sm:$0xff] }
  0x24   : > { %v576_v35 = vmax.f32 %v6400_v24, 0.0  ;;  %v7571_v36 = vmax.f32 %v6403_v25, 0.0  ;;  %v582_v40 = vpack.c.bf16 %v575_v30, %v574_v29  ;;  %v513_v42 = vmul.f32 %v6362_v3, %v499_v27  ;;  %v758_v54 = vld [vmem:[%s6367_s15 + $0x21] sm:$0xff]  ;;  %v759_v55 = vld [vmem:[%s6367_s15 + $0x31] sm:$0xff] }
  0x25   : > { %v7566_v41 = vmax.f32 %v6411_v32, 0.0  ;;  %v514_v43 = vmul.f32 %v6362_v3, %v500_v28  ;;  %v584_v45 = vpack.c.bf16 %v7567_v34, %v7570_v31  ;;  %v581_v47 = vmax.f32 %v6418_v37, 0.0  ;;  %v503_v60 = vld [vmem:[%s6367_s15 + $0x40] sm:$0xff]  ;;  %v504_v5 = vld [vmem:[%s6367_s15 + $0x50] sm:$0xff] }
  0x26   : > { %v583_v46 = vpack.c.bf16 %v7571_v36, %v576_v35  ;;  %v764_v48 = vmul.f32 %v6362_v3, %v756_v33  ;;  %5623 = vmatprep.mubr.msk.bf16.mxu0 %vm595_vm0, %v582_v40  ;;  %v527_v50 = vadd.f32 %v6372_v4, %v513_v42  ;;  %v765_v52 = vmul.f32 %v6362_v3, %v757_v38  ;;  %v760_v9 = vld [vmem:[%s6367_s15 + $0x41] sm:$0xff]  ;;  %v761_v10 = vld [vmem:[%s6367_s15 + $0x51] sm:$0xff] }
  0x27   : > { %v6446_v51 = vadd.f32 %v6372_v4, %v514_v43  ;;  %v515_v53 = vmul.f32 %v6362_v3, %v501_v39  ;;  %5627 = vmatprep.mubr.msk.bf16.mxu1 %vm595_vm0, %v584_v45  ;;  %v585_v56 = vpack.c.bf16 %v581_v47, %v7566_v41  ;;  %v516_v59 = vmul.f32 %v6362_v3, %v502_v44  ;;  %v505_v18 = vld [vmem:[%s6367_s15 + $0x60] sm:$0xff]  ;;  %v506_v28 = vld [vmem:[%s6367_s15 + $0x70] sm:$0xff]  ;;  %v6523_v43 = vld [vmem:[%s7547_s1 + $0x28] sm:$0xff]  }
  0x28   : > { %5624 = vmatmul.mubr.msk.bf16.vlgmr.msra.gmra.mxu0 %vm595_vm0, %v583_v46  ;;  %v772_v57 = vadd.f32 %v6372_v4, %v764_v48  ;;  %v535_v61 = vmax.f32 %v527_v50, 0.0  ;;  %v6469_v63 = vadd.f32 %v6372_v4, %v765_v52  ;;  %v766_v8 = vmul.f32 %v6362_v3, %v758_v54  ;;  %v762_v29 = vld [vmem:[%s6367_s15 + $0x61] sm:$0xff]  ;;  %v763_v42 = vld [vmem:[%s6367_s15 + $0x71] sm:$0xff] }
  0x29   : > { %5642 = vmatpush3.bf16.msra.mxu0 %v6355_v2  ;;  %v536_v62 = vmax.f32 %v6446_v51, 0.0  ;;  %v6472_v0 = vadd.f32 %v6372_v4, %v515_v53  ;;  %5628 = vmatmul.mubr.msk.bf16.vlgmr.msra.gmra.mxu1 %vm595_vm0, %v585_v56  ;;  %v6477_v7 = vadd.f32 %v6372_v4, %v516_v59  ;;  %v767_v2 = vmul.f32 %v6362_v3, %v759_v55  ;;  %v5044_v50 = vld [vmem:[%s6367_s15 + $0x120] sm:$0xff]  ;;  %v5045_v52 = vld [vmem:[%s6367_s15 + $0x130] sm:$0xff] }
  0x2a   : > { %v780_v6 = vmax.f32 %v772_v57, 0.0  ;;  %5661 = vmatprep.subr.bf16.mxu0 %v6441_v49  ;;  %5632 = vmatpush3.bf16.msra.mxu1 %v6350_v1  ;;  %v781_v12 = vmax.f32 %v6469_v63, 0.0  ;;  %v517_v14 = vmul.f32 %v6362_v3, %v503_v60  ;;  %v6493_v16 = vadd.f32 %v6372_v4, %v766_v8  ;;  %v6539_v53 = vld [vmem:[%s7547_s1 + $0x30] sm:$0xff]   ;;  %v5060_v60 = vld [vmem:[%s6367_s15 + $0x1c0] sm:$0xff] }
  0x2b   : > { %v543_v11 = vpack.c.bf16 %v536_v62, %v535_v61  ;;  %v537_v13 = vmax.f32 %v6472_v0, 0.0  ;;  %5651 = vmatprep.subr.bf16.mxu1 %v6462_v58  ;;  %v538_v15 = vmax.f32 %v6477_v7, 0.0  ;;  %v6496_v1 = vadd.f32 %v6372_v4, %v767_v2  ;;  %v5059_v59 = vld [vmem:[%s6367_s15 + $0x1b0] sm:$0xff]  ;;  %v5046_v61 = vld [vmem:[%s6367_s15 + $0x140] sm:$0xff] }
  0x2c   : > { %v518_v17 = vmul.f32 %v6362_v3, %v504_v5  ;;  %v788_v19 = vpack.c.bf16 %v781_v12, %v780_v6  ;;  %v6504_v22 = vadd.f32 %v6372_v4, %v517_v14  ;;  %v768_v26 = vmul.f32 %v6362_v3, %v760_v9  ;;  %v5047_v9 = vld [vmem:[%s6367_s15 + $0x150] sm:$0xff]  ;;  %v5064_v41 = vld [vmem:[%s6367_s15 + $0x200] sm:$0xff] }
  0x2d   : > { %5633 = vmatprep.mubr.msk.bf16.mxu1 %vm595_vm0, %v543_v11  ;;  %v769_v27 = vmul.f32 %v6362_v3, %v761_v10  ;;  %v544_v33 = vpack.c.bf16 %v538_v15, %v537_v13  ;;  %v782_v38 = vmax.f32 %v6493_v16, 0.0  ;;  %v7569_v39 = vmax.f32 %v6496_v1, 0.0 }
  0x2e   : > { %v6517_v40 = vadd.f32 %v6372_v4, %v518_v17  ;;  %5643 = vmatprep.mubr.msk.bf16.mxu0 %vm595_vm0, %v788_v19  ;;  %v539_v44 = vmax.f32 %v6504_v22, 0.0  ;;  %v6528_v45 = vadd.f32 %v6372_v4, %v768_v26  ;;  %v519_v48 = vmul.f32 %v6362_v3, %v505_v18 }
  0x2f   : > { %v6531_v46 = vadd.f32 %v6372_v4, %v769_v27  ;;  %v789_v54 = vpack.c.bf16 %v7569_v39, %v782_v38  ;;  %v520_v56 = vmul.f32 %v6362_v3, %v506_v28  ;;  %v770_v57 = vmul.f32 %v6362_v3, %v762_v29  ;;  %v5061_v27 = vld [vmem:[%s6367_s15 + $0x1d0] sm:$0xff] }
  0x30   : > { %v540_v55 = vmax.f32 %v6517_v40, 0.0  ;;  %v7568_v5 = vmax.f32 %v6528_v45, 0.0  ;;  %v6554_v8 = vadd.f32 %v6372_v4, %v519_v48  ;;  %v771_v2 = vmul.f32 %v6362_v3, %v763_v42  ;;  %v5048_v42 = vld [vmem:[%s6367_s15 + $0x160] sm:$0xff] }
  0x31   : > { %v7565_v6 = vmax.f32 %v6531_v46, 0.0  ;;  %5634 = vmatmul.mubr.msk.bf16.vlgmr.msra.gmra.mxu1 %vm595_vm0, %v544_v33  ;;  %5644 = vmatmul.mubr.msk.bf16.vlgmr.msra.gmra.mxu0 %vm595_vm0, %v789_v54  ;;  %v6565_v11 = vadd.f32 %v6372_v4, %v520_v56  ;;  %v6568_v14 = vadd.f32 %v6372_v4, %v770_v57  ;;  %v895_v26 = vmul.f32 %v5044_v50, %v6362_v3  ;;  %v5062_v33 = vld [vmem:[%s6367_s15 + $0x1e0] sm:$0xff] }
  0x32   : > { %v545_v10 = vpack.c.bf16 %v540_v55, %v539_v44  ;;  %5652 = vmatpush3.bf16.msra.mxu1 %v6462_v58  ;;  %5662 = vmatpush3.bf16.msra.mxu0 %v6441_v49  ;;  %v541_v18 = vmax.f32 %v6554_v8, 0.0  ;;  %v6578_v19 = vadd.f32 %v6372_v4, %v771_v2  ;;  %v896_v28 = vmul.f32 %v5045_v52, %v6362_v3  ;;  %v5049_v52 = vld [vmem:[%s6367_s15 + $0x170] sm:$0xff] }
  0x33   : > { %v790_v17 = vpack.c.bf16 %v7565_v6, %v7568_v5  ;;  %v542_v58 = vmax.f32 %v6565_v11, 0.0  ;;  %v7572_v49 = vmax.f32 %v6568_v14, 0.0  ;;  %v1026_v29 = vmul.f32 %v5059_v59, %v6362_v3  ;;  %5671 = vmatprep.subr.bf16.mxu1 %v6523_v43  ;;  %5681 = vmatprep.subr.bf16.mxu0 %v6539_v53  ;;  %v5050_v5 = vld [vmem:[%s6367_s15 + $0x180] sm:$0xff] }
  0x34   : > { %5637 = vmatprep.mubr.msk.bf16.mxu1 %vm595_vm0, %v545_v10  ;;  %v7573_v48 = vmax.f32 %v6578_v19, 0.0  ;;  %v903_v50 = vadd.f32 %v6372_v4, %v895_v26  ;;  %v1027_v54 = vmul.f32 %v5060_v60, %v6362_v3  ;;  %v897_v56 = vmul.f32 %v5046_v61, %v6362_v3 }
  0x35   : > { %5647 = vmatprep.mubr.msk.bf16.mxu0 %vm595_vm0, %v790_v17  ;;  %v546_v57 = vpack.c.bf16 %v542_v58, %v541_v18  ;;  %v904_v59 = vadd.f32 %v6372_v4, %v896_v28  ;;  %v1034_v2 = vadd.f32 %v6372_v4, %v1026_v29  ;;  %v898_v10 = vmul.f32 %v5047_v9, %v6362_v3  ;;  %v5063_v17 = vld [vmem:[%s6367_s15 + $0x1f0] sm:$0xff] }
  0x36   : > { %v791_v60 = vpack.c.bf16 %v7573_v48, %v7572_v49  ;;  %v911_v61 = vmax.f32 %v903_v50, 0.0  ;;  %v1035_v26 = vadd.f32 %v6372_v4, %v1027_v54  ;;  %v905_v6 = vadd.f32 %v6372_v4, %v897_v56  ;;  %v5051_v50 = vld [vmem:[%s6367_s15 + $0x190] sm:$0xff] }
  0x37   : > { %v912_v34 = vmax.f32 %v904_v59, 0.0  ;;  %v1042_v28 = vmax.f32 %v1034_v2, 0.0  ;;  %v906_v29 = vadd.f32 %v6372_v4, %v898_v10  ;;  %v1028_v9 = vmul.f32 %v5061_v27, %v6362_v3  ;;  %v5065_v48 = vld [vmem:[%s6367_s15 + $0x210] sm:$0xff]  ;;  %v5066_v2 = vld [vmem:[%s6367_s15 + $0x220] sm:$0xff] }
  0x38   : > { %v1043_v39 = vmax.f32 %v1035_v26, 0.0  ;;  %v913_v31 = vmax.f32 %v905_v6, 0.0  ;;  %v1029_v36 = vmul.f32 %v5062_v33, %v6362_v3  ;;  %v899_v49 = vmul.f32 %v5048_v42, %v6362_v3  ;;  %v5074_v26 = vld [vmem:[%s6367_s15 + $0x121] sm:$0xff] }
  0x39   : > { %5638 = vmatmul.mubr.msk.bf16.gmra.mxu1 %vm595_vm0, %v546_v57  ;;  %5648 = vmatmul.mubr.msk.bf16.gmra.mxu0 %vm595_vm0, %v791_v60  ;;  %v919_v54 = vpack.c.bf16 %v912_v34, %v911_v61  ;;  %v914_v56 = vmax.f32 %v906_v29, 0.0  ;;  %v1036_v59 = vadd.f32 %v6372_v4, %v1028_v9  ;;  %v900_v27 = vmul.f32 %v5049_v52, %v6362_v3 }
  0x3a   : > { %v6624_v10 = vpack.c.bf16 %v1043_v39, %v1042_v28  ;;  %v1037_v6 = vadd.f32 %v6372_v4, %v1029_v36  ;;  %v907_v33 = vadd.f32 %v6372_v4, %v899_v49  ;;  %v1030_v42 = vmul.f32 %v5063_v17, %v6362_v3 }
  0x3b   : > { %5653 = vmatprep.mubr.msk.bf16.mxu1 %vm595_vm0, %v919_v54  ;;  %v920_v57 = vpack.c.bf16 %v914_v56, %v913_v31  ;;  %v1044_v60 = vmax.f32 %v1036_v59, 0.0  ;;  %v908_v34 = vadd.f32 %v6372_v4, %v900_v27  ;;  %v1031_v61 = vmul.f32 %v5064_v41, %v6362_v3  ;;  %v5075_v41 = vld [vmem:[%s6367_s15 + $0x131] sm:$0xff] }
  0x3c   : > { %5663 = vmatprep.mubr.msk.bf16.mxu0 %vm595_vm0, %v6624_v10  ;;  %v1045_v39 = vmax.f32 %v1037_v6, 0.0  ;;  %v915_v52 = vmax.f32 %v907_v33, 0.0  ;;  %v1038_v36 = vadd.f32 %v6372_v4, %v1030_v42  ;;  %v901_v49 = vmul.f32 %v5050_v5, %v6362_v3  ;;  %v6648_v5 = vld [vmem:[%s7547_s1 + $0x38] sm:$0xff]   ;;  %v5076_v33 = vld [vmem:[%s6367_s15 + $0x141] sm:$0xff] }
  0x3d   : > { %v916_v17 = vmax.f32 %v908_v34, 0.0  ;;  %v1039_v28 = vadd.f32 %v6372_v4, %v1031_v61  ;;  %v902_v31 = vmul.f32 %v5051_v50, %v6362_v3  ;;  %v1032_v29 = vmul.f32 %v5065_v48, %v6362_v3  ;;  %v5077_v61 = vld [vmem:[%s6367_s15 + $0x151] sm:$0xff] }
  0x3e   : > { %v6641_v9 = vpack.c.bf16 %v1045_v39, %v1044_v60  ;;  %v1046_v54 = vmax.f32 %v1038_v36, 0.0  ;;  %v909_v56 = vadd.f32 %v6372_v4, %v901_v49  ;;  %v1033_v59 = vmul.f32 %v5066_v2, %v6362_v3  ;;  %v6098_v39 = vld [vmem:[%s7547_s1 + $0x40] sm:$0xff]  }
  0x3f   : > { %v921_v27 = vpack.c.bf16 %v916_v17, %v915_v52  ;;  %v1047_v6 = vmax.f32 %v1039_v28, 0.0  ;;  %v910_v50 = vadd.f32 %v6372_v4, %v902_v31  ;;  %v1040_v48 = vadd.f32 %v6372_v4, %v1032_v29  ;;  %v5078_v17 = vld [vmem:[%s6367_s15 + $0x161] sm:$0xff]  ;;  %v5079_v29 = vld [vmem:[%s6367_s15 + $0x171] sm:$0xff] }
  0x40   : > { %v917_v42 = vmax.f32 %v909_v56, 0.0  ;;  %v1041_v60 = vadd.f32 %v6372_v4, %v1033_v59  ;;  %v1156_v34 = vmul.f32 %v5074_v26, %v6362_v3  ;;  %v1157_v2 = vmul.f32 %v5075_v41, %v6362_v3 }
  0x41   : > { %5654 = vmatmul.mubr.msk.bf16.vlgmr.msra.gmra.mxu1 %vm595_vm0, %v920_v57  ;;  %5664 = vmatmul.mubr.msk.bf16.vlgmr.msra.gmra.mxu0 %vm595_vm0, %v6641_v9  ;;  %v6663_v52 = vpack.c.bf16 %v1047_v6, %v1046_v54  ;;  %v918_v36 = vmax.f32 %v910_v50, 0.0  ;;  %v1048_v49 = vmax.f32 %v1040_v48, 0.0  ;;  %v1158_v41 = vmul.f32 %v5076_v33, %v6362_v3  ;;  %v5080_v50 = vld [vmem:[%s6367_s15 + $0x181] sm:$0xff] }
  0x42   : > { %5672 = vmatpush3.bf16.msra.mxu1 %v6523_v43  ;;  %5682 = vmatpush3.bf16.msra.mxu0 %v6539_v53  ;;  %v1049_v26 = vmax.f32 %v1041_v60, 0.0  ;;  %v1164_v28 = vadd.f32 %v6372_v4, %v1156_v34  ;;  %v1165_v31 = vadd.f32 %v6372_v4, %v1157_v2  ;;  %v1159_v56 = vmul.f32 %v5077_v61, %v6362_v3  ;;  %v5081_v60 = vld [vmem:[%s6367_s15 + $0x191] sm:$0xff] }
  0x43   : > { %5657 = vmatprep.mubr.msk.bf16.mxu1 %vm595_vm0, %v921_v27  ;;  %5667 = vmatprep.mubr.msk.bf16.mxu0 %vm595_vm0, %v6663_v52  ;;  %v922_v57 = vpack.c.bf16 %v918_v36, %v917_v42  ;;  %v1166_v59 = vadd.f32 %v6372_v4, %v1158_v41  ;;  %v1160_v27 = vmul.f32 %v5078_v17, %v6362_v3  ;;  %v7599_v63 = vmax.f32 %v6403_v25, 0.0  ;;  %v6100_v25 = vld [vmem:[%s7548_s2 + $0x18] sm:$0xff]  }
  0x44   : > { %v6675_v54 = vpack.c.bf16 %v1049_v26, %v1048_v49  ;;  %v1172_v43 = vmax.f32 %v1164_v28, 0.0  ;;  %v1173_v53 = vmax.f32 %v1165_v31, 0.0  ;;  %5691 = vmatprep.subr.bf16.mxu1 %v6648_v5  ;;  %5701 = vmatprep.subr.bf16.mxu0 %v6098_v39  ;;  %v1167_v48 = vadd.f32 %v6372_v4, %v1159_v56  ;;  %v5096_v49 = vld [vmem:[%s6367_s15 + $0x80] sm:$0xff] }
  0x45   : > { %v1174_v42 = vmax.f32 %v1166_v59, 0.0  ;;  %v1161_v33 = vmul.f32 %v5079_v29, %v6362_v3  ;;  %v1311_v34 = vpack.c.bf16 %v537_v13, %v536_v62  ;;  %v1168_v2 = vadd.f32 %v6372_v4, %v1160_v27 }
  0x46   : > { %v1180_v6 = vpack.c.bf16 %v1173_v53, %v1172_v43  ;;  %v1175_v61 = vmax.f32 %v1167_v48, 0.0  ;;  %v1162_v51 = vmul.f32 %v5080_v50, %v6362_v3  ;;  %v1163_v13 = vmul.f32 %v5081_v60, %v6362_v3  ;;  %v5111_v53 = vld [vmem:[%s6367_s15 + $0x110] sm:$0xff] }
  0x47   : > { %v1169_v36 = vadd.f32 %v6372_v4, %v1161_v33  ;;  %v1176_v0 = vmax.f32 %v1168_v2, 0.0  ;;  %v1312_v28 = vpack.c.bf16 %v539_v44, %v538_v15  ;;  %v1294_v29 = vmul.f32 %v5096_v49, %v6362_v3  ;;  %v5126_v15 = vld [vmem:[%s6367_s15 + $0x81] sm:$0xff]  ;;  %s6158_s15 = sshll.u32 %s6217_s22, 4  ;;  %s6159_s15 = int_to_ptr.vmem [resolvable:$false] %s6158_s15 }
  0x48   : > { %v1181_v17 = vpack.c.bf16 %v1175_v61, %v1174_v42  ;;  %v1170_v26 = vadd.f32 %v6372_v4, %v1162_v51  ;;  %v1171_v31 = vadd.f32 %v6372_v4, %v1163_v13  ;;  %v1313_v41 = vpack.c.bf16 %v541_v18, %v540_v55  ;;  %s6160_s27 = scalar_lea.vmem %s6159_s15, 2048  ;;  %p6161_p0 = scmp.lt.s32.totalorder %s7497_s25, %s6159_s15 }
  0x49   : > { %5658 = vmatmul.mubr.msk.bf16.gmra.mxu1 %vm595_vm0, %v922_v57  ;;  %5668 = vmatmul.mubr.msk.bf16.gmra.mxu0 %vm595_vm0, %v6675_v54  ;;  %v1177_v62 = vmax.f32 %v1169_v36, 0.0  ;;  %v1302_v43 = vadd.f32 %v6372_v4, %v1294_v29  ;;  %v1442_v22 = vpack.c.bf16 %v576_v35, %v575_v30  ;;  %v1425_v40 = vmul.f32 %v5111_v53, %v6362_v3  ;;  %p6162_p1 = scmp.lt.s32.totalorder %s6160_s27, %s6154_s19 }
  0x4a   : > { %5673 = vmatprep.mubr.msk.bf16.mxu1 %vm595_vm0, %v1180_v6  ;;  %5683 = vmatprep.mubr.msk.bf16.mxu0 %vm595_vm0, %v1311_v34  ;;  %v1178_v56 = vmax.f32 %v1170_v26, 0.0  ;;  %v1179_v59 = vmax.f32 %v1171_v31, 0.0  ;;  %v1555_v8 = vmul.f32 %v5126_v15, %v6362_v3  ;;  %v1572_v18 = vpack.c.bf16 %v782_v38, %v781_v12 }
  0x4b   : > { %v1182_v57 = vpack.c.bf16 %v1177_v62, %v1176_v0  ;;  %v1310_v7 = vmax.f32 %v1302_v43, 0.0  ;;  %v7598_v30 = vmax.f32 %v6578_v19, 0.0  ;;  %v7601_v16 = vmax.f32 %v6496_v1, 0.0  ;;  %v6101_v1 = vld [vmem:[%s7548_s2 + $0x10] sm:$0xff]   ;;  %p6163_p2 = por %p6162_p1, %p6161_p0 }
  0x4c   : > { %v1183_v44 = vpack.c.bf16 %v1179_v59, %v1178_v56  ;;  %v1563_v20 = vadd.f32 %v6372_v4, %v1555_v8  ;;  %v7602_v38 = vmax.f32 %v6528_v45, 0.0  ;;  %v7604_v6 = vmax.f32 %v6411_v32, 0.0  ;;  %v6102_v32 = vld [vmem:[%s7548_s2 + $0x8] sm:$0xff]   ;;  %v6103_v45 = vld [vmem:[%s7548_s2] sm:$0xff]  }
  0x4d   : > { %v1314_v55 = vpack.c.bf16 %v1310_v7, %v542_v58  ;;  %v7603_v58 = vmax.f32 %v6397_v23, 0.0  ;;  %v7605_v37 = vmax.f32 %v6531_v46, 0.0  ;;  %v6099_v23 = vld [vmem:[%s7549_s3] sm:$0xff]   ;;  %v6808_v46 = vld [vmem:[%s7548_s2 + $0x28] sm:$0xff]   ;;  %p6164_p3 = pnand %p6163_p2, %p6157_p13 }
  0x4e   : > { %v1571_v24 = vmax.f32 %v1563_v20, 0.0  ;;  %v1573_v11 = vpack.c.bf16 %v7602_v38, %v7601_v16 }
  0x4f   : > { %v1444_v27 = vpack.c.bf16 %v7604_v6, %v7603_v58 }
  0x50   : > { %v1575_v35 = vpack.c.bf16 %v1571_v24, %v7598_v30 }
  0x51   : > { %5674 = vmatmul.mubr.msk.bf16.vlgmr.msra.gmra.mxu1 %vm595_vm0, %v1181_v17  ;;  %5684 = vmatmul.mubr.msk.bf16.vlgmr.msra.gmra.mxu0 %vm595_vm0, %v1312_v28 }
  0x52   : > { %5692 = vmatpush3.bf16.msra.mxu1 %v6648_v5  ;;  %5702 = vmatpush3.bf16.msra.mxu0 %v6098_v39  ;;  %v1433_v5 = vadd.f32 %v6372_v4, %v1425_v40  ;;  %v7600_v4 = vmax.f32 %v6393_v21, 0.0  ;;  %v6216_v21 = vmov 0.0  }
  0x53   : > { %5677 = vmatprep.mubr.msk.bf16.mxu1 %vm595_vm0, %v1182_v57  ;;  %5687 = vmatprep.mubr.msk.bf16.mxu0 %vm595_vm0, %v1313_v41  ;;  %481 = vst.msk [vmem:[#allocation2 + $0x30] sm:$0xff] %vm473_vm1, %v6216_v21  ;;  %474 = vst.msk [vmem:[#allocation2] sm:$0xff] %vm473_vm1, %v6216_v21 }
  0x54   : > { %v1441_v39 = vmax.f32 %v1433_v5, 0.0  ;;  %v1443_v12 = vpack.c.bf16 %v7600_v4, %v7599_v63  ;;  %482 = vst.msk [vmem:[#allocation2 + $0x38] sm:$0x3] %vm475_vm2, %v6216_v21  ;;  %476 = vst.msk [vmem:[#allocation2 + $0x8] sm:$0x3] %vm475_vm2, %v6216_v21  ;;  %5711 = vmatprep.subr.bf16.mxu1 %v6099_v23  ;;  %5721 = vmatprep.subr.bf16.mxu0 %v6100_v25 }
  0x55   : > { %477 = vst.msk [vmem:[#allocation2 + $0x10] sm:$0xff] %vm473_vm1, %v6216_v21  ;;  %479 = vst.msk [vmem:[#allocation2 + $0x20] sm:$0xff] %vm473_vm1, %v6216_v21 }
  0x56   : > { %v1445_v3 = vpack.c.bf16 %v1441_v39, %v581_v47  ;;  %v7606_v47 = vmax.f32 %v6568_v14, 0.0  ;;  %478 = vst.msk [vmem:[#allocation2 + $0x18] sm:$0x3] %vm475_vm2, %v6216_v21  ;;  %480 = vst.msk [vmem:[#allocation2 + $0x28] sm:$0x3] %vm475_vm2, %v6216_v21  ;;  %v6814_v14 = vld [vmem:[%s7548_s2 + $0x38] sm:$0xff]  }
  0x57   : > { %483 = vst.msk [vmem:[#allocation2 + $0x40] sm:$0xff] %vm473_vm1, %v6216_v21  ;;  %485 = vst.msk [vmem:[#allocation2 + $0x50] sm:$0xff] %vm473_vm1, %v6216_v21 }
  0x58   : > { %v1574_v19 = vpack.c.bf16 %v7606_v47, %v7605_v37  ;;  %484 = vst.msk [vmem:[#allocation2 + $0x48] sm:$0x3] %vm475_vm2, %v6216_v21  ;;  %486 = vst.msk [vmem:[#allocation2 + $0x58] sm:$0x3] %vm475_vm2, %v6216_v21 }
  0x59   : > { %5678 = vmatmul.mubr.msk.bf16.gmra.mxu1 %vm595_vm0, %v1183_v44  ;;  %5688 = vmatmul.mubr.msk.bf16.gmra.mxu0 %vm595_vm0, %v1314_v55  ;;  %487 = vst.msk [vmem:[#allocation2 + $0x60] sm:$0xff] %vm473_vm1, %v6216_v21  ;;  %489 = vst.msk [vmem:[#allocation2 + $0x70] sm:$0xff] %vm473_vm1, %v6216_v21 }
  0x5a   : > { %5693 = vmatprep.mubr.msk.bf16.mxu1 %vm595_vm0, %v1442_v22  ;;  %5703 = vmatprep.mubr.msk.bf16.mxu0 %vm595_vm0, %v1572_v18  ;;  %488 = vst.msk [vmem:[#allocation2 + $0x68] sm:$0x3] %vm475_vm2, %v6216_v21  ;;  %490 = vst.msk [vmem:[#allocation2 + $0x78] sm:$0x3] %vm475_vm2, %v6216_v21 }
  0x5b   : > { %491 = vst.msk [vmem:[#allocation2 + $0x80] sm:$0xff] %vm473_vm1, %v6216_v21  ;;  %493 = vst.msk [vmem:[#allocation2 + $0x90] sm:$0xff] %vm473_vm1, %v6216_v21 }
  0x5c   : > { %492 = vst.msk [vmem:[#allocation2 + $0x88] sm:$0x3] %vm475_vm2, %v6216_v21  ;;  %494 = vst.msk [vmem:[#allocation2 + $0x98] sm:$0x3] %vm475_vm2, %v6216_v21 }
  0x61   : > { %5694 = vmatmul.mubr.msk.bf16.vlgmr.msra.gmra.mxu1 %vm595_vm0, %v1443_v12  ;;  %5704 = vmatmul.mubr.msk.bf16.vlgmr.msra.gmra.mxu0 %vm595_vm0, %v1573_v11 }
  0x62   : > { %5697 = vmatprep.mubr.msk.bf16.mxu1 %vm595_vm0, %v1444_v27  ;;  %5707 = vmatprep.mubr.msk.bf16.mxu0 %vm595_vm0, %v1574_v19 }
  0x63   : > { %5712 = vmatpush3.bf16.msra.mxu1 %v6099_v23  ;;  %5722 = vmatpush3.bf16.msra.mxu0 %v6100_v25 }
  0x64   : > { %5733 = vmatprep.subr.bf16.mxu1 %v6102_v32  ;;  %5723 = vmatprep.subr.bf16.mxu0 %v6101_v1 }
  0x67   : > { %5724 = vmatpush3.bf16.msra.mxu0 %v6101_v1 }
  0x68   : > { %5745 = vmatprep.subr.bf16.mxu0 %v6808_v46 }
  0x69   : > { %5698 = vmatmul.mubr.msk.bf16.gmra.mxu1 %vm595_vm0, %v1445_v3  ;;  %5708 = vmatmul.mubr.msk.bf16.gmra.mxu0 %vm595_vm0, %v1575_v35 }
  0x6a   : > { %5713 = vmatprep.mubr.msk.bf16.mxu1 %vm595_vm0, %v6624_v10 }
  0x71   : > { %5714 = vmatmul.mubr.msk.bf16.vlgmr.msra.gmra.mxu1 %vm595_vm0, %v6641_v9 }
  0x72   : > { %5717 = vmatprep.mubr.msk.bf16.mxu1 %vm595_vm0, %v6663_v52  ;;  %5734 = vmatpush3.bf16.msra.mxu1 %v6102_v32 }
  0x73   : > { %5735 = vmatprep.subr.bf16.mxu1 %v6103_v45 }
  0x76   : > { %5736 = vmatpush3.bf16.msra.mxu1 %v6103_v45 }
  0x77   : > { %5757 = vmatprep.subr.bf16.mxu1 %v6814_v14 }
  0x79   : > { %5718 = vmatmul.mubr.msk.bf16.gmra.mxu1 %vm595_vm0, %v6675_v54 }
  0xe8   : > { %v5625_v10 = vpop.f32.mrf.mxu0 }
  0xe9   : > { %v5629_v9 = vpop.f32.mrf.mxu1 }
  0xea   : > { %v642_v52 = vpop.f32.mrf.mxu0 }
  0xeb   : > { %v658_v54 = vpop.f32.mrf.mxu1 }
  0xec   : > { %v5626_v50 = vpop.f32.mrf.mxu0 }
  0xed   : > { %v5630_v48 = vpop.f32.mrf.mxu1 }
  0xee   : > { %v645_v42 = vpop.f32.mrf.mxu0 }
  0xef   : > { %v6817_v33 = vpop.f32.mrf.mxu1 }
  0xf1   : > { %v5635_v60 = vpop.f32.mrf.mxu1  ;;  %v5645_v34 = vpop.f32.mrf.mxu0 }
  0xf2   : > { %v734_v24 = vadd.f32 %v5635_v60, %v5625_v10 }
  0xf3   : > { %v725_v2 = vpop.f32.mrf.mxu1  ;;  %v847_v61 = vpop.f32.mrf.mxu0 }
  0xf4   : > { %v726_v35 = vadd.f32 %v725_v2, %v642_v52  ;;  %v880_v12 = vadd.f32 %v5645_v34, %v734_v24 }
  0xf5   : > { %v5636_v36 = vpop.f32.mrf.mxu1  ;;  %v5646_v51 = vpop.f32.mrf.mxu0 }
  0xf6   : > { %v737_v16 = vadd.f32 %v5636_v36, %v5626_v50  ;;  %v878_v58 = vadd.f32 %v847_v61, %v726_v35 }
  0xf7   : > { %v728_v49 = vpop.f32.mrf.mxu1  ;;  %v850_v0 = vpop.f32.mrf.mxu0 }
  0xf8   : > { %v729_v6 = vadd.f32 %v728_v49, %v645_v42  ;;  %v881_v19 = vadd.f32 %v5646_v51, %v737_v16 }
  0xf9   : > { %v5639_v62 = vpop.f32.mrf.mxu1  ;;  %v5649_v13 = vpop.f32.mrf.mxu0 }
  0xfa   : > { %v750_v23 = vadd.f32 %v5639_v62, %v5629_v9  ;;  %v879_v45 = vadd.f32 %v850_v0, %v729_v6 }
  0xfb   : > { %v741_v17 = vpop.f32.mrf.mxu1  ;;  %v863_v26 = vpop.f32.mrf.mxu0 }
  0xfc   : > { %v742_v25 = vadd.f32 %v741_v17, %v658_v54  ;;  %v884_v61 = vadd.f32 %v5649_v13, %v750_v23 }
  0xfd   : > { %v5640_v28 = vpop.f32.mrf.mxu1  ;;  %v5650_v31 = vpop.f32.mrf.mxu0 }
  0xfe   : > { %v753_v60 = vadd.f32 %v5640_v28, %v5630_v48  ;;  %v882_v42 = vadd.f32 %v863_v26, %v742_v25 }
  0xff   : > { %v744_v29 = vpop.f32.mrf.mxu1  ;;  %v866_v57 = vpop.f32.mrf.mxu0 }
 0x100   : > { %v745_v49 = vadd.f32 %v744_v29, %v6817_v33  ;;  %v885_v54 = vadd.f32 %v5650_v31, %v753_v60  ;;  %v6827_v31 = vld [vmem:[%s7552_s6] ss:$0 sm:$0xff] }
 0x101   : > { %v5655_v41 = vpop.f32.mrf.mxu1  ;;  %v5665_v43 = vpop.f32.mrf.mxu0 }
 0x102   : > { %v1011_v27 = vadd.f32 %v5655_v41, %v880_v12  ;;  %v883_v35 = vadd.f32 %v866_v57, %v745_v49 }
 0x103   : > { %v978_v53 = vpop.f32.mrf.mxu1  ;;  %v1109_v56 = vpop.f32.mrf.mxu0 }
 0x104   : > { %v1009_v21 = vadd.f32 %v978_v53, %v878_v58  ;;  %v1142_v10 = vadd.f32 %v5665_v43, %v1011_v27 }
 0x105   : > { %v5656_v59 = vpop.f32.mrf.mxu1  ;;  %v5666_v7 = vpop.f32.mrf.mxu0 }
 0x106   : > { %v1012_v52 = vadd.f32 %v5656_v59, %v881_v19  ;;  %v1140_v50 = vadd.f32 %v1109_v56, %v1009_v21 }
 0x107   : > { %v981_v15 = vpop.f32.mrf.mxu1  ;;  %v1112_v22 = vpop.f32.mrf.mxu0 }
 0x108   : > { %v1010_v36 = vadd.f32 %v981_v15, %v879_v45  ;;  %v1143_v53 = vadd.f32 %v5666_v7, %v1012_v52 }
 0x109   : > { %v5659_v40 = vpop.f32.mrf.mxu1  ;;  %v5669_v44 = vpop.f32.mrf.mxu0 }
 0x10a   : > { %v1015_v62 = vadd.f32 %v5659_v40, %v884_v61  ;;  %v1141_v59 = vadd.f32 %v1112_v22, %v1010_v36 }
 0x10b   : > { %v994_v55 = vpop.f32.mrf.mxu1  ;;  %v1125_v8 = vpop.f32.mrf.mxu0 }
 0x10c   : > { %v1013_v17 = vadd.f32 %v994_v55, %v882_v42  ;;  %v1146_v33 = vadd.f32 %v5669_v44, %v1015_v62  ;;  %v6833_v44 = vld [vmem:[%s7553_s7] ss:$0 sm:$0xff] }
 0x10d   : > { %v5660_v18 = vpop.f32.mrf.mxu1  ;;  %v6819_v5 = vpop.f32.mrf.mxu0 }
 0x10e   : > { %v1016_v56 = vadd.f32 %v5660_v18, %v885_v54  ;;  %v1144_v29 = vadd.f32 %v1125_v8, %v1013_v17 }
 0x10f   : > { %v997_v20 = vpop.f32.mrf.mxu1  ;;  %v6821_v39 = vpop.f32.mrf.mxu0 }
 0x110   : > { %v1014_v16 = vadd.f32 %v997_v20, %v883_v35  ;;  %v1147_v57 = vadd.f32 %v6819_v5, %v1016_v56 }
 0x111   : > { %v5675_v3 = vpop.f32.mrf.mxu1  ;;  %v5685_v30 = vpop.f32.mrf.mxu0 }
 0x112   : > { %v1272_v24 = vadd.f32 %v5675_v3, %v1142_v10 }
 0x113   : > { %v1239_v63 = vpop.f32.mrf.mxu1  ;;  %v1370_v4 = vpop.f32.mrf.mxu0 }
 0x114   : > { %v1270_v9 = vadd.f32 %v1239_v63, %v1140_v50  ;;  %v1403_v48 = vadd.f32 %v5685_v30, %v1272_v24 }
 0x115   : > { %v5676_v38 = vpop.f32.mrf.mxu1  ;;  %v5686_v11 = vpop.f32.mrf.mxu0 }
 0x116   : > { %v1273_v28 = vadd.f32 %v5676_v38, %v1143_v53  ;;  %v1401_v13 = vadd.f32 %v1370_v4, %v1270_v9 }
 0x117   : > { %v1242_v37 = vpop.f32.mrf.mxu1  ;;  %v1373_v47 = vpop.f32.mrf.mxu0 }
 0x118   : > { %v1271_v26 = vadd.f32 %v1242_v37, %v1141_v59  ;;  %v1404_v22 = vadd.f32 %v5686_v11, %v1273_v28  ;;  %v1145_v11 = vadd.f32 %v6821_v39, %v1014_v16  ;;  %v6853_v16 = vld [vmem:[#allocation2 + $0x1] sm:$0xff] }
 0x119   : > { %v5679_v32 = vpop.f32.mrf.mxu1  ;;  %v5689_v1 = vpop.f32.mrf.mxu0  ;;  %7607 = vst [vmem:[#allocation10_spill] sm:$0xff] %v6853_v16 }
 0x11a   : > { %v1276_v18 = vadd.f32 %v5679_v32, %v1146_v33  ;;  %v1402_v4 = vadd.f32 %v1373_v47, %v1271_v26 }
 0x11b   : > { %v1255_v2 = vpop.f32.mrf.mxu1  ;;  %v1386_v34 = vpop.f32.mrf.mxu0 }
 0x11c   : > { %v1274_v63 = vadd.f32 %v1255_v2, %v1144_v29  ;;  %v1407_v32 = vadd.f32 %v5689_v1, %v1276_v18 }
 0x11d   : > { %v5680_v41 = vpop.f32.mrf.mxu1  ;;  %v5690_v51 = vpop.f32.mrf.mxu0 }
 0x11e   : > { %v1277_v27 = vadd.f32 %v5680_v41, %v1147_v57  ;;  %v1405_v45 = vadd.f32 %v1386_v34, %v1274_v63 }
 0x11f   : > { %v1258_v0 = vpop.f32.mrf.mxu1  ;;  %v1389_v43 = vpop.f32.mrf.mxu0 }
 0x120   : > { %v1275_v10 = vadd.f32 %v1258_v0, %v1145_v11  ;;  %v1408_v36 = vadd.f32 %v5690_v51, %v1277_v27  ;;  %v6105_v27 = vld [vmem:[%s7548_s2 + $0x20] sm:$0xff]  }
 0x121   : > { %v5695_v15 = vpop.f32.mrf.mxu1  ;;  %v5705_v3 = vpop.f32.mrf.mxu0 }
 0x122   : > { %v1534_v12 = vadd.f32 %v5695_v15, %v1403_v48  ;;  %v1406_v53 = vadd.f32 %v1389_v43, %v1275_v10  ;;  %v6915_v10 = vld [vmem:[#allocation2 + $0x2] sm:$0xff] }
 0x123   : > { %v1501_v7 = vpop.f32.mrf.mxu1  ;;  %v1631_v40 = vpop.f32.mrf.mxu0  ;;  %7609 = vst [vmem:[#allocation12_spill] sm:$0xff] %v6915_v10 }
 0x124   : > { %v1664_v55 = vadd.f32 %v5705_v3, %v1534_v12  ;;  %v1532_v30 = vadd.f32 %v1501_v7, %v1401_v13  ;;  %v6855_v7 = vld [vmem:[#allocation2] sm:$0xff] }
 0x125   : > { %v5696_v8 = vpop.f32.mrf.mxu1  ;;  %v5706_v20 = vpop.f32.mrf.mxu0  ;;  %7608 = vst [vmem:[#allocation11_spill] sm:$0xff] %v6855_v7 }
 0x126   : > { %v1751_v38 = vmul.f32 %v6827_v31, %v1664_v55  ;;  %v1662_v58 = vadd.f32 %v1631_v40, %v1532_v30  ;;  %v1535_v6 = vadd.f32 %v5696_v8, %v1404_v22 }
 0x127   : > { %v1504_v37 = vpop.f32.mrf.mxu1  ;;  %v1634_v19 = vpop.f32.mrf.mxu0 }
 0x128   : > { %v1765_v5 = vadd.f32 %v6833_v44, %v1751_v38  ;;  %v1749_v21 = vmul.f32 %v6827_v31, %v1662_v58  ;;  %v1665_v23 = vadd.f32 %v5706_v20, %v1535_v6  ;;  %v1533_v25 = vadd.f32 %v1504_v37, %v1402_v4  ;;  %v6107_v37 = vld [vmem:[%s7548_s2 + $0x30] sm:$0xff]  }
 0x129   : > { %v5699_v52 = vpop.f32.mrf.mxu1  ;;  %v5709_v47 = vpop.f32.mrf.mxu0 }
 0x12a   : > { %v1773_v60 = vmax.f32 %v1765_v5, 0.0  ;;  %v1763_v2 = vadd.f32 %v6833_v44, %v1749_v21  ;;  %v1752_v50 = vmul.f32 %v6827_v31, %v1665_v23  ;;  %v1663_v39 = vadd.f32 %v1634_v19, %v1533_v25 }
 0x12b   : > { %v1538_v24 = vadd.f32 %v5699_v52, %v1407_v32  ;;  %v1517_v61 = vpop.f32.mrf.mxu1  ;;  %v1647_v42 = vpop.f32.mrf.mxu0 }
 0x12c   : > { %1782 = vst.msk [vmem:[#allocation2 + $0x31] sm:$0xff] %vm473_vm1, %v1773_v60  ;;  %v1771_v49 = vmax.f32 %v1763_v2, 0.0  ;;  %v1766_v41 = vadd.f32 %v6833_v44, %v1752_v50  ;;  %v1750_v1 = vmul.f32 %v6827_v31, %v1663_v39  ;;  %v1536_v34 = vadd.f32 %v1517_v61, %v1405_v45  ;;  %v6108_v45 = vld [vmem:[%s7548_s2 + $0x48] sm:$0xff]  }
 0x12d   : > { %v1668_v9 = vadd.f32 %v5709_v47, %v1538_v24  ;;  %v5700_v54 = vpop.f32.mrf.mxu1  ;;  %v5710_v62 = vpop.f32.mrf.mxu0 }
 0x12e   : > { %1780 = vst.msk [vmem:[#allocation2 + $0x11] sm:$0xff] %vm473_vm1, %v1771_v49  ;;  %v1774_v17 = vmax.f32 %v1766_v41, 0.0  ;;  %v1764_v51 = vadd.f32 %v6833_v44, %v1750_v1  ;;  %v1666_v0 = vadd.f32 %v1647_v42, %v1536_v34  ;;  %v1539_v59 = vadd.f32 %v5700_v54, %v1408_v36 }
 0x12f   : > { %v1755_v48 = vmul.f32 %v6827_v31, %v1668_v9  ;;  %v1520_v28 = vpop.f32.mrf.mxu1  ;;  %v1650_v13 = vpop.f32.mrf.mxu0 }
 0x130   : > { %1783 = vst.msk [vmem:[#allocation2 + $0x41] sm:$0xff] %vm473_vm1, %v1774_v17  ;;  %v1772_v35 = vmax.f32 %v1764_v51, 0.0  ;;  %v1753_v56 = vmul.f32 %v6827_v31, %v1666_v0  ;;  %v1669_v15 = vadd.f32 %v5710_v62, %v1539_v59  ;;  %v1537_v43 = vadd.f32 %v1520_v28, %v1406_v53  ;;  %v6109_v53 = vld [vmem:[%s7548_s2 + $0x40] sm:$0xff]   ;;  %v6111_v62 = vld [vmem:[%s7548_s2 + $0x50] sm:$0xff]   ;;  %v6112_v17 = vld [vmem:[%s7548_s2 + $0x68] sm:$0xff]  }
 0x131   : > { %v1769_v3 = vadd.f32 %v6833_v44, %v1755_v48 }
 0x132   : > { %1781 = vst.msk [vmem:[#allocation2 + $0x21] sm:$0xff] %vm473_vm1, %v1772_v35  ;;  %v1767_v26 = vadd.f32 %v6833_v44, %v1753_v56  ;;  %v1756_v12 = vmul.f32 %v6827_v31, %v1669_v15  ;;  %v1667_v33 = vadd.f32 %v1650_v13, %v1537_v43  ;;  %v6114_v35 = vld [vmem:[%s7548_s2 + $0x78] sm:$0xff]   ;;  %v6113_v13 = vld [vmem:[%s7548_s2 + $0x60] sm:$0xff]  }
 0x133   : > { %v1777_v29 = vmax.f32 %v1769_v3, 0.0  ;;  %v1791_v6 = vld [vmem:[#allocation2 + $0x30] sm:$0xff] }
 0x134   : > { %v1775_v40 = vmax.f32 %v1767_v26, 0.0  ;;  %v1770_v22 = vadd.f32 %v6833_v44, %v1756_v12  ;;  %v1754_v55 = vmul.f32 %v6827_v31, %v1667_v33  ;;  %v6870_v31 = vld [vmem:[#allocation2 + $0x31] sm:$0xff] }
 0x135   : > { %1786 = vst.msk [vmem:[#allocation2 + $0x71] sm:$0xff] %vm473_vm1, %v1777_v29  ;;  %v6860_v30 = vld [vmem:[#allocation2 + $0x11] sm:$0xff]  ;;  %v6116_v29 = vld [vmem:[%s7548_s2 + $0x88] sm:$0xff]  }
 0x136   : > { %v1789_v57 = vld [vmem:[#allocation2 + $0x10] sm:$0xff]  ;;  %1784 = vst.msk [vmem:[#allocation2 + $0x51] sm:$0xff] %vm473_vm1, %v1775_v40  ;;  %v1778_v18 = vmax.f32 %v1770_v22, 0.0  ;;  %v1768_v63 = vadd.f32 %v6833_v44, %v1754_v55  ;;  %v1812_v8 = vpack.c.bf16 %v6860_v30, %v6853_v16 }
 0x137   : > { %v1796_v20 = vpack.c.bf16 %v1789_v57, %v6855_v7  ;;  %v6891_v19 = vld [vmem:[#allocation2 + $0x41] sm:$0xff]  ;;  %v2000_v52 = vld [vmem:[#allocation2 + $0x12] sm:$0xff] }
 0x138   : > { %1787 = vst.msk [vmem:[#allocation2 + $0x81] sm:$0xff] %vm473_vm1, %v1778_v18  ;;  %v1776_v4 = vmax.f32 %v1768_v63, 0.0  ;;  %5725 = vmatprep.mubr.msk.bf16.mxu0 %vm473_vm1, %v1812_v8  ;;  %v1792_v21 = vld [vmem:[#allocation2 + $0x40] sm:$0xff]  ;;  %v2007_v36 = vpack.c.bf16 %v2000_v52, %v6915_v10  ;;  %v2002_v49 = vld [vmem:[#allocation2 + $0x32] sm:$0xff]  ;;  %v2236_v43 = vpack.c.bf16 %v6891_v19, %v6870_v31 }
 0x139   : > { %5737 = vmatprep.mubr.msk.bf16.mxu1 %vm473_vm1, %v1796_v20  ;;  %v6872_v38 = vld [vmem:[#allocation2 + $0x21] sm:$0xff]  ;;  %v2122_v1 = vpack.c.bf16 %v1792_v21, %v1791_v6  ;;  %v6115_v33 = vld [vmem:[%s7548_s2 + $0x70] sm:$0xff]  }
 0x13a   : > { %v1790_v58 = vld [vmem:[#allocation2 + $0x20] sm:$0xff]  ;;  %1785 = vst.msk [vmem:[#allocation2 + $0x61] sm:$0xff] %vm473_vm1, %v1776_v4  ;;  %v6877_v44 = vpack.c.bf16 %v6870_v31, %v6872_v38  ;;  %v2235_v56 = vpack.c.bf16 %v6872_v38, %v6860_v30  ;;  %v6991_v18 = vld [vmem:[#allocation2 + $0x90] sm:$0xff]  ;;  %v6118_v38 = vld [vmem:[%s7554_s8 + $0x18] sm:$0xff]  }
 0x13b   : > { %v6879_v11 = vpack.c.bf16 %v1791_v6, %v1790_v58  ;;  %v2121_v24 = vpack.c.bf16 %v1790_v58, %v1789_v57  ;;  %v2001_v61 = vld [vmem:[#allocation2 + $0x22] sm:$0xff]  ;;  %7610 = vst [vmem:[#allocation13_spill] sm:$0xff] %v6991_v18  ;;  %v6993_v63 = vld [vmem:[#allocation2 + $0x91] sm:$0xff] }
 0x13c   : > { %5726 = vmatmul.mubr.msk.bf16.vlgmr.msra.gmra.mxu0 %vm473_vm1, %v6877_v44  ;;  %v1795_v2 = vld [vmem:[#allocation2 + $0x70] sm:$0xff]  ;;  %v6929_v41 = vpack.c.bf16 %v2002_v49, %v2001_v61  ;;  %v2003_v34 = vld [vmem:[#allocation2 + $0x42] sm:$0xff]  ;;  %v2349_v15 = vpack.c.bf16 %v2001_v61, %v2000_v52  ;;  %7611 = vst [vmem:[#allocation14_spill] sm:$0xff] %v6993_v63 }
 0x13d   : > { %5738 = vmatmul.mubr.msk.bf16.vlgmr.msra.gmra.mxu1 %vm473_vm1, %v6879_v11  ;;  %5746 = vmatpush3.bf16.msra.mxu0 %v6808_v46  ;;  %v6894_v5 = vld [vmem:[#allocation2 + $0x51] sm:$0xff]  ;;  %v2350_v3 = vpack.c.bf16 %v2003_v34, %v2002_v49  ;;  %v6117_v57 = vld [vmem:[%s7548_s2 + $0x80] sm:$0xff]   ;;  %v6120_v58 = vld [vmem:[%s7554_s8 + $0x8] sm:$0xff]  }
 0x13e   : > { %v1793_v23 = vld [vmem:[#allocation2 + $0x50] sm:$0xff]  ;;  %5758 = vmatpush3.bf16.msra.mxu1 %v6814_v14  ;;  %v6899_v25 = vpack.c.bf16 %v6894_v5, %v6891_v19  ;;  %5747 = vmatprep.subr.bf16.mxu0 %v6105_v27  ;;  %v6110_v46 = vld [vmem:[%s7548_s2 + $0x58] sm:$0xff]  }
 0x13f   : > { %v6901_v32 = vpack.c.bf16 %v1793_v23, %v1792_v21  ;;  %5759 = vmatprep.subr.bf16.mxu1 %v6107_v37  ;;  %v6913_v14 = vld [vmem:[#allocation2 + $0x71] sm:$0xff]  ;;  %v2120_v0 = vld [vmem:[#allocation2 + $0x80] sm:$0xff] }
 0x140   : > { %5729 = vmatprep.mubr.msk.bf16.mxu0 %vm473_vm1, %v6899_v25  ;;  %v2004_v42 = vld [vmem:[#allocation2 + $0x52] sm:$0xff]  ;;  %v2124_v28 = vpack.c.bf16 %v2120_v0, %v1795_v2  ;;  %v2234_v40 = vld [vmem:[#allocation2 + $0x81] sm:$0xff]  ;;  %v2467_v8 = vpack.c.bf16 %v6991_v18, %v2120_v0 }
 0x141   : > { %5741 = vmatprep.mubr.msk.bf16.mxu1 %vm473_vm1, %v6901_v32  ;;  %v1810_v47 = vld [vmem:[#allocation2 + $0x61] sm:$0xff]  ;;  %5748 = vmatpush3.bf16.msra.mxu0 %v6105_v27  ;;  %v6934_v9 = vpack.c.bf16 %v2004_v42, %v2003_v34  ;;  %v2006_v59 = vld [vmem:[#allocation2 + $0x72] sm:$0xff]  ;;  %v2238_v55 = vpack.c.bf16 %v2234_v40, %v6913_v14  ;;  %v2581_v20 = vpack.c.bf16 %v6993_v63, %v2234_v40  ;;  %v7026_v27 = vpop.f32.mrf.mxu1 }
 0x142   : > { %v1794_v60 = vld [vmem:[#allocation2 + $0x60] sm:$0xff]  ;;  %5760 = vmatpush3.bf16.msra.mxu1 %v6107_v37  ;;  %v6918_v50 = vpack.c.bf16 %v6913_v14, %v1810_v47  ;;  %5769 = vmatprep.subr.bf16.mxu0 %v6108_v45  ;;  %v2237_v26 = vpack.c.bf16 %v1810_v47, %v6894_v5  ;;  %v7004_v4 = vld [vmem:[#allocation2 + $0x92] sm:$0xff]  ;;  %7614 = vst [vmem:[#allocation17_spill] sm:$0xff] %v7026_v27 }
 0x143   : > { %v6920_v39 = vpack.c.bf16 %v1795_v2, %v1794_v60  ;;  %5781 = vmatprep.subr.bf16.mxu1 %v6110_v46  ;;  %v2123_v54 = vpack.c.bf16 %v1794_v60, %v1793_v23  ;;  %v2005_v51 = vld [vmem:[#allocation2 + $0x62] sm:$0xff]  ;;  %7612 = vst [vmem:[#allocation15_spill] sm:$0xff] %v7004_v4  ;;  %v6119_v6 = vld [vmem:[%s7554_s8 + $0x10] sm:$0xff]   ;;  %v7031_v37 = vld [vmem:[%s7554_s8 + $0x38] sm:$0xff]   ;;  %v7033_v19 = vpop.f32.mrf.mxu1 }
 0x144   : > { %5730 = vmatmul.mubr.msk.bf16.gmra.mxu0 %vm473_vm1, %v6918_v50  ;;  %v2010_v48 = vpack.c.bf16 %v2006_v59, %v2005_v51  ;;  %v2351_v12 = vpack.c.bf16 %v2005_v51, %v2004_v42  ;;  %v2348_v22 = vld [vmem:[#allocation2 + $0x82] sm:$0xff]  ;;  %7615 = vst [vmem:[#allocation18_spill] sm:$0xff] %v7031_v37  ;;  %7616 = vst [vmem:[#allocation19_spill] sm:$0xff] %v7033_v19 }
 0x145   : > { %5742 = vmatmul.mubr.msk.bf16.gmra.mxu1 %vm473_vm1, %v6920_v39  ;;  %5749 = vmatprep.mubr.msk.bf16.mxu0 %vm473_vm1, %v2007_v36  ;;  %v2352_v30 = vpack.c.bf16 %v2348_v22, %v2006_v59  ;;  %v2695_v31 = vpack.c.bf16 %v7004_v4, %v2348_v22  ;;  %v7036_v5 = vpop.f32.mrf.mxu1 }
 0x146   : > { %5761 = vmatprep.mubr.msk.bf16.mxu1 %vm473_vm1, %v2121_v24  ;;  %7617 = vst [vmem:[#allocation20_spill] sm:$0xff] %v7036_v5 }
 0x147   : > { %v7038_v21 = vpop.f32.mrf.mxu1 }
 0x148   : > { %7618 = vst [vmem:[#allocation21_spill] sm:$0xff] %v7038_v21 }
 0x149   : > { %v7040_v23 = vpop.f32.mrf.mxu1 }
 0x14a   : > { %7619 = vst [vmem:[#allocation22_spill] sm:$0xff] %v7040_v23 }
 0x14c   : > { %5750 = vmatmul.mubr.msk.bf16.vlgmr.msra.gmra.mxu0 %vm473_vm1, %v6929_v41 }
 0x14d   : > { %5762 = vmatmul.mubr.msk.bf16.vlgmr.msra.gmra.mxu1 %vm473_vm1, %v2122_v1  ;;  %5770 = vmatpush3.bf16.msra.mxu0 %v6108_v45 }
 0x14e   : > { %5753 = vmatprep.mubr.msk.bf16.mxu0 %vm473_vm1, %v6934_v9  ;;  %5765 = vmatprep.mubr.msk.bf16.mxu1 %vm473_vm1, %v2123_v54 }
 0x14f   : > { %5771 = vmatprep.subr.bf16.mxu0 %v6109_v53  ;;  %5782 = vmatpush3.bf16.msra.mxu1 %v6110_v46 }
 0x150   : > { %5783 = vmatprep.subr.bf16.mxu1 %v6111_v62 }
 0x151   : > { %5772 = vmatpush3.bf16.msra.mxu0 %v6109_v53 }
 0x152   : > { %5793 = vmatprep.subr.bf16.mxu0 %v6112_v17 }
 0x153   : > { %5784 = vmatpush3.bf16.msra.mxu1 %v6111_v62 }
 0x154   : > { %5754 = vmatmul.mubr.msk.bf16.gmra.mxu0 %vm473_vm1, %v2010_v48  ;;  %5805 = vmatprep.subr.bf16.mxu1 %v6114_v35 }
 0x155   : > { %5766 = vmatmul.mubr.msk.bf16.gmra.mxu1 %vm473_vm1, %v2124_v28  ;;  %5773 = vmatprep.mubr.msk.bf16.mxu0 %vm473_vm1, %v2235_v56 }
 0x156   : > { %5785 = vmatprep.mubr.msk.bf16.mxu1 %vm473_vm1, %v2349_v15 }
 0x15c   : > { %5774 = vmatmul.mubr.msk.bf16.vlgmr.msra.gmra.mxu0 %vm473_vm1, %v2236_v43 }
 0x15d   : > { %5786 = vmatmul.mubr.msk.bf16.vlgmr.msra.gmra.mxu1 %vm473_vm1, %v2350_v3  ;;  %5794 = vmatpush3.bf16.msra.mxu0 %v6112_v17 }
 0x15e   : > { %5777 = vmatprep.mubr.msk.bf16.mxu0 %vm473_vm1, %v2237_v26  ;;  %5789 = vmatprep.mubr.msk.bf16.mxu1 %vm473_vm1, %v2351_v12 }
 0x15f   : > { %5795 = vmatprep.subr.bf16.mxu0 %v6113_v13  ;;  %5806 = vmatpush3.bf16.msra.mxu1 %v6114_v35 }
 0x160   : > { %5807 = vmatprep.subr.bf16.mxu1 %v6115_v33 }
 0x161   : > { %5796 = vmatpush3.bf16.msra.mxu0 %v6113_v13 }
 0x162   : > { %5817 = vmatprep.subr.bf16.mxu0 %v6116_v29 }
 0x163   : > { %5808 = vmatpush3.bf16.msra.mxu1 %v6115_v33 }
 0x164   : > { %5778 = vmatmul.mubr.msk.bf16.gmra.mxu0 %vm473_vm1, %v2238_v55  ;;  %5829 = vmatprep.subr.bf16.mxu1 %v6118_v38 }
 0x165   : > { %5790 = vmatmul.mubr.msk.bf16.gmra.mxu1 %vm473_vm1, %v2352_v30  ;;  %5797 = vmatprep.mubr.msk.bf16.mxu0 %vm473_vm1, %v6879_v11  ;;  %v7023_v11 = vld [vmem:[%s7554_s8 + $0x28] sm:$0xff]  }
 0x166   : > { %5809 = vmatprep.mubr.msk.bf16.mxu1 %vm473_vm1, %v6877_v44  ;;  %v6121_v44 = vld [vmem:[%s7554_s8] sm:$0xff]   ;;  %7613 = vst [vmem:[#allocation16_spill] sm:$0xff] %v7023_v11 }
 0x16c   : > { %5798 = vmatmul.mubr.msk.bf16.vlgmr.msra.gmra.mxu0 %vm473_vm1, %v6901_v32 }
 0x16d   : > { %5810 = vmatmul.mubr.msk.bf16.vlgmr.msra.gmra.mxu1 %vm473_vm1, %v6899_v25  ;;  %5818 = vmatpush3.bf16.msra.mxu0 %v6116_v29  ;;  %v7042_v25 = vpop.f32.mrf.mxu1 }
 0x16e   : > { %5801 = vmatprep.mubr.msk.bf16.mxu0 %vm473_vm1, %v6920_v39  ;;  %5813 = vmatprep.mubr.msk.bf16.mxu1 %vm473_vm1, %v6918_v50  ;;  %7620 = vst [vmem:[#allocation23_spill] sm:$0xff] %v7042_v25 }
 0x16f   : > { %5819 = vmatprep.subr.bf16.mxu0 %v6117_v57  ;;  %5830 = vmatpush3.bf16.msra.mxu1 %v6118_v38  ;;  %v7044_v32 = vpop.f32.mrf.mxu1 }
 0x170   : > { %5831 = vmatprep.subr.bf16.mxu1 %v6119_v6  ;;  %7621 = vst [vmem:[#allocation24_spill] sm:$0xff] %v7044_v32 }
 0x171   : > { %5820 = vmatpush3.bf16.msra.mxu0 %v6117_v57  ;;  %v7046_v45 = vpop.f32.mrf.mxu1 }
 0x172   : > { %5841 = vmatprep.subr.bf16.mxu0 %v6120_v58  ;;  %7622 = vst [vmem:[#allocation25_spill] sm:$0xff] %v7046_v45 }
 0x173   : > { %5832 = vmatpush3.bf16.msra.mxu1 %v6119_v6 }
 0x174   : > { %5802 = vmatmul.mubr.msk.bf16.gmra.mxu0 %vm473_vm1, %v2467_v8  ;;  %5853 = vmatprep.subr.bf16.mxu1 %v7023_v11 }
 0x175   : > { %5814 = vmatmul.mubr.msk.bf16.gmra.mxu1 %vm473_vm1, %v2581_v20  ;;  %5821 = vmatprep.mubr.msk.bf16.mxu0 %vm473_vm1, %v6929_v41 }
 0x17c   : > { %5822 = vmatmul.mubr.msk.bf16.vlgmr.msra.gmra.mxu0 %vm473_vm1, %v6934_v9 }
 0x17d   : > { %5825 = vmatprep.mubr.msk.bf16.mxu0 %vm473_vm1, %v2010_v48  ;;  %5842 = vmatpush3.bf16.msra.mxu0 %v6120_v58 }
 0x17e   : > { %5843 = vmatprep.subr.bf16.mxu0 %v6121_v44 }
 0x181   : > { %5844 = vmatpush3.bf16.msra.mxu0 %v6121_v44 }
 0x182   : > { %5865 = vmatprep.subr.bf16.mxu0 %v7031_v37 }
 0x184   : > { %5826 = vmatmul.mubr.msk.bf16.gmra.mxu0 %vm473_vm1, %v2695_v31 }
 0x1fc   : > { %v5727_v46 = vpop.f32.mrf.mxu0 }
 0x1fd   : > { %v5739_v14 = vpop.f32.mrf.mxu1 }
 0x1fe   : > { %v1879_v52 = vpop.f32.mrf.mxu0  ;;  %v1977_v6 = vadd.f32 %v5739_v14, %v5727_v46 }
 0x1ff   : > { %v1968_v47 = vpop.f32.mrf.mxu1 }
 0x200   : > { %v5728_v60 = vpop.f32.mrf.mxu0  ;;  %v1969_v63 = vadd.f32 %v1968_v47, %v1879_v52 }
 0x201   : > { %v5740_v2 = vpop.f32.mrf.mxu1 }
 0x202   : > { %v1882_v50 = vpop.f32.mrf.mxu0  ;;  %v1980_v11 = vadd.f32 %v5740_v2, %v5728_v60 }
 0x203   : > { %v1971_v39 = vpop.f32.mrf.mxu1 }
 0x204   : > { %v5731_v36 = vpop.f32.mrf.mxu0  ;;  %v1972_v45 = vadd.f32 %v1971_v39, %v1882_v50 }
 0x205   : > { %v5743_v24 = vpop.f32.mrf.mxu1 }
 0x206   : > { %v1895_v61 = vpop.f32.mrf.mxu0 }
 0x207   : > { %v1984_v42 = vpop.f32.mrf.mxu1 }
 0x208   : > { %v5732_v49 = vpop.f32.mrf.mxu0  ;;  %v1985_v46 = vadd.f32 %v1984_v42, %v1895_v61 }
 0x209   : > { %v5744_v41 = vpop.f32.mrf.mxu1 }
 0x20a   : > { %v7048_v1 = vpop.f32.mrf.mxu0  ;;  %v1996_v47 = vadd.f32 %v5744_v41, %v5732_v49 }
 0x20b   : > { %v1987_v34 = vpop.f32.mrf.mxu1 }
 0x20c   : > { %v5751_v53 = vpop.f32.mrf.mxu0 }
 0x20d   : > { %v5763_v9 = vpop.f32.mrf.mxu1  ;;  %v2107_v18 = vadd.f32 %v5751_v53, %v1977_v6 }
 0x20e   : > { %v2074_v54 = vpop.f32.mrf.mxu0 }
 0x20f   : > { %v2188_v62 = vpop.f32.mrf.mxu1  ;;  %v2105_v7 = vadd.f32 %v2074_v54, %v1969_v63  ;;  %v2221_v32 = vadd.f32 %v5763_v9, %v2107_v18  ;;  %v1988_v18 = vadd.f32 %v1987_v34, %v7048_v1 }
 0x210   : > { %v5752_v17 = vpop.f32.mrf.mxu0 }
 0x211   : > { %v5764_v51 = vpop.f32.mrf.mxu1  ;;  %v2108_v25 = vadd.f32 %v5752_v17, %v1980_v11  ;;  %v2219_v5 = vadd.f32 %v2188_v62, %v2105_v7 }
 0x212   : > { %v2077_v0 = vpop.f32.mrf.mxu0 }
 0x213   : > { %v2191_v59 = vpop.f32.mrf.mxu1  ;;  %v2106_v19 = vadd.f32 %v2077_v0, %v1972_v45 }
 0x214   : > { %v5755_v48 = vpop.f32.mrf.mxu0 }
 0x215   : > { %v5767_v28 = vpop.f32.mrf.mxu1  ;;  %v2220_v63 = vadd.f32 %v2191_v59, %v2106_v19 }
 0x216   : > { %v2090_v35 = vpop.f32.mrf.mxu0 }
 0x217   : > { %v2204_v56 = vpop.f32.mrf.mxu1  ;;  %v2109_v6 = vadd.f32 %v2090_v35, %v1985_v46 }
 0x218   : > { %v5756_v15 = vpop.f32.mrf.mxu0 }
 0x219   : > { %v5768_v43 = vpop.f32.mrf.mxu1  ;;  %v2112_v11 = vadd.f32 %v5756_v15, %v1996_v47  ;;  %v2223_v61 = vadd.f32 %v2204_v56, %v2109_v6 }
 0x21a   : > { %v2093_v3 = vpop.f32.mrf.mxu0 }
 0x21b   : > { %v7050_v13 = vpop.f32.mrf.mxu1  ;;  %v2226_v41 = vadd.f32 %v5768_v43, %v2112_v11  ;;  %v7627_v43 = vld [vmem:[#allocation17_spill] sm:$0xff] }
 0x21c   : > { %v5775_v26 = vpop.f32.mrf.mxu0 }
 0x21d   : > { %v5787_v12 = vpop.f32.mrf.mxu1  ;;  %v2335_v27 = vadd.f32 %v5775_v26, %v2221_v32 }
 0x21e   : > { %v2302_v33 = vpop.f32.mrf.mxu0 }
 0x21f   : > { %v2416_v29 = vpop.f32.mrf.mxu1  ;;  %v2449_v2 = vadd.f32 %v5787_v12, %v2335_v27 }
 0x220   : > { %v5776_v40 = vpop.f32.mrf.mxu0 }
 0x221   : > { %v5788_v22 = vpop.f32.mrf.mxu1 }
 0x222   : > { %v2305_v55 = vpop.f32.mrf.mxu0 }
 0x223   : > { %v2419_v30 = vpop.f32.mrf.mxu1  ;;  %v2334_v45 = vadd.f32 %v2305_v55, %v2220_v63 }
 0x224   : > { %v5779_v57 = vpop.f32.mrf.mxu0 }
 0x225   : > { %v7052_v8 = vpop.f32.mrf.mxu1  ;;  %v2448_v27 = vadd.f32 %v2419_v30, %v2334_v45  ;;  %v7630_v30 = vld [vmem:[#allocation19_spill] sm:$0xff] }
 0x226   : > { %7623 = vst [vmem:[#allocation26_spill] sm:$0xff] %v7052_v8  ;;  %v2318_v20 = vpop.f32.mrf.mxu0  ;;  %v2222_v8 = vadd.f32 %v5764_v51, %v2108_v25  ;;  %v2110_v25 = vadd.f32 %v2093_v3, %v1988_v18 }
 0x227   : > { %v2432_v31 = vpop.f32.mrf.mxu1  ;;  %v2337_v54 = vadd.f32 %v2318_v20, %v2223_v61 }
 0x228   : > { %v5780_v38 = vpop.f32.mrf.mxu0  ;;  %v2336_v50 = vadd.f32 %v5776_v40, %v2222_v8  ;;  %v2224_v34 = vadd.f32 %v7050_v13, %v2110_v25 }
 0x229   : > { %v7054_v58 = vpop.f32.mrf.mxu1  ;;  %v2451_v35 = vadd.f32 %v2432_v31, %v2337_v54 }
 0x22a   : > { %7624 = vst [vmem:[#allocation27_spill] sm:$0xff] %v7054_v58  ;;  %v2321_v44 = vpop.f32.mrf.mxu0  ;;  %v1993_v58 = vadd.f32 %v5743_v24, %v5731_v36  ;;  %v2450_v42 = vadd.f32 %v5788_v22, %v2336_v50 }
 0x22b   : > { %v7056_v4 = vpop.f32.mrf.mxu1  ;;  %v2338_v56 = vadd.f32 %v2321_v44, %v2224_v34 }
 0x22c   : > { %7625 = vst [vmem:[#allocation28_spill] sm:$0xff] %v7056_v4  ;;  %v5799_v10 = vpop.f32.mrf.mxu0  ;;  %v2333_v4 = vadd.f32 %v2302_v33, %v2219_v5  ;;  %v2111_v53 = vadd.f32 %v5755_v48, %v1993_v58 }
 0x22d   : > { %v5811_v37 = vpop.f32.mrf.mxu1  ;;  %v2564_v32 = vadd.f32 %v5799_v10, %v2449_v2  ;;  %v7626_v48 = vld [vmem:[#allocation26_spill] sm:$0xff] }
 0x22e   : > { %v2531_v16 = vpop.f32.mrf.mxu0  ;;  %v2447_v7 = vadd.f32 %v2416_v29, %v2333_v4  ;;  %v2225_v24 = vadd.f32 %v5767_v28, %v2111_v53  ;;  %v2340_v4 = vadd.f32 %v5780_v38, %v2226_v41  ;;  %v5228_v29 = vld [vmem:[%s7557_s11] ss:$0 sm:$0xff] }
 0x22f   : > { %v2645_v23 = vpop.f32.mrf.mxu1  ;;  %v2678_v62 = vadd.f32 %v5811_v37, %v2564_v32  ;;  %v7637_v41 = vld [vmem:[#allocation22_spill] sm:$0xff] }
 0x230   : > { %v5800_v21 = vpop.f32.mrf.mxu0  ;;  %v2562_v49 = vadd.f32 %v2531_v16, %v2447_v7  ;;  %v2339_v9 = vadd.f32 %v5779_v57, %v2225_v24  ;;  %v7064_v16 = vld [vmem:[%s7556_s10] ss:$0 sm:$0xff] }
 0x231   : > { %v5812_v52 = vpop.f32.mrf.mxu1  ;;  %v2565_v17 = vadd.f32 %v5800_v21, %v2450_v42  ;;  %v7629_v26 = vld [vmem:[#allocation27_spill] sm:$0xff] }
 0x232   : > { %v2534_v14 = vpop.f32.mrf.mxu0  ;;  %v2676_v10 = vadd.f32 %v2645_v23, %v2562_v49  ;;  %v2453_v28 = vadd.f32 %v7626_v48, %v2339_v9  ;;  %v2454_v23 = vadd.f32 %v7629_v26, %v2340_v4 }
 0x233   : > { %v2648_v36 = vpop.f32.mrf.mxu1  ;;  %v2563_v0 = vadd.f32 %v2534_v14, %v2448_v27  ;;  %v2679_v37 = vadd.f32 %v5812_v52, %v2565_v17  ;;  %v7632_v20 = vld [vmem:[#allocation28_spill] sm:$0xff] }
 0x234   : > { %v5803_v60 = vpop.f32.mrf.mxu0  ;;  %v2452_v31 = vadd.f32 %v7632_v20, %v2338_v56  ;;  %v7633_v52 = vld [vmem:[#allocation20_spill] sm:$0xff] }
 0x235   : > { %v5815_v1 = vpop.f32.mrf.mxu1  ;;  %v2568_v12 = vadd.f32 %v5803_v60, %v2453_v28  ;;  %v2677_v22 = vadd.f32 %v2648_v36, %v2563_v0  ;;  %v7641_v0 = vld [vmem:[#allocation24_spill] sm:$0xff] }
 0x236   : > { %v2547_v39 = vpop.f32.mrf.mxu0 }
 0x237   : > { %v2661_v21 = vpop.f32.mrf.mxu1  ;;  %v2566_v33 = vadd.f32 %v2547_v39, %v2451_v35  ;;  %v2682_v6 = vadd.f32 %v5815_v1, %v2568_v12  ;;  %v7635_v39 = vld [vmem:[#allocation21_spill] sm:$0xff] }
 0x238   : > { %v5804_v5 = vpop.f32.mrf.mxu0 }
 0x239   : > { %v2569_v38 = vadd.f32 %v5804_v5, %v2454_v23  ;;  %v5816_v44 = vpop.f32.mrf.mxu1  ;;  %v2680_v60 = vadd.f32 %v2661_v21, %v2566_v33 }
 0x23a   : > { %v2550_v19 = vpop.f32.mrf.mxu0 }
 0x23b   : > { %v2567_v63 = vadd.f32 %v2550_v19, %v2452_v31  ;;  %v2683_v45 = vadd.f32 %v5816_v44, %v2569_v38  ;;  %v2664_v24 = vpop.f32.mrf.mxu1 }
 0x23c   : > { %v5823_v51 = vpop.f32.mrf.mxu0 }
 0x23d   : > { %v2792_v59 = vadd.f32 %v5823_v51, %v2678_v62  ;;  %v2681_v49 = vadd.f32 %v2664_v24, %v2567_v63  ;;  %v7639_v62 = vld [vmem:[#allocation23_spill] sm:$0xff] }
 0x23e   : > { %v2759_v15 = vpop.f32.mrf.mxu0 }
 0x23f   : > { %v7067_v3 = vadd.f32 %v7627_v43, %v2792_v59  ;;  %v2790_v13 = vadd.f32 %v2759_v15, %v2676_v10  ;;  %v7643_v15 = vld [vmem:[#allocation25_spill] sm:$0xff] }
 0x240   : > { %v5824_v40 = vpop.f32.mrf.mxu0 }
 0x241   : > { %7628 = vst [vmem:[#allocation26_spill] sm:$0xff] %v7067_v3  ;;  %v2818_v55 = vmul.f32 %v7064_v16, %v7067_v3  ;;  %v7076_v57 = vadd.f32 %v2790_v13, %v7630_v30  ;;  %v2793_v8 = vadd.f32 %v5824_v40, %v2679_v37  ;;  %v7646_v30 = vld [vmem:[#allocation11_spill] sm:$0xff] }
 0x242   : > { %v2762_v58 = vpop.f32.mrf.mxu0 }
 0x243   : > { %7631 = vst [vmem:[#allocation17_spill] sm:$0xff] %v7076_v57  ;;  %v2832_v46 = vadd.f32 %v5228_v29, %v2818_v55  ;;  %v2816_v14 = vmul.f32 %v7064_v16, %v7076_v57  ;;  %v7082_v47 = vadd.f32 %v7633_v52, %v2793_v8  ;;  %v2791_v53 = vadd.f32 %v2762_v58, %v2677_v22  ;;  %v7645_v22 = vld [vmem:[#allocation10_spill] sm:$0xff] }
 0x244   : > { %v5827_v2 = vpop.f32.mrf.mxu0 }
 0x245   : > { %7634 = vst [vmem:[#allocation27_spill] sm:$0xff] %v7082_v47  ;;  %v2840_v50 = vmax.f32 %v2832_v46, 0.0  ;;  %v2830_v18 = vadd.f32 %v5228_v29, %v2816_v14  ;;  %v2819_v11 = vmul.f32 %v7064_v16, %v7082_v47  ;;  %v7087_v7 = vadd.f32 %v2791_v53, %v7635_v39  ;;  %v6123_v46 = vld [vmem:[%s7554_s8 + $0x20] sm:$0xff]   ;;  %v6125_v14 = vld [vmem:[%s7554_s8 + $0x30] sm:$0xff]   ;;  %v6128_v39 = vld [vmem:[%s7554_s8 + $0x58] sm:$0xff]  }
 0x246   : > { %v2796_v32 = vadd.f32 %v5827_v2, %v2682_v6  ;;  %v2775_v36 = vpop.f32.mrf.mxu0  ;;  %v7647_v53 = vld [vmem:[#allocation16_spill] sm:$0xff]  ;;  %v7648_v2 = vld [vmem:[#allocation18_spill] sm:$0xff] }
 0x247   : > { %7636 = vst [vmem:[#allocation19_spill] sm:$0xff] %v7087_v7  ;;  %2848 = vst.msk [vmem:[#allocation2 + $0x31] sm:$0xff] %vm473_vm1, %v2840_v50  ;;  %v2838_v61 = vmax.f32 %v2830_v18, 0.0  ;;  %v2833_v25 = vadd.f32 %v5228_v29, %v2819_v11  ;;  %v2817_v5 = vmul.f32 %v7064_v16, %v7087_v7  ;;  %v2794_v42 = vadd.f32 %v2775_v36, %v2680_v60  ;;  %v6126_v11 = vld [vmem:[%s7554_s8 + $0x48] sm:$0xff]  }
 0x248   : > { %v7093_v9 = vadd.f32 %v7637_v41, %v2796_v32  ;;  %v5828_v54 = vpop.f32.mrf.mxu0 }
 0x249   : > { %2846 = vst.msk [vmem:[#allocation2 + $0x11] sm:$0xff] %vm473_vm1, %v2838_v61  ;;  %v2841_v19 = vmax.f32 %v2833_v25, 0.0  ;;  %v2831_v27 = vadd.f32 %v5228_v29, %v2817_v5  ;;  %v7097_v17 = vadd.f32 %v2794_v42, %v7639_v62  ;;  %v2797_v1 = vadd.f32 %v5828_v54, %v2683_v45  ;;  %v7649_v42 = vld [vmem:[#allocation12_spill] sm:$0xff] }
 0x24a   : > { %7638 = vst [vmem:[#allocation28_spill] sm:$0xff] %v7093_v9  ;;  %v2822_v34 = vmul.f32 %v7064_v16, %v7093_v9  ;;  %v2778_v4 = vpop.f32.mrf.mxu0 }
 0x24b   : > { %7640 = vst [vmem:[#allocation20_spill] sm:$0xff] %v7097_v17  ;;  %2849 = vst.msk [vmem:[#allocation2 + $0x41] sm:$0xff] %vm473_vm1, %v2841_v19  ;;  %v2839_v51 = vmax.f32 %v2831_v27, 0.0  ;;  %v2820_v10 = vmul.f32 %v7064_v16, %v7097_v17  ;;  %v7105_v59 = vadd.f32 %v7641_v0, %v2797_v1  ;;  %v2795_v48 = vadd.f32 %v2778_v4, %v2681_v49  ;;  %v6127_v4 = vld [vmem:[%s7554_s8 + $0x40] sm:$0xff]   ;;  %v6129_v0 = vld [vmem:[%s7554_s8 + $0x50] sm:$0xff]  }
 0x24c   : > { %v2836_v28 = vadd.f32 %v5228_v29, %v2822_v34 }
 0x24d   : > { %7642 = vst [vmem:[#allocation21_spill] sm:$0xff] %v7105_v59  ;;  %2847 = vst.msk [vmem:[#allocation2 + $0x21] sm:$0xff] %vm473_vm1, %v2839_v51  ;;  %v2834_v35 = vadd.f32 %v5228_v29, %v2820_v10  ;;  %v2823_v56 = vmul.f32 %v7064_v16, %v7105_v59  ;;  %v7111_v37 = vadd.f32 %v2795_v48, %v7643_v15  ;;  %v6130_v48 = vld [vmem:[%s7554_s8 + $0x68] sm:$0xff]  }
 0x24e   : > { %v2844_v21 = vmax.f32 %v2836_v28, 0.0  ;;  %v2857_v58 = vld [vmem:[#allocation2 + $0x30] sm:$0xff] }
 0x24f   : > { %7644 = vst [vmem:[#allocation22_spill] sm:$0xff] %v7111_v37  ;;  %v2842_v43 = vmax.f32 %v2834_v35, 0.0  ;;  %v2837_v13 = vadd.f32 %v5228_v29, %v2823_v56  ;;  %v2821_v26 = vmul.f32 %v7064_v16, %v7111_v37  ;;  %v7125_v16 = vld [vmem:[#allocation2 + $0x31] sm:$0xff] }
 0x250   : > { %2852 = vst.msk [vmem:[#allocation2 + $0x71] sm:$0xff] %vm473_vm1, %v2844_v21  ;;  %v7116_v23 = vld [vmem:[#allocation2 + $0x11] sm:$0xff] }
 0x251   : > { %v2855_v12 = vld [vmem:[#allocation2 + $0x10] sm:$0xff]  ;;  %2850 = vst.msk [vmem:[#allocation2 + $0x51] sm:$0xff] %vm473_vm1, %v2842_v43  ;;  %v2845_v33 = vmax.f32 %v2837_v13, 0.0  ;;  %v2835_v40 = vadd.f32 %v5228_v29, %v2821_v26  ;;  %v2878_v55 = vpack.c.bf16 %v7116_v23, %v7645_v22  ;;  %v6132_v43 = vld [vmem:[%s7554_s8 + $0x78] sm:$0xff]  }
 0x252   : > { %v2862_v8 = vpack.c.bf16 %v2855_v12, %v7646_v30  ;;  %v7146_v52 = vld [vmem:[#allocation2 + $0x41] sm:$0xff]  ;;  %v3066_v32 = vld [vmem:[#allocation2 + $0x12] sm:$0xff] }
 0x253   : > { %2853 = vst.msk [vmem:[#allocation2 + $0x81] sm:$0xff] %vm473_vm1, %v2845_v33  ;;  %v2843_v20 = vmax.f32 %v2835_v40, 0.0  ;;  %5833 = vmatprep.mubr.msk.bf16.mxu1 %vm473_vm1, %v2878_v55  ;;  %v2858_v60 = vld [vmem:[#allocation2 + $0x40] sm:$0xff]  ;;  %v3073_v49 = vpack.c.bf16 %v3066_v32, %v7649_v42  ;;  %v3068_v27 = vld [vmem:[#allocation2 + $0x32] sm:$0xff]  ;;  %v6134_v30 = vld [vmem:[%s7554_s8 + $0x88] sm:$0xff]  }
 0x254   : > { %5845 = vmatprep.mubr.msk.bf16.mxu0 %vm473_vm1, %v2862_v8  ;;  %v7127_v31 = vld [vmem:[#allocation2 + $0x21] sm:$0xff]  ;;  %v3188_v1 = vpack.c.bf16 %v2858_v60, %v2857_v58  ;;  %v6133_v55 = vld [vmem:[%s7554_s8 + $0x70] sm:$0xff]  }
 0x255   : > { %v2856_v38 = vld [vmem:[#allocation2 + $0x20] sm:$0xff]  ;;  %2851 = vst.msk [vmem:[#allocation2 + $0x61] sm:$0xff] %vm473_vm1, %v2843_v20  ;;  %v7132_v29 = vpack.c.bf16 %v7125_v16, %v7127_v31  ;;  %v3301_v13 = vpack.c.bf16 %v7127_v31, %v7116_v23 }
 0x256   : > { %v7134_v44 = vpack.c.bf16 %v2857_v58, %v2856_v38  ;;  %v3187_v41 = vpack.c.bf16 %v2856_v38, %v2855_v12  ;;  %v3067_v54 = vld [vmem:[#allocation2 + $0x22] sm:$0xff]  ;;  %v3302_v12 = vpack.c.bf16 %v7146_v52, %v7125_v16  ;;  %v7650_v58 = vld [vmem:[#allocation13_spill] sm:$0xff] }
 0x257   : > { %5834 = vmatmul.mubr.msk.bf16.vlgmr.msra.gmra.mxu1 %vm473_vm1, %v7132_v29  ;;  %v7168_v45 = vld [vmem:[#allocation2 + $0x71] sm:$0xff]  ;;  %v7182_v62 = vpack.c.bf16 %v3068_v27, %v3067_v54  ;;  %v3069_v34 = vld [vmem:[#allocation2 + $0x42] sm:$0xff]  ;;  %v3415_v26 = vpack.c.bf16 %v3067_v54, %v3066_v32 }
 0x258   : > { %5846 = vmatmul.mubr.msk.bf16.vlgmr.msra.gmra.mxu0 %vm473_vm1, %v7134_v44  ;;  %5854 = vmatpush3.bf16.msra.mxu1 %v7647_v53  ;;  %v7149_v6 = vld [vmem:[#allocation2 + $0x51] sm:$0xff]  ;;  %v3416_v33 = vpack.c.bf16 %v3069_v34, %v3068_v27  ;;  %v6131_v40 = vld [vmem:[%s7554_s8 + $0x60] sm:$0xff]  }
 0x259   : > { %v2859_v63 = vld [vmem:[#allocation2 + $0x50] sm:$0xff]  ;;  %5866 = vmatpush3.bf16.msra.mxu0 %v7648_v2  ;;  %v7154_v50 = vpack.c.bf16 %v7149_v6, %v7146_v52  ;;  %5855 = vmatprep.subr.bf16.mxu1 %v6123_v46  ;;  %v6135_v38 = vld [vmem:[%s7554_s8 + $0x80] sm:$0xff]   ;;  %v6136_v53 = vld [vmem:[%s7555_s9 + $0x18] sm:$0xff]  }
 0x25a   : > { %v7156_v18 = vpack.c.bf16 %v2859_v63, %v2858_v60  ;;  %5867 = vmatprep.subr.bf16.mxu0 %v6125_v14  ;;  %v2861_v61 = vld [vmem:[#allocation2 + $0x70] sm:$0xff]  ;;  %v3186_v35 = vld [vmem:[#allocation2 + $0x80] sm:$0xff]  ;;  %v7270_v2 = vld [vmem:[%s7555_s9 + $0x28] sm:$0xff]  }
 0x25b   : > { %5837 = vmatprep.mubr.msk.bf16.mxu1 %vm473_vm1, %v7154_v50  ;;  %v3070_v19 = vld [vmem:[#allocation2 + $0x52] sm:$0xff]  ;;  %v3190_v21 = vpack.c.bf16 %v3186_v35, %v2861_v61  ;;  %v3300_v8 = vld [vmem:[#allocation2 + $0x81] sm:$0xff]  ;;  %7653 = vst [vmem:[#allocation23_spill] sm:$0xff] %v7270_v2 }
 0x25c   : > { %5849 = vmatprep.mubr.msk.bf16.mxu0 %vm473_vm1, %v7156_v18  ;;  %v2876_v36 = vld [vmem:[#allocation2 + $0x61] sm:$0xff]  ;;  %5856 = vmatpush3.bf16.msra.mxu1 %v6123_v46  ;;  %v7187_v51 = vpack.c.bf16 %v3070_v19, %v3069_v34  ;;  %v3072_v56 = vld [vmem:[#allocation2 + $0x72] sm:$0xff]  ;;  %v3304_v16 = vpack.c.bf16 %v3300_v8, %v7168_v45 }
 0x25d   : > { %v2860_v24 = vld [vmem:[#allocation2 + $0x60] sm:$0xff]  ;;  %5868 = vmatpush3.bf16.msra.mxu0 %v6125_v14  ;;  %v7171_v25 = vpack.c.bf16 %v7168_v45, %v2876_v36  ;;  %5877 = vmatprep.subr.bf16.mxu1 %v6126_v11  ;;  %v3303_v23 = vpack.c.bf16 %v2876_v36, %v7149_v6  ;;  %v7652_v14 = vld [vmem:[#allocation15_spill] sm:$0xff]  ;;  %v6137_v60 = vld [vmem:[%s7555_s9 + $0x10] sm:$0xff]  }
 0x25e   : > { %v7173_v5 = vpack.c.bf16 %v2861_v61, %v2860_v24  ;;  %5889 = vmatprep.subr.bf16.mxu0 %v6128_v39  ;;  %v3189_v10 = vpack.c.bf16 %v2860_v24, %v2859_v63  ;;  %v3071_v28 = vld [vmem:[#allocation2 + $0x62] sm:$0xff] }
 0x25f   : > { %5838 = vmatmul.mubr.msk.bf16.gmra.mxu1 %vm473_vm1, %v7171_v25  ;;  %v3076_v15 = vpack.c.bf16 %v3072_v56, %v3071_v28  ;;  %v3417_v22 = vpack.c.bf16 %v3071_v28, %v3070_v19  ;;  %v3414_v20 = vld [vmem:[#allocation2 + $0x82] sm:$0xff] }
 0x260   : > { %5850 = vmatmul.mubr.msk.bf16.gmra.mxu0 %vm473_vm1, %v7173_v5  ;;  %5857 = vmatprep.mubr.msk.bf16.mxu1 %vm473_vm1, %v3073_v49  ;;  %v3418_v31 = vpack.c.bf16 %v3414_v20, %v3072_v56  ;;  %v3760_v52 = vpack.c.bf16 %v7652_v14, %v3414_v20  ;;  %v6138_v6 = vld [vmem:[%s7555_s9 + $0x8] sm:$0xff]   ;;  %v6139_v63 = vld [vmem:[%s7555_s9] sm:$0xff]  }
 0x261   : > { %5869 = vmatprep.mubr.msk.bf16.mxu0 %vm473_vm1, %v3187_v41 }
 0x267   : > { %5858 = vmatmul.mubr.msk.bf16.vlgmr.msra.gmra.mxu1 %vm473_vm1, %v7182_v62 }
 0x268   : > { %5870 = vmatmul.mubr.msk.bf16.vlgmr.msra.gmra.mxu0 %vm473_vm1, %v3188_v1  ;;  %5878 = vmatpush3.bf16.msra.mxu1 %v6126_v11 }
 0x269   : > { %5861 = vmatprep.mubr.msk.bf16.mxu1 %vm473_vm1, %v7187_v51  ;;  %5873 = vmatprep.mubr.msk.bf16.mxu0 %vm473_vm1, %v3189_v10 }
 0x26a   : > { %5879 = vmatprep.subr.bf16.mxu1 %v6127_v4  ;;  %5890 = vmatpush3.bf16.msra.mxu0 %v6128_v39 }
 0x26b   : > { %5891 = vmatprep.subr.bf16.mxu0 %v6129_v0 }
 0x26c   : > { %5880 = vmatpush3.bf16.msra.mxu1 %v6127_v4 }
 0x26d   : > { %5901 = vmatprep.subr.bf16.mxu1 %v6130_v48 }
 0x26e   : > { %5892 = vmatpush3.bf16.msra.mxu0 %v6129_v0 }
 0x26f   : > { %5862 = vmatmul.mubr.msk.bf16.gmra.mxu1 %vm473_vm1, %v3076_v15  ;;  %5913 = vmatprep.subr.bf16.mxu0 %v6132_v43 }
 0x270   : > { %5874 = vmatmul.mubr.msk.bf16.gmra.mxu0 %vm473_vm1, %v3190_v21  ;;  %5881 = vmatprep.mubr.msk.bf16.mxu1 %vm473_vm1, %v3301_v13 }
 0x271   : > { %5893 = vmatprep.mubr.msk.bf16.mxu0 %vm473_vm1, %v3415_v26 }
 0x277   : > { %5882 = vmatmul.mubr.msk.bf16.vlgmr.msra.gmra.mxu1 %vm473_vm1, %v3302_v12 }
 0x278   : > { %5894 = vmatmul.mubr.msk.bf16.vlgmr.msra.gmra.mxu0 %vm473_vm1, %v3416_v33  ;;  %5902 = vmatpush3.bf16.msra.mxu1 %v6130_v48 }
 0x279   : > { %5885 = vmatprep.mubr.msk.bf16.mxu1 %vm473_vm1, %v3303_v23  ;;  %5897 = vmatprep.mubr.msk.bf16.mxu0 %vm473_vm1, %v3417_v22 }
 0x27a   : > { %5903 = vmatprep.subr.bf16.mxu1 %v6131_v40  ;;  %5914 = vmatpush3.bf16.msra.mxu0 %v6132_v43 }
 0x27b   : > { %5915 = vmatprep.subr.bf16.mxu0 %v6133_v55 }
 0x27c   : > { %5904 = vmatpush3.bf16.msra.mxu1 %v6131_v40 }
 0x27d   : > { %5925 = vmatprep.subr.bf16.mxu1 %v6134_v30 }
 0x27e   : > { %5916 = vmatpush3.bf16.msra.mxu0 %v6133_v55 }
 0x27f   : > { %5886 = vmatmul.mubr.msk.bf16.gmra.mxu1 %vm473_vm1, %v3304_v16  ;;  %5937 = vmatprep.subr.bf16.mxu0 %v6136_v53 }
 0x280   : > { %5898 = vmatmul.mubr.msk.bf16.gmra.mxu0 %vm473_vm1, %v3418_v31  ;;  %5905 = vmatprep.mubr.msk.bf16.mxu1 %vm473_vm1, %v7134_v44  ;;  %v7651_v44 = vld [vmem:[#allocation14_spill] sm:$0xff] }
 0x281   : > { %5917 = vmatprep.mubr.msk.bf16.mxu0 %vm473_vm1, %v7132_v29  ;;  %v3532_v29 = vpack.c.bf16 %v7650_v58, %v3186_v35  ;;  %v3646_v46 = vpack.c.bf16 %v7651_v44, %v3300_v8 }
 0x287   : > { %5906 = vmatmul.mubr.msk.bf16.vlgmr.msra.gmra.mxu1 %vm473_vm1, %v7156_v18 }
 0x288   : > { %5918 = vmatmul.mubr.msk.bf16.vlgmr.msra.gmra.mxu0 %vm473_vm1, %v7154_v50  ;;  %5926 = vmatpush3.bf16.msra.mxu1 %v6134_v30  ;;  %v7276_v50 = vld [vmem:[%s7555_s9 + $0x38] sm:$0xff]  }
 0x289   : > { %5909 = vmatprep.mubr.msk.bf16.mxu1 %vm473_vm1, %v7173_v5  ;;  %5921 = vmatprep.mubr.msk.bf16.mxu0 %vm473_vm1, %v7171_v25  ;;  %7654 = vst [vmem:[#allocation24_spill] sm:$0xff] %v7276_v50 }
 0x28a   : > { %5927 = vmatprep.subr.bf16.mxu1 %v6135_v38  ;;  %5938 = vmatpush3.bf16.msra.mxu0 %v6136_v53 }
 0x28b   : > { %5939 = vmatprep.subr.bf16.mxu0 %v6137_v60 }
 0x28c   : > { %5928 = vmatpush3.bf16.msra.mxu1 %v6135_v38 }
 0x28d   : > { %5949 = vmatprep.subr.bf16.mxu1 %v6138_v6 }
 0x28e   : > { %5940 = vmatpush3.bf16.msra.mxu0 %v6137_v60 }
 0x28f   : > { %5910 = vmatmul.mubr.msk.bf16.gmra.mxu1 %vm473_vm1, %v3532_v29  ;;  %5961 = vmatprep.subr.bf16.mxu0 %v7270_v2 }
 0x290   : > { %5922 = vmatmul.mubr.msk.bf16.gmra.mxu0 %vm473_vm1, %v3646_v46  ;;  %5929 = vmatprep.mubr.msk.bf16.mxu1 %vm473_vm1, %v7182_v62 }
 0x297   : > { %5930 = vmatmul.mubr.msk.bf16.vlgmr.msra.gmra.mxu1 %vm473_vm1, %v7187_v51 }
 0x298   : > { %5933 = vmatprep.mubr.msk.bf16.mxu1 %vm473_vm1, %v3076_v15  ;;  %5950 = vmatpush3.bf16.msra.mxu1 %v6138_v6 }
 0x299   : > { %5951 = vmatprep.subr.bf16.mxu1 %v6139_v63 }
 0x29c   : > { %5952 = vmatpush3.bf16.msra.mxu1 %v6139_v63 }
 0x29d   : > { %5973 = vmatprep.subr.bf16.mxu1 %v7276_v50 }
 0x29f   : > { %5934 = vmatmul.mubr.msk.bf16.gmra.mxu1 %vm473_vm1, %v3760_v52 }
 0x317   : > { %v5835_v18 = vpop.f32.mrf.mxu1 }
 0x318   : > { %v5847_v11 = vpop.f32.mrf.mxu0 }
 0x319   : > { %v2945_v39 = vpop.f32.mrf.mxu1  ;;  %v3043_v44 = vadd.f32 %v5847_v11, %v5835_v18 }
 0x31a   : > { %v3034_v45 = vpop.f32.mrf.mxu0 }
 0x31b   : > { %v5836_v32 = vpop.f32.mrf.mxu1  ;;  %v3035_v52 = vadd.f32 %v3034_v45, %v2945_v39 }
 0x31c   : > { %v5848_v36 = vpop.f32.mrf.mxu0 }
 0x31d   : > { %v2948_v24 = vpop.f32.mrf.mxu1  ;;  %v3046_v63 = vadd.f32 %v5848_v36, %v5836_v32 }
 0x31e   : > { %v3037_v61 = vpop.f32.mrf.mxu0 }
 0x31f   : > { %v5839_v25 = vpop.f32.mrf.mxu1  ;;  %v3038_v17 = vadd.f32 %v3037_v61, %v2948_v24 }
 0x320   : > { %v5851_v5 = vpop.f32.mrf.mxu0 }
 0x321   : > { %v2961_v42 = vpop.f32.mrf.mxu1  ;;  %v3059_v57 = vadd.f32 %v5851_v5, %v5839_v25 }
 0x322   : > { %v3050_v49 = vpop.f32.mrf.mxu0 }
 0x323   : > { %v5840_v41 = vpop.f32.mrf.mxu1  ;;  %v3051_v18 = vadd.f32 %v3050_v49, %v2961_v42 }
 0x324   : > { %v5852_v54 = vpop.f32.mrf.mxu0 }
 0x325   : > { %v7279_v19 = vpop.f32.mrf.mxu1 }
 0x326   : > { %v3053_v27 = vpop.f32.mrf.mxu0 }
 0x327   : > { %v5859_v62 = vpop.f32.mrf.mxu1  ;;  %v3054_v61 = vadd.f32 %v3053_v27, %v7279_v19 }
 0x328   : > { %v5871_v1 = vpop.f32.mrf.mxu0  ;;  %v3173_v53 = vadd.f32 %v5859_v62, %v3043_v44  ;;  %v3062_v62 = vadd.f32 %v5852_v54, %v5840_v41 }
 0x329   : > { %v3140_v34 = vpop.f32.mrf.mxu1 }
 0x32a   : > { %v3254_v4 = vpop.f32.mrf.mxu0  ;;  %v3171_v37 = vadd.f32 %v3140_v34, %v3035_v52  ;;  %v3287_v9 = vadd.f32 %v5871_v1, %v3173_v53 }
 0x32b   : > { %v5860_v51 = vpop.f32.mrf.mxu1 }
 0x32c   : > { %v5872_v10 = vpop.f32.mrf.mxu0  ;;  %v3174_v7 = vadd.f32 %v5860_v51, %v3046_v63  ;;  %v3285_v50 = vadd.f32 %v3254_v4, %v3171_v37 }
 0x32d   : > { %v3143_v0 = vpop.f32.mrf.mxu1 }
 0x32e   : > { %v3257_v48 = vpop.f32.mrf.mxu0  ;;  %v3172_v2 = vadd.f32 %v3143_v0, %v3038_v17 }
 0x32f   : > { %v5863_v28 = vpop.f32.mrf.mxu1 }
 0x330   : > { %v5875_v35 = vpop.f32.mrf.mxu0  ;;  %v3177_v11 = vadd.f32 %v5863_v28, %v3059_v57  ;;  %v3286_v36 = vadd.f32 %v3257_v48, %v3172_v2 }
 0x331   : > { %v3156_v56 = vpop.f32.mrf.mxu1 }
 0x332   : > { %v3270_v15 = vpop.f32.mrf.mxu0  ;;  %v3175_v44 = vadd.f32 %v3156_v56, %v3051_v18  ;;  %v3291_v1 = vadd.f32 %v5875_v35, %v3177_v11  ;;  %v7294_v56 = vld [vmem:[%s7558_s12] ss:$0 sm:$0xff] }
 0x333   : > { %v5864_v21 = vpop.f32.mrf.mxu1 }
 0x334   : > { %v5876_v43 = vpop.f32.mrf.mxu0  ;;  %v3178_v25 = vadd.f32 %v5864_v21, %v3062_v62  ;;  %v3289_v57 = vadd.f32 %v3270_v15, %v3175_v44 }
 0x335   : > { %v3159_v13 = vpop.f32.mrf.mxu1 }
 0x336   : > { %v7281_v26 = vpop.f32.mrf.mxu0  ;;  %v3176_v49 = vadd.f32 %v3159_v13, %v3054_v61  ;;  %v3292_v54 = vadd.f32 %v5876_v43, %v3178_v25 }
 0x337   : > { %v5883_v12 = vpop.f32.mrf.mxu1 }
 0x338   : > { %v5895_v33 = vpop.f32.mrf.mxu0  ;;  %v3290_v27 = vadd.f32 %v7281_v26, %v3176_v49 }
 0x339   : > { %v3368_v40 = vpop.f32.mrf.mxu1 }
 0x33a   : > { %v3482_v23 = vpop.f32.mrf.mxu0  ;;  %v3399_v39 = vadd.f32 %v3368_v40, %v3285_v50 }
 0x33b   : > { %v5884_v22 = vpop.f32.mrf.mxu1 }
 0x33c   : > { %v5896_v55 = vpop.f32.mrf.mxu0  ;;  %v3513_v37 = vadd.f32 %v3482_v23, %v3399_v39 }
 0x33d   : > { %v3371_v30 = vpop.f32.mrf.mxu1 }
 0x33e   : > { %v3485_v8 = vpop.f32.mrf.mxu0  ;;  %v3400_v17 = vadd.f32 %v3371_v30, %v3286_v36 }
 0x33f   : > { %v5887_v20 = vpop.f32.mrf.mxu1 }
 0x340   : > { %v5899_v16 = vpop.f32.mrf.mxu0 }
 0x341   : > { %v3384_v31 = vpop.f32.mrf.mxu1 }
 0x342   : > { %v7283_v38 = vpop.f32.mrf.mxu0  ;;  %v3403_v51 = vadd.f32 %v3384_v31, %v3289_v57 }
 0x343   : > { %7655 = vst [vmem:[#allocation25_spill] sm:$0xff] %v7283_v38  ;;  %v5888_v58 = vpop.f32.mrf.mxu1 }
 0x344   : > { %v7285_v29 = vpop.f32.mrf.mxu0  ;;  %v3406_v35 = vadd.f32 %v5888_v58, %v3292_v54 }
 0x345   : > { %7656 = vst [vmem:[#allocation10_spill] sm:$0xff] %v7285_v29  ;;  %v3387_v46 = vpop.f32.mrf.mxu1  ;;  %v3401_v29 = vadd.f32 %v5883_v12, %v3287_v9 }
 0x346   : > { %v7287_v14 = vpop.f32.mrf.mxu0 }
 0x347   : > { %7657 = vst [vmem:[#allocation11_spill] sm:$0xff] %v7287_v14  ;;  %v5907_v6 = vpop.f32.mrf.mxu1  ;;  %v3288_v14 = vadd.f32 %v5872_v10, %v3174_v7  ;;  %v3515_v34 = vadd.f32 %v5895_v33, %v3401_v29  ;;  %v3405_v7 = vadd.f32 %v5887_v20, %v3291_v1  ;;  %v3514_v10 = vadd.f32 %v3485_v8, %v3400_v17 }
 0x348   : > { %v5919_v60 = vpop.f32.mrf.mxu0  ;;  %v3404_v33 = vadd.f32 %v3387_v46, %v3290_v27 }
 0x349   : > { %v3596_v59 = vpop.f32.mrf.mxu1  ;;  %v3402_v24 = vadd.f32 %v5884_v22, %v3288_v14  ;;  %v3629_v9 = vadd.f32 %v5907_v6, %v3515_v34  ;;  %v3519_v28 = vadd.f32 %v5899_v16, %v3405_v7 }
 0x34a   : > { %v3710_v47 = vpop.f32.mrf.mxu0  ;;  %v3627_v41 = vadd.f32 %v3596_v59, %v3513_v37  ;;  %v7658_v43 = vld [vmem:[#allocation25_spill] sm:$0xff] }
 0x34b   : > { %v5908_v3 = vpop.f32.mrf.mxu1  ;;  %v3516_v4 = vadd.f32 %v5896_v55, %v3402_v24  ;;  %v3743_v0 = vadd.f32 %v5919_v60, %v3629_v9  ;;  %v3517_v12 = vadd.f32 %v7658_v43, %v3403_v51 }
 0x34c   : > { %v5920_v45 = vpop.f32.mrf.mxu0  ;;  %v3741_v21 = vadd.f32 %v3710_v47, %v3627_v41  ;;  %v7659_v8 = vld [vmem:[#allocation10_spill] sm:$0xff] }
 0x34d   : > { %v3599_v38 = vpop.f32.mrf.mxu1  ;;  %v3630_v48 = vadd.f32 %v5908_v3, %v3516_v4  ;;  %v5316_v3 = vld [vmem:[%s7559_s13] ss:$0 sm:$0xff]  ;;  %v3520_v20 = vadd.f32 %v7659_v8, %v3406_v35  ;;  %v7661_v8 = vld [vmem:[#allocation23_spill] sm:$0xff] }
 0x34e   : > { %v3713_v42 = vpop.f32.mrf.mxu0  ;;  %v3628_v13 = vadd.f32 %v3599_v38, %v3514_v10  ;;  %v7660_v46 = vld [vmem:[#allocation11_spill] sm:$0xff] }
 0x34f   : > { %v5911_v32 = vpop.f32.mrf.mxu1  ;;  %v3744_v23 = vadd.f32 %v5920_v45, %v3630_v48  ;;  %v3518_v14 = vadd.f32 %v7660_v46, %v3404_v33  ;;  %v3907_v48 = vld [vmem:[#allocation2] sm:$0xff]  ;;  %v6146_v46 = vld [vmem:[%s7555_s9 + $0x58] sm:$0xff]  }
 0x350   : > { %v5923_v19 = vpop.f32.mrf.mxu0  ;;  %v3633_v40 = vadd.f32 %v5911_v32, %v3519_v28  ;;  %v3742_v31 = vadd.f32 %v3713_v42, %v3628_v13 }
 0x351   : > { %v3612_v5 = vpop.f32.mrf.mxu1 }
 0x352   : > { %v3726_v22 = vpop.f32.mrf.mxu0  ;;  %v3631_v16 = vadd.f32 %v3612_v5, %v3517_v12  ;;  %v3747_v52 = vadd.f32 %v5923_v19, %v3633_v40 }
 0x353   : > { %v5912_v50 = vpop.f32.mrf.mxu1 }
 0x354   : > { %v3634_v53 = vadd.f32 %v5912_v50, %v3520_v20  ;;  %v5924_v60 = vpop.f32.mrf.mxu0  ;;  %v3745_v45 = vadd.f32 %v3726_v22, %v3631_v16  ;;  %v6141_v22 = vld [vmem:[%s7555_s9 + $0x20] sm:$0xff]  }
 0x355   : > { %v3615_v2 = vpop.f32.mrf.mxu1 }
 0x356   : > { %v3632_v62 = vadd.f32 %v3615_v2, %v3518_v14  ;;  %v3748_v61 = vadd.f32 %v5924_v60, %v3634_v53  ;;  %v3729_v25 = vpop.f32.mrf.mxu0 }
 0x357   : > { %v5931_v15 = vpop.f32.mrf.mxu1 }
 0x358   : > { %v3857_v59 = vadd.f32 %v5931_v15, %v3743_v0  ;;  %v3746_v42 = vadd.f32 %v3729_v25, %v3632_v62  ;;  %v3923_v0 = vld [vmem:[#allocation2 + $0x1] sm:$0xff] }
 0x359   : > { %v3824_v26 = vpop.f32.mrf.mxu1 }
 0x35a   : > { %v3871_v55 = vmul.f32 %v7294_v56, %v3857_v59  ;;  %v3855_v30 = vadd.f32 %v3824_v26, %v3741_v21 }
 0x35b   : > { %v5932_v47 = vpop.f32.mrf.mxu1 }
 0x35c   : > { %v3885_v38 = vadd.f32 %v5316_v3, %v3871_v55  ;;  %v3869_v58 = vmul.f32 %v7294_v56, %v3855_v30  ;;  %v3858_v29 = vadd.f32 %v5932_v47, %v3744_v23  ;;  %v6143_v55 = vld [vmem:[%s7555_s9 + $0x30] sm:$0xff]  }
 0x35d   : > { %v3827_v6 = vpop.f32.mrf.mxu1 }
 0x35e   : > { %v3893_v63 = vmax.f32 %v3885_v38, 0.0  ;;  %v3883_v18 = vadd.f32 %v5316_v3, %v3869_v58  ;;  %v3872_v11 = vmul.f32 %v7294_v56, %v3858_v29  ;;  %v3856_v39 = vadd.f32 %v3827_v6, %v3742_v31  ;;  %v7662_v31 = vld [vmem:[#allocation24_spill] sm:$0xff]  ;;  %v6144_v29 = vld [vmem:[%s7555_s9 + $0x48] sm:$0xff]  }
 0x35f   : > { %v5935_v44 = vpop.f32.mrf.mxu1 }
 0x360   : > { %3901 = vst.msk [vmem:[#allocation2 + $0x31] sm:$0xff] %vm473_vm1, %v3893_v63  ;;  %v3891_v32 = vmax.f32 %v3883_v18, 0.0  ;;  %v3886_v36 = vadd.f32 %v5316_v3, %v3872_v11  ;;  %v3870_v34 = vmul.f32 %v7294_v56, %v3856_v39  ;;  %v3861_v24 = vadd.f32 %v5935_v44, %v3747_v52  ;;  %v4118_v52 = vld [vmem:[#allocation2 + $0x2] sm:$0xff] }
 0x361   : > { %v3840_v1 = vpop.f32.mrf.mxu1 }
 0x362   : > { %3899 = vst.msk [vmem:[#allocation2 + $0x11] sm:$0xff] %vm473_vm1, %v3891_v32  ;;  %v3894_v5 = vmax.f32 %v3886_v36, 0.0  ;;  %v3884_v37 = vadd.f32 %v5316_v3, %v3870_v34  ;;  %v3875_v17 = vmul.f32 %v7294_v56, %v3861_v24  ;;  %v3859_v9 = vadd.f32 %v3840_v1, %v3745_v45 }
 0x363   : > { %v5936_v57 = vpop.f32.mrf.mxu1 }
 0x364   : > { %3902 = vst.msk [vmem:[#allocation2 + $0x41] sm:$0xff] %vm473_vm1, %v3894_v5  ;;  %v3892_v49 = vmax.f32 %v3884_v37, 0.0  ;;  %v3889_v7 = vadd.f32 %v5316_v3, %v3875_v17  ;;  %v3873_v50 = vmul.f32 %v7294_v56, %v3859_v9  ;;  %v3862_v4 = vadd.f32 %v5936_v57, %v3748_v61  ;;  %v6145_v61 = vld [vmem:[%s7555_s9 + $0x40] sm:$0xff]   ;;  %v6147_v5 = vld [vmem:[%s7555_s9 + $0x50] sm:$0xff]   ;;  %v6148_v37 = vld [vmem:[%s7555_s9 + $0x68] sm:$0xff]  }
 0x365   : > { %v3843_v41 = vpop.f32.mrf.mxu1 }
 0x366   : > { %3900 = vst.msk [vmem:[#allocation2 + $0x21] sm:$0xff] %vm473_vm1, %v3892_v49  ;;  %v3897_v54 = vmax.f32 %v3889_v7, 0.0  ;;  %v3887_v51 = vadd.f32 %v5316_v3, %v3873_v50  ;;  %v3876_v2 = vmul.f32 %v7294_v56, %v3862_v4  ;;  %v3860_v10 = vadd.f32 %v3843_v41, %v3746_v42  ;;  %v6150_v7 = vld [vmem:[%s7555_s9 + $0x78] sm:$0xff]  }
 0x367   : > { %v7322_v33 = vld [vmem:[#allocation2 + $0x31] sm:$0xff] }
 0x368   : > { %3905 = vst.msk [vmem:[#allocation2 + $0x71] sm:$0xff] %vm473_vm1, %v3897_v54  ;;  %v3895_v19 = vmax.f32 %v3887_v51, 0.0  ;;  %v3890_v27 = vadd.f32 %v5316_v3, %v3876_v2  ;;  %v3874_v28 = vmul.f32 %v7294_v56, %v3860_v10  ;;  %v3910_v26 = vld [vmem:[#allocation2 + $0x30] sm:$0xff]  ;;  %v6149_v51 = vld [vmem:[%s7555_s9 + $0x60] sm:$0xff]  }
 0x369   : > { %v7315_v35 = vld [vmem:[#allocation2 + $0x11] sm:$0xff] }
 0x36a   : > { %v3908_v15 = vld [vmem:[#allocation2 + $0x10] sm:$0xff]  ;;  %3903 = vst.msk [vmem:[#allocation2 + $0x51] sm:$0xff] %vm473_vm1, %v3895_v19  ;;  %v3898_v21 = vmax.f32 %v3890_v27, 0.0  ;;  %v3888_v13 = vadd.f32 %v5316_v3, %v3874_v28  ;;  %v3931_v59 = vpack.c.bf16 %v7315_v35, %v3923_v0 }
 0x36b   : > { %v3915_v43 = vpack.c.bf16 %v3908_v15, %v3907_v48  ;;  %v7343_v30 = vld [vmem:[#allocation2 + $0x41] sm:$0xff]  ;;  %v4119_v53 = vld [vmem:[#allocation2 + $0x12] sm:$0xff] }
 0x36c   : > { %3906 = vst.msk [vmem:[#allocation2 + $0x81] sm:$0xff] %vm473_vm1, %v3898_v21  ;;  %v3896_v12 = vmax.f32 %v3888_v13, 0.0  ;;  %5941 = vmatprep.mubr.msk.bf16.mxu0 %vm473_vm1, %v3931_v59  ;;  %v3911_v16 = vld [vmem:[#allocation2 + $0x40] sm:$0xff]  ;;  %v4126_v39 = vpack.c.bf16 %v4119_v53, %v4118_v52  ;;  %v4121_v32 = vld [vmem:[#allocation2 + $0x32] sm:$0xff]  ;;  %v4355_v41 = vpack.c.bf16 %v7343_v30, %v7322_v33  ;;  %v6152_v48 = vld [vmem:[%s7555_s9 + $0x88] sm:$0xff]  }
 0x36d   : > { %5953 = vmatprep.mubr.msk.bf16.mxu1 %vm473_vm1, %v3915_v43  ;;  %v7324_v56 = vld [vmem:[#allocation2 + $0x21] sm:$0xff]  ;;  %v4241_v34 = vpack.c.bf16 %v3911_v16, %v3910_v26  ;;  %v6151_v0 = vld [vmem:[%s7555_s9 + $0x70] sm:$0xff]  }
 0x36e   : > { %v3909_v40 = vld [vmem:[#allocation2 + $0x20] sm:$0xff]  ;;  %3904 = vst.msk [vmem:[#allocation2 + $0x61] sm:$0xff] %vm473_vm1, %v3896_v12  ;;  %v7329_v3 = vpack.c.bf16 %v7322_v33, %v7324_v56  ;;  %v4354_v50 = vpack.c.bf16 %v7324_v56, %v7315_v35  ;;  %v4581_v21 = vld [vmem:[#allocation2 + $0x90] sm:$0xff] }
 0x36f   : > { %v7331_v23 = vpack.c.bf16 %v3910_v26, %v3909_v40  ;;  %v7365_v14 = vld [vmem:[#allocation2 + $0x71] sm:$0xff]  ;;  %v4240_v45 = vpack.c.bf16 %v3909_v40, %v3908_v15  ;;  %v4120_v62 = vld [vmem:[#allocation2 + $0x22] sm:$0xff] }
 0x370   : > { %5942 = vmatmul.mubr.msk.bf16.vlgmr.msra.gmra.mxu0 %vm473_vm1, %v7329_v3  ;;  %v3914_v63 = vld [vmem:[#allocation2 + $0x70] sm:$0xff]  ;;  %v7378_v36 = vpack.c.bf16 %v4121_v32, %v4120_v62  ;;  %v4122_v24 = vld [vmem:[#allocation2 + $0x42] sm:$0xff]  ;;  %v4468_v4 = vpack.c.bf16 %v4120_v62, %v4119_v53 }
 0x371   : > { %5954 = vmatmul.mubr.msk.bf16.vlgmr.msra.gmra.mxu1 %vm473_vm1, %v7331_v23  ;;  %5962 = vmatpush3.bf16.msra.mxu0 %v7661_v8  ;;  %v7346_v20 = vld [vmem:[#allocation2 + $0x51] sm:$0xff]  ;;  %v4469_v54 = vpack.c.bf16 %v4122_v24, %v4121_v32  ;;  %v6153_v15 = vld [vmem:[%s7555_s9 + $0x80] sm:$0xff]  }
 0x372   : > { %v3912_v47 = vld [vmem:[#allocation2 + $0x50] sm:$0xff]  ;;  %5974 = vmatpush3.bf16.msra.mxu1 %v7662_v31  ;;  %v7351_v38 = vpack.c.bf16 %v7346_v20, %v7343_v30  ;;  %5963 = vmatprep.subr.bf16.mxu0 %v6141_v22 }
 0x373   : > { %v7353_v58 = vpack.c.bf16 %v3912_v47, %v3911_v16  ;;  %5975 = vmatprep.subr.bf16.mxu1 %v6143_v55  ;;  %v4123_v44 = vld [vmem:[#allocation2 + $0x52] sm:$0xff]  ;;  %v4239_v9 = vld [vmem:[#allocation2 + $0x80] sm:$0xff] }
 0x374   : > { %5945 = vmatprep.mubr.msk.bf16.mxu0 %vm473_vm1, %v7351_v38  ;;  %v7383_v1 = vpack.c.bf16 %v4123_v44, %v4122_v24  ;;  %v4125_v42 = vld [vmem:[#allocation2 + $0x72] sm:$0xff]  ;;  %v4243_v49 = vpack.c.bf16 %v4239_v9, %v3914_v63  ;;  %v4353_v19 = vld [vmem:[#allocation2 + $0x81] sm:$0xff]  ;;  %v4585_v59 = vpack.c.bf16 %v4581_v21, %v4239_v9 }
 0x375   : > { %5957 = vmatprep.mubr.msk.bf16.mxu1 %vm473_vm1, %v7353_v58  ;;  %v3929_v6 = vld [vmem:[#allocation2 + $0x61] sm:$0xff]  ;;  %5964 = vmatpush3.bf16.msra.mxu0 %v6141_v22  ;;  %v4357_v28 = vpack.c.bf16 %v4353_v19, %v7365_v14  ;;  %v4695_v13 = vld [vmem:[#allocation2 + $0x91] sm:$0xff] }
 0x376   : > { %v3913_v60 = vld [vmem:[#allocation2 + $0x60] sm:$0xff]  ;;  %5976 = vmatpush3.bf16.msra.mxu1 %v6143_v55  ;;  %v7368_v18 = vpack.c.bf16 %v7365_v14, %v3929_v6  ;;  %5985 = vmatprep.subr.bf16.mxu0 %v6144_v29  ;;  %v4356_v2 = vpack.c.bf16 %v3929_v6, %v7346_v20  ;;  %v4699_v43 = vpack.c.bf16 %v4695_v13, %v4353_v19  ;;  %v4809_v12 = vld [vmem:[#allocation2 + $0x92] sm:$0xff] }
 0x377   : > { %v7370_v11 = vpack.c.bf16 %v3914_v63, %v3913_v60  ;;  %5997 = vmatprep.subr.bf16.mxu1 %v6146_v46  ;;  %v4242_v25 = vpack.c.bf16 %v3913_v60, %v3912_v47  ;;  %v4124_v17 = vld [vmem:[#allocation2 + $0x62] sm:$0xff] }
 0x378   : > { %5946 = vmatmul.mubr.msk.bf16.gmra.mxu0 %vm473_vm1, %v7368_v18  ;;  %v4129_v57 = vpack.c.bf16 %v4125_v42, %v4124_v17  ;;  %v4470_v10 = vpack.c.bf16 %v4124_v17, %v4123_v44  ;;  %v4467_v27 = vld [vmem:[#allocation2 + $0x82] sm:$0xff] }
 0x379   : > { %5958 = vmatmul.mubr.msk.bf16.gmra.mxu1 %vm473_vm1, %v7370_v11  ;;  %5965 = vmatprep.mubr.msk.bf16.mxu0 %vm473_vm1, %v4126_v39  ;;  %v4471_v35 = vpack.c.bf16 %v4467_v27, %v4125_v42  ;;  %v4813_v33 = vpack.c.bf16 %v4809_v12, %v4467_v27 }
 0x37a   : > { %5977 = vmatprep.mubr.msk.bf16.mxu1 %vm473_vm1, %v4240_v45 }
 0x380   : > { %5966 = vmatmul.mubr.msk.bf16.vlgmr.msra.gmra.mxu0 %vm473_vm1, %v7378_v36 }
 0x381   : > { %5978 = vmatmul.mubr.msk.bf16.vlgmr.msra.gmra.mxu1 %vm473_vm1, %v4241_v34  ;;  %5986 = vmatpush3.bf16.msra.mxu0 %v6144_v29 }
 0x382   : > { %5969 = vmatprep.mubr.msk.bf16.mxu0 %vm473_vm1, %v7383_v1  ;;  %5981 = vmatprep.mubr.msk.bf16.mxu1 %vm473_vm1, %v4242_v25 }
 0x383   : > { %5987 = vmatprep.subr.bf16.mxu0 %v6145_v61  ;;  %5998 = vmatpush3.bf16.msra.mxu1 %v6146_v46 }
 0x384   : > { %5999 = vmatprep.subr.bf16.mxu1 %v6147_v5 }
 0x385   : > { %5988 = vmatpush3.bf16.msra.mxu0 %v6145_v61 }
 0x386   : > { %6009 = vmatprep.subr.bf16.mxu0 %v6148_v37 }
 0x387   : > { %6000 = vmatpush3.bf16.msra.mxu1 %v6147_v5 }
 0x388   : > { %5970 = vmatmul.mubr.msk.bf16.gmra.mxu0 %vm473_vm1, %v4129_v57  ;;  %6021 = vmatprep.subr.bf16.mxu1 %v6150_v7 }
 0x389   : > { %5982 = vmatmul.mubr.msk.bf16.gmra.mxu1 %vm473_vm1, %v4243_v49  ;;  %5989 = vmatprep.mubr.msk.bf16.mxu0 %vm473_vm1, %v4354_v50 }
 0x38a   : > { %6001 = vmatprep.mubr.msk.bf16.mxu1 %vm473_vm1, %v4468_v4 }
 0x390   : > { %5990 = vmatmul.mubr.msk.bf16.vlgmr.msra.gmra.mxu0 %vm473_vm1, %v4355_v41 }
 0x391   : > { %6002 = vmatmul.mubr.msk.bf16.vlgmr.msra.gmra.mxu1 %vm473_vm1, %v4469_v54  ;;  %6010 = vmatpush3.bf16.msra.mxu0 %v6148_v37 }
 0x392   : > { %5993 = vmatprep.mubr.msk.bf16.mxu0 %vm473_vm1, %v4356_v2  ;;  %6005 = vmatprep.mubr.msk.bf16.mxu1 %vm473_vm1, %v4470_v10 }
 0x393   : > { %6011 = vmatprep.subr.bf16.mxu0 %v6149_v51  ;;  %6022 = vmatpush3.bf16.msra.mxu1 %v6150_v7 }
 0x394   : > { %6023 = vmatprep.subr.bf16.mxu1 %v6151_v0 }
 0x395   : > { %6012 = vmatpush3.bf16.msra.mxu0 %v6149_v51 }
 0x396   : > { %6033 = vmatprep.subr.bf16.mxu0 %v6152_v48 }
 0x397   : > { %6024 = vmatpush3.bf16.msra.mxu1 %v6151_v0 }
 0x398   : > { %5994 = vmatmul.mubr.msk.bf16.gmra.mxu0 %vm473_vm1, %v4357_v28 }
 0x399   : > { %6006 = vmatmul.mubr.msk.bf16.gmra.mxu1 %vm473_vm1, %v4471_v35  ;;  %6013 = vmatprep.mubr.msk.bf16.mxu0 %vm473_vm1, %v7331_v23 }
 0x39a   : > { %6025 = vmatprep.mubr.msk.bf16.mxu1 %vm473_vm1, %v7329_v3 }
 0x3a0   : > { %6014 = vmatmul.mubr.msk.bf16.vlgmr.msra.gmra.mxu0 %vm473_vm1, %v7353_v58 }
 0x3a1   : > { %6026 = vmatmul.mubr.msk.bf16.vlgmr.msra.gmra.mxu1 %vm473_vm1, %v7351_v38  ;;  %6034 = vmatpush3.bf16.msra.mxu0 %v6152_v48 }
 0x3a2   : > { %6017 = vmatprep.mubr.msk.bf16.mxu0 %vm473_vm1, %v7370_v11  ;;  %6029 = vmatprep.mubr.msk.bf16.mxu1 %vm473_vm1, %v7368_v18 }
 0x3a3   : > { %6035 = vmatprep.subr.bf16.mxu0 %v6153_v15 }
 0x3a5   : > { %6036 = vmatpush3.bf16.msra.mxu0 %v6153_v15 }
 0x3a8   : > { %6018 = vmatmul.mubr.msk.bf16.gmra.mxu0 %vm473_vm1, %v4585_v59 }
 0x3a9   : > { %6030 = vmatmul.mubr.msk.bf16.gmra.mxu1 %vm473_vm1, %v4699_v43  ;;  %6037 = vmatprep.mubr.msk.bf16.mxu0 %vm473_vm1, %v7378_v36 }
 0x3b0   : > { %6038 = vmatmul.mubr.msk.bf16.vlgmr.msra.gmra.mxu0 %vm473_vm1, %v7383_v1 }
 0x3b1   : > { %6041 = vmatprep.mubr.msk.bf16.mxu0 %vm473_vm1, %v4129_v57 }
 0x3b8   : > { %6042 = vmatmul.mubr.msk.bf16.gmra.mxu0 %vm473_vm1, %v4813_v33 }
 0x430   : > { %v5943_v56 = vpop.f32.mrf.mxu0 }
 0x431   : > { %v5955_v40 = vpop.f32.mrf.mxu1 }
 0x432   : > { %v3998_v26 = vpop.f32.mrf.mxu0  ;;  %v4096_v41 = vadd.f32 %v5955_v40, %v5943_v56 }
 0x433   : > { %v4087_v3 = vpop.f32.mrf.mxu1 }
 0x434   : > { %v5944_v23 = vpop.f32.mrf.mxu0  ;;  %v4088_v2 = vadd.f32 %v4087_v3, %v3998_v26 }
 0x435   : > { %v5956_v22 = vpop.f32.mrf.mxu1 }
 0x436   : > { %v4001_v55 = vpop.f32.mrf.mxu0  ;;  %v4099_v19 = vadd.f32 %v5956_v22, %v5944_v23 }
 0x437   : > { %v4090_v30 = vpop.f32.mrf.mxu1 }
 0x438   : > { %v5947_v8 = vpop.f32.mrf.mxu0  ;;  %v4091_v35 = vadd.f32 %v4090_v30, %v4001_v55 }
 0x439   : > { %v5959_v20 = vpop.f32.mrf.mxu1 }
 0x43a   : > { %v4014_v16 = vpop.f32.mrf.mxu0  ;;  %v4112_v43 = vadd.f32 %v5959_v20, %v5947_v8 }
 0x43b   : > { %v4103_v47 = vpop.f32.mrf.mxu1 }
 0x43c   : > { %v5948_v31 = vpop.f32.mrf.mxu0  ;;  %v4104_v56 = vadd.f32 %v4103_v47, %v4014_v16 }
 0x43d   : > { %v5960_v38 = vpop.f32.mrf.mxu1 }
 0x43e   : > { %v7448_v58 = vpop.f32.mrf.mxu0  ;;  %v4115_v3 = vadd.f32 %v5960_v38, %v5948_v31 }
 0x43f   : > { %v4106_v29 = vpop.f32.mrf.mxu1 }
 0x440   : > { %v5967_v46 = vpop.f32.mrf.mxu0 }
 0x441   : > { %v5979_v14 = vpop.f32.mrf.mxu1  ;;  %v4226_v10 = vadd.f32 %v5967_v46, %v4096_v41 }
 0x442   : > { %v4193_v52 = vpop.f32.mrf.mxu0 }
 0x443   : > { %v4307_v53 = vpop.f32.mrf.mxu1  ;;  %v4224_v27 = vadd.f32 %v4193_v52, %v4088_v2  ;;  %v4340_v15 = vadd.f32 %v5979_v14, %v4226_v10  ;;  %v4107_v14 = vadd.f32 %v4106_v29, %v7448_v58 }
 0x444   : > { %v5968_v6 = vpop.f32.mrf.mxu0 }
 0x445   : > { %v5980_v60 = vpop.f32.mrf.mxu1  ;;  %v4227_v21 = vadd.f32 %v5968_v6, %v4099_v19  ;;  %v4338_v12 = vadd.f32 %v4307_v53, %v4224_v27 }
 0x446   : > { %v4196_v63 = vpop.f32.mrf.mxu0 }
 0x447   : > { %v4310_v18 = vpop.f32.mrf.mxu1  ;;  %v4225_v33 = vadd.f32 %v4196_v63, %v4091_v35 }
 0x448   : > { %v5971_v11 = vpop.f32.mrf.mxu0 }
 0x449   : > { %v5983_v39 = vpop.f32.mrf.mxu1  ;;  %v4339_v22 = vadd.f32 %v4310_v18, %v4225_v33 }
 0x44a   : > { %v4209_v45 = vpop.f32.mrf.mxu0 }
 0x44b   : > { %v4323_v62 = vpop.f32.mrf.mxu1  ;;  %v4228_v46 = vadd.f32 %v4209_v45, %v4104_v56 }
 0x44c   : > { %v5972_v44 = vpop.f32.mrf.mxu0 }
 0x44d   : > { %v7450_v32 = vpop.f32.mrf.mxu1  ;;  %v4231_v52 = vadd.f32 %v5972_v44, %v4115_v3  ;;  %v4342_v47 = vadd.f32 %v4323_v62, %v4228_v46  ;;  %v7672_v46 = vld [vmem:[#allocation19_spill] sm:$0xff] }
 0x44e   : > { %v4212_v36 = vpop.f32.mrf.mxu0 }
 0x44f   : > { %v7452_v34 = vpop.f32.mrf.mxu1  ;;  %v4345_v18 = vadd.f32 %v7450_v32, %v4231_v52 }
 0x450   : > { %v5991_v24 = vpop.f32.mrf.mxu0 }
 0x451   : > { %v6003_v61 = vpop.f32.mrf.mxu1 }
 0x452   : > { %v4421_v1 = vpop.f32.mrf.mxu0 }
 0x453   : > { %v4535_v25 = vpop.f32.mrf.mxu1  ;;  %v4452_v26 = vadd.f32 %v4421_v1, %v4338_v12 }
 0x454   : > { %v5992_v5 = vpop.f32.mrf.mxu0 }
 0x455   : > { %v6004_v37 = vpop.f32.mrf.mxu1  ;;  %v4566_v53 = vadd.f32 %v4535_v25, %v4452_v26 }
 0x456   : > { %v4424_v17 = vpop.f32.mrf.mxu0 }
 0x457   : > { %v4538_v9 = vpop.f32.mrf.mxu1  ;;  %v4453_v6 = vadd.f32 %v4424_v17, %v4339_v22 }
 0x458   : > { %v5995_v42 = vpop.f32.mrf.mxu0 }
 0x459   : > { %v6007_v57 = vpop.f32.mrf.mxu1  ;;  %v4567_v58 = vadd.f32 %v4538_v9, %v4453_v6  ;;  %v7667_v9 = vld [vmem:[#allocation26_spill] sm:$0xff]  ;;  %v7674_v6 = vld [vmem:[#allocation20_spill] sm:$0xff] }
 0x45a   : > { %v4437_v49 = vpop.f32.mrf.mxu0 }
 0x45b   : > { %v7454_v7 = vpop.f32.mrf.mxu1 }
 0x45c   : > { %7663 = vst [vmem:[#allocation16_spill] sm:$0xff] %v7454_v7  ;;  %v5996_v50 = vpop.f32.mrf.mxu0  ;;  %v4341_v7 = vadd.f32 %v5980_v60, %v4227_v21  ;;  %v4229_v60 = vadd.f32 %v4212_v36, %v4107_v14 }
 0x45d   : > { %v7456_v4 = vpop.f32.mrf.mxu1  ;;  %v4459_v1 = vadd.f32 %v5996_v50, %v4345_v18 }
 0x45e   : > { %7664 = vst [vmem:[#allocation18_spill] sm:$0xff] %v7456_v4  ;;  %v4440_v54 = vpop.f32.mrf.mxu0  ;;  %v4454_v4 = vadd.f32 %v5991_v24, %v4340_v15  ;;  %v4455_v30 = vadd.f32 %v5992_v5, %v4341_v7  ;;  %v4456_v24 = vadd.f32 %v4437_v49, %v4342_v47 }
 0x45f   : > { %v7458_v51 = vpop.f32.mrf.mxu1 }
 0x460   : > { %7665 = vst [vmem:[#allocation12_spill] sm:$0xff] %v7458_v51  ;;  %v6015_v0 = vpop.f32.mrf.mxu0  ;;  %v4230_v51 = vadd.f32 %v5971_v11, %v4112_v43  ;;  %v4568_v55 = vadd.f32 %v6003_v61, %v4454_v4  ;;  %v4569_v38 = vadd.f32 %v6004_v37, %v4455_v30  ;;  %v7671_v43 = vld [vmem:[#allocation27_spill] sm:$0xff]  ;;  %v7673_v30 = vld [vmem:[#allocation28_spill] sm:$0xff] }
 0x461   : > { %v6027_v48 = vpop.f32.mrf.mxu1 }
 0x462   : > { %v4649_v28 = vpop.f32.mrf.mxu0  ;;  %v4344_v20 = vadd.f32 %v5983_v39, %v4230_v51  ;;  %v4682_v16 = vadd.f32 %v6015_v0, %v4568_v55  ;;  %v4343_v39 = vadd.f32 %v7452_v34, %v4229_v60 }
 0x463   : > { %v4763_v13 = vpop.f32.mrf.mxu1  ;;  %v4680_v45 = vadd.f32 %v4649_v28, %v4566_v53 }
 0x464   : > { %v6016_v59 = vpop.f32.mrf.mxu0  ;;  %v4458_v11 = vadd.f32 %v5995_v42, %v4344_v20  ;;  %v4796_v29 = vadd.f32 %v6027_v48, %v4682_v16  ;;  %v7666_v42 = vld [vmem:[#allocation16_spill] sm:$0xff]  ;;  %v4457_v4 = vadd.f32 %v4440_v54, %v4343_v39 }
 0x465   : > { %v6028_v41 = vpop.f32.mrf.mxu1  ;;  %v4683_v44 = vadd.f32 %v6016_v59, %v4569_v38  ;;  %v4794_v5 = vadd.f32 %v4763_v13, %v4680_v45  ;;  %v4570_v7 = vadd.f32 %v7666_v42, %v4456_v24  ;;  %v7668_v0 = vld [vmem:[#allocation18_spill] sm:$0xff] }
 0x466   : > { %v4652_v40 = vpop.f32.mrf.mxu0  ;;  %v4572_v25 = vadd.f32 %v6007_v57, %v4458_v11  ;;  %v4573_v48 = vadd.f32 %v7668_v0, %v4459_v1  ;;  %v7669_v57 = vld [vmem:[#allocation17_spill] sm:$0xff]  ;;  %v7676_v11 = vld [vmem:[#allocation22_spill] sm:$0xff] }
 0x467   : > { %v4766_v63 = vpop.f32.mrf.mxu1  ;;  %v4681_v17 = vadd.f32 %v4652_v40, %v4567_v58  ;;  %v4797_v49 = vadd.f32 %v6028_v41, %v4683_v44  ;;  %v7670_v35 = vld [vmem:[#allocation12_spill] sm:$0xff] }
 0x468   : > { %v6019_v23 = vpop.f32.mrf.mxu0  ;;  %v4571_v15 = vadd.f32 %v7670_v35, %v4457_v4 }
 0x469   : > { %v6031_v62 = vpop.f32.mrf.mxu1  ;;  %v4686_v51 = vadd.f32 %v6019_v23, %v4572_v25  ;;  %v4795_v50 = vadd.f32 %v4766_v63, %v4681_v17  ;;  %v7675_v63 = vld [vmem:[#allocation21_spill] sm:$0xff] }
 0x46a   : > { %v4665_v8 = vpop.f32.mrf.mxu0 }
 0x46b   : > { %v4779_v19 = vpop.f32.mrf.mxu1  ;;  %v4684_v27 = vadd.f32 %v4665_v8, %v4570_v7  ;;  %v4800_v13 = vadd.f32 %v6031_v62, %v4686_v51 }
 0x46c   : > { %v6020_v31 = vpop.f32.mrf.mxu0 }
 0x46d   : > { %v4687_v59 = vadd.f32 %v6020_v31, %v4573_v48  ;;  %v6032_v56 = vpop.f32.mrf.mxu1  ;;  %v4798_v26 = vadd.f32 %v4779_v19, %v4684_v27 }
 0x46e   : > { %v4668_v61 = vpop.f32.mrf.mxu0 }
 0x46f   : > { %v4685_v3 = vadd.f32 %v4668_v61, %v4571_v15  ;;  %v4801_v55 = vadd.f32 %v6032_v56, %v4687_v59  ;;  %v4782_v8 = vpop.f32.mrf.mxu1 }
 0x470   : > { %v6039_v36 = vpop.f32.mrf.mxu0 }
 0x471   : > { %v4910_v37 = vadd.f32 %v6039_v36, %v4796_v29  ;;  %v4799_v53 = vadd.f32 %v4782_v8, %v4685_v3 }
 0x472   : > { %v4877_v32 = vpop.f32.mrf.mxu0 }
 0x473   : > { %v4918_v2 = vadd.f32 %v4910_v37, %v7667_v9  ;;  %v4908_v10 = vadd.f32 %v4877_v32, %v4794_v5 }
 0x474   : > { %v6040_v34 = vpop.f32.mrf.mxu0 }
 0x475   : > { %4926 = vst.msk [vmem:[%s7469_s20 + $0x10] sm:$0xff] %vm473_vm1, %v4918_v2  ;;  %v4916_v54 = vadd.f32 %v4908_v10, %v7669_v57  ;;  %v4911_v28 = vadd.f32 %v6040_v34, %v4797_v49 }
 0x476   : > { %v4880_v21 = vpop.f32.mrf.mxu0 }
 0x477   : > { %4924 = vst.msk [vmem:[%s7469_s20] sm:$0xff] %vm473_vm1, %v4916_v54  ;;  %v4919_v12 = vadd.f32 %v4911_v28, %v7671_v43  ;;  %v4909_v33 = vadd.f32 %v4880_v21, %v4795_v50 }
 0x478   : > { %v6043_v40 = vpop.f32.mrf.mxu0 }
 0x479   : > { %4927 = vst.msk [vmem:[%s7469_s20 + $0x18] sm:$0xff] %vm473_vm1, %v4919_v12  ;;  %v4917_v41 = vadd.f32 %v4909_v33, %v7672_v46  ;;  %v4914_v23 = vadd.f32 %v6043_v40, %v4800_v13 }
 0x47a   : > { %v4893_v22 = vpop.f32.mrf.mxu0 }
 0x47b   : > { %4925 = vst.msk [vmem:[%s7469_s20 + $0x8] sm:$0xff] %vm473_vm1, %v4917_v41  ;;  %v4922_v14 = vadd.f32 %v4914_v23, %v7673_v30  ;;  %v4912_v52 = vadd.f32 %v4893_v22, %v4798_v26 }
 0x47c   : > { %v6044_v20 = vpop.f32.mrf.mxu0 }
 0x47d   : > { %4930 = vst.msk [vmem:[%s7469_s20 + $0x30] sm:$0xff] %vm473_vm1, %v4922_v14  ;;  %v4920_v16 = vadd.f32 %v4912_v52, %v7674_v6  ;;  %v4915_v47 = vadd.f32 %v6044_v20, %v4801_v55 }
 0x47e   : > { %v4896_v60 = vpop.f32.mrf.mxu0 }
 0x47f   : > { %4928 = vst.msk [vmem:[%s7469_s20 + $0x20] sm:$0xff] %vm473_vm1, %v4920_v16  ;;  %v4923_v31 = vadd.f32 %v4915_v47, %v7675_v63  ;;  %v4913_v38 = vadd.f32 %v4896_v60, %v4799_v53 }
 0x481   : > { %4931 = vst.msk [vmem:[%s7469_s20 + $0x38] sm:$0xff] %vm473_vm1, %v4923_v31  ;;  %v4921_v45 = vadd.f32 %v4913_v38, %v7676_v11 }
 0x483   : > { %4929 = vst.msk [vmem:[%s7469_s20 + $0x28] sm:$0xff] %vm473_vm1, %v4921_v45 }
 0x484   : > { %6167 = shalt.err (!%p6164_p3)
}
 0x485   : > { %s6168_s24 = scalar_lea.hbm %s7495_s18, 1024  ;;  %s6172_s26 = scalar_lea.hbm %s7560_s14, 2048 }
 0x486   : > { %p6169_p4 = scmp.ne.s32.totalorder %s7495_s18, %s6168_s24  ;;  %p6173_p9 = scmp.lt.s32.totalorder %s7495_s18, %s7560_s14 }
 0x487   : > { %p6174_p10 = scmp.lt.s32.totalorder %s6172_s26, %s6168_s24 }
 0x488   : > { %p6170_p7 = pnand %p6169_p4, %p6333_p5 }
 0x489   : > { %p6175_p11 = por %p6174_p10, %p6173_p9 }
 0x48a   : > { %p6171_p8 = pneg %p6170_p7 }
 0x48c   : > { %p6176_p12 = pnand %p6175_p11, %p6171_p8 }
 0x48e   : > { %6179 = shalt.err (!%p6176_p12)
}
 0x48f   : > { %s6218_s19 = smov 128   ;;  %s6219_s15 = smov 8  }
 0x490   : > { %6048 = dma.vmem_to_hbm [thread:$0]  (%p6333_p5), %s7497_s25, 1024, %s7495_s18, %s7506_s17, %s6218_s19, %s6218_s19, %s6219_s15  }
 0x491 PF: > { %p6054_p13 = scmp.ge.s32.totalorder %s6214_s16, 2  ;;  %s4961_s20 = sand.u32 1, %s6202_s29  }
 0x492   : > { %s4962_s24 = scalar_lea.sflag [#allocation4], %s4961_s20 }
 0x493   : > { %p6051_p0 = pnand %p6054_p13, %p6337_p6 }
 0x495   : > { %p6052_p1 = pneg %p6051_p0 }
 0x497   : > { %6197 = dma.done.wait (%p6052_p1), %s4962_s24, 1024  }
 0x498   : > { %6199 = vsyncadd (%p6052_p1), %s4962_s24, 4294966272  ;;  %s7678_s16 = sld [smem:[#allocation7_spill]]  ;;  %s7681_s29 = smov %s6206_s30 }
 0x499   : > { %s7679_s21 = sld [smem:[#allocation6_spill]] }
 0x49a   : > { %s7680_s15 = sld [smem:[#allocation8_spill]] }
 0x49e   : > { %p24_p2 = scmp.ge.s32.totalorder %s7678_s16, 4  }
 0x49f   : > { %s7682_s30 = smov %s7679_s21 }
 0x4a0   :  { %26 = sbr.rel (!%p24_p2) target bundleno = 3 (0x3), region = 150 }
 0x4a5   :  { %4967 = vsyncpa [#allocation4], 1 }
 0x4a6   :  { %4969 = vsyncpa [#allocation4 + $0x1], 1 }

</bundles_post_ra>
